<compile_context>
chip_gen: v7x
topology: tpu7x:2x2x1
jax: 0.10.0
libtpu: 0.0.40
codegen_flags: <defaults>
</compile_context>

<pallas_src>
import functools

import jax
import jax.numpy as jnp
from jax.experimental import pallas as pl
from jax.experimental.pallas import tpu as pltpu


LATENT_DIM = 100
OUT_SHAPE = 31          # credit-card dataset feature count (data.shape[1])
HIDDEN = (128, 256, 512, 1024)
BN_EPS = 0.8
LRELU_SLOPE = 0.2

K_PAD = 128             # latent / contraction dim padded to a lane multiple
OUT_PAD = 128           # output dim padded to a lane multiple
MIN_ROWS = 16           # bf16 LHS packs 16 rows per vreg sublane group

# Offsets of the packed small per-feature vectors inside the (1, 3840) slab.
_VO_B0, _VO_B4 = 0, 128
_VO_G1, _VO_BE1 = 256, 512
_VO_G2, _VO_BE2 = 768, 1280
_VO_G3, _VO_BE3 = 1792, 2816
_VEC_LEN = 3840


def _round_up(x, m):
    return (x + m - 1) // m * m


def _lrelu(x):
    return jnp.maximum(x, LRELU_SLOPE * x)


# ----------------------------------------------------------------------------
# Kernel (one independent PyTorch batch per grid step)
# ----------------------------------------------------------------------------
def _generator_kernel(z_ref,
                      w0_ref, w1_ref, w2_ref, w3_ref, w4_ref,
                      vec_ref,
                      out_ref,
                      *, n_valid, n_rows):
    # Per-row weights for batch statistics: 1/B for real rows, 0 for pad rows
    # (n_valid / n_rows are trace-time constants).
    row = jax.lax.broadcasted_iota(jnp.int32, (n_rows, 1), 0)
    rw = jnp.where(row < n_valid,
                   jnp.float32(1.0 / n_valid), jnp.float32(0.0))

    def matmul(x, w_ref):
        # bf16 operands on the MXU, f32 accumulation.
        return jnp.dot(x.astype(jnp.bfloat16), w_ref[...],
                       preferred_element_type=jnp.float32)

    def bn_lrelu(x, g, be):
        # PyTorch train-mode BatchNorm1d: batch mean, biased batch variance,
        # over the real rows only; fused into a single scale+shift pass.
        # E[x^2]-E[x]^2 form is safe only because BN_EPS=0.8 is large.
        mu = jnp.sum(x * rw, axis=0, keepdims=True)           # (1, F)
        ex2 = jnp.sum((x * x) * rw, axis=0, keepdims=True)    # (1, F)
        var = ex2 - mu * mu
        scale = g * jax.lax.rsqrt(var + BN_EPS)
        shift = be - mu * scale
        return _lrelu(x * scale + shift)

    # Static, 128-lane-aligned views into the packed vector slab.
    b0 = vec_ref[:, _VO_B0:_VO_B0 + HIDDEN[0]]
    b4 = vec_ref[:, _VO_B4:_VO_B4 + OUT_PAD]
    g1 = vec_ref[:, _VO_G1:_VO_G1 + HIDDEN[1]]
    be1 = vec_ref[:, _VO_BE1:_VO_BE1 + HIDDEN[1]]
    g2 = vec_ref[:, _VO_G2:_VO_G2 + HIDDEN[2]]
    be2 = vec_ref[:, _VO_BE2:_VO_BE2 + HIDDEN[2]]
    g3 = vec_ref[:, _VO_G3:_VO_G3 + HIDDEN[3]]
    be3 = vec_ref[:, _VO_BE3:_VO_BE3 + HIDDEN[3]]

    # block(latent, 128, normalize=False): Linear + LeakyReLU.
    x = _lrelu(matmul(z_ref[...], w0_ref) + b0)
    # block(128,256) / block(256,512) / block(512,1024):
    # Linear (bias dropped -- train-mode BN cancels it exactly) + BN + LReLU.
    x = bn_lrelu(matmul(x, w1_ref), g1, be1)
    x = bn_lrelu(matmul(x, w2_ref), g2, be2)
    x = bn_lrelu(matmul(x, w3_ref), g3, be3)
    # Linear(1024, out_shape) -> Tanh (out dim zero-padded to 128 lanes).
    out_ref[...] = jnp.tanh(matmul(x, w4_ref) + b4)


# ----------------------------------------------------------------------------
# Parameters (PyTorch-style init) + one-time kernel-arg preparation
# ----------------------------------------------------------------------------
def init_generator_params(key, latent_dim=LATENT_DIM, out_shape=OUT_SHAPE):
    """Deterministic PyTorch-style init. Weights returned as (in, out), f32."""
    dims = [latent_dim, *HIDDEN, out_shape]
    params = []
    for i in range(len(dims) - 1):
        fan_in, fan_out = dims[i], dims[i + 1]
        key, kw, kb = jax.random.split(key, 3)
        bound = 1.0 / jnp.sqrt(jnp.float32(fan_in))
        w = jax.random.uniform(kw, (fan_in, fan_out), jnp.float32, -bound, bound)
        b = jax.random.uniform(kb, (1, fan_out), jnp.float32, -bound, bound)
        params.append((w, b))
    bn_params = [(jnp.ones((1, d), jnp.float32), jnp.zeros((1, d), jnp.float32))
                 for d in HIDDEN[1:]]
    return params, bn_params


def prep_generator_params(lin_params, bn_params):
    """One-time prep (hoisted out of the per-call path):
    * zero-pad edge layers to lane-dense widths (latent 100->128, out 31->128),
    * cast all weight matrices to bf16,
    * drop b1/b2/b3 (exactly cancelled by train-mode BatchNorm),
    * pack b0, b4 and BN gamma/beta into one lane-dense (1, 3840) f32 slab.
    """
    (w0, b0), (w1, _b1), (w2, _b2), (w3, _b3), (w4, b4) = lin_params
    (g1, be1), (g2, be2), (g3, be3) = bn_params

    w0p = jnp.zeros((K_PAD, HIDDEN[0]), jnp.float32).at[:w0.shape[0], :].set(w0)
    w4p = jnp.zeros((HIDDEN[3], OUT_PAD), jnp.float32).at[:, :w4.shape[1]].set(w4)
    b4p = jnp.zeros((1, OUT_PAD), jnp.float32).at[:, :b4.shape[1]].set(b4)

    vec = jnp.concatenate([b0, b4p, g1, be1, g2, be2, g3, be3], axis=1)
    assert vec.shape == (1, _VEC_LEN), vec.shape

    ws = tuple(w.astype(jnp.bfloat16) for w in (w0p, w1, w2, w3, w4p))
    return (*ws, vec.astype(jnp.float32))


# ----------------------------------------------------------------------------
# Jitted forward (grid over independent batches, weights VMEM-resident)
# ----------------------------------------------------------------------------
@jax.jit
def _generator_call(z3, w0, w1, w2, w3, w4, vec):
    """z3: (G, B, LATENT_DIM) -> (G, B, OUT_SHAPE). Each grid step is one
    independent PyTorch forward (BatchNorm statistics per batch)."""
    num_batches, n_valid, latent = z3.shape
    n_rows = _round_up(max(n_valid, 1), MIN_ROWS)

    # Zero-pad rows (bf16 sublane packing) and the latent dim (128 lanes).
    z_pad = jnp.zeros((num_batches, n_rows, K_PAD), jnp.float32)
    z_pad = z_pad.at[:, :n_valid, :latent].set(z3)

    flops = 2 * num_batches * n_rows * (
        K_PAD * HIDDEN[0] + HIDDEN[0] * HIDDEN[1] + HIDDEN[1] * HIDDEN[2]
        + HIDDEN[2] * HIDDEN[3] + HIDDEN[3] * OUT_PAD)
    transcendentals = num_batches * (n_rows * OUT_PAD + 3 * sum(HIDDEN[1:]))
    weight_bytes = (sum(int(w.size) * w.dtype.itemsize
                        for w in (w0, w1, w2, w3, w4)) + _VEC_LEN * 4)
    bytes_accessed = weight_bytes + num_batches * n_rows * (K_PAD + OUT_PAD) * 4

    grid_spec = pltpu.PrefetchScalarGridSpec(
        num_scalar_prefetch=0,
        grid=(num_batches,),
        in_specs=[
            # One batch of latents per grid step (leading dim squeezed).
            pl.BlockSpec((None, n_rows, K_PAD), lambda g: (g, 0, 0)),
            # Weights / packed vectors: same block every step -> DMA'd once,
            # stay VMEM-resident across the whole grid.
            pl.BlockSpec(w0.shape, lambda g: (0, 0)),
            pl.BlockSpec(w1.shape, lambda g: (0, 0)),
            pl.BlockSpec(w2.shape, lambda g: (0, 0)),
            pl.BlockSpec(w3.shape, lambda g: (0, 0)),
            pl.BlockSpec(w4.shape, lambda g: (0, 0)),
            pl.BlockSpec(vec.shape, lambda g: (0, 0)),
        ],
        out_specs=pl.BlockSpec((None, n_rows, OUT_PAD), lambda g: (g, 0, 0)),
    )

    out = pl.pallas_call(
        functools.partial(_generator_kernel, n_valid=n_valid, n_rows=n_rows),
        out_shape=jax.ShapeDtypeStruct((num_batches, n_rows, OUT_PAD),
                                       jnp.float32),
        grid_spec=grid_spec,
        compiler_params=pltpu.CompilerParams(
            dimension_semantics=("parallel",)),   # v7x: shard batches over TCs
        cost_estimate=pl.CostEstimate(flops=int(flops),
                                      transcendentals=int(transcendentals),
                                      bytes_accessed=int(bytes_accessed)),
    )(z_pad, w0, w1, w2, w3, w4, vec)

    # Strip row / lane padding.
    return out[:, :n_valid, :OUT_SHAPE]


def generator_forward(z, prepped):
    """Single forward pass: z (B, latent) -> (B, OUT_SHAPE)."""
    return _generator_call(z[None], *prepped)[0]


def generator_forward_batched(z_batches, prepped):
    """Throughput form: (G, B, latent) -> (G, B, OUT_SHAPE); one independent
    PyTorch forward per grid step, weights DMA'd once."""
    return _generator_call(z_batches, *prepped)


# ----------------------------------------------------------------------------
# References
# ----------------------------------------------------------------------------
def generator_ref_f32(z, lin_params, bn_params):
    """PyTorch-faithful pure-f32 reference (includes all Linear biases)."""
    (w0, b0), (w1, b1), (w2, b2), (w3, b3), (w4, b4) = lin_params
    (g1, be1), (g2, be2), (g3, be3) = bn_params

    def bn(x, g, be):
        mu = jnp.mean(x, axis=0, keepdims=True)
        var = jnp.mean((x - mu) ** 2, axis=0, keepdims=True)
        return (x - mu) / jnp.sqrt(var + BN_EPS) * g + be

    x = _lrelu(z @ w0 + b0)
    x = _lrelu(bn(x @ w1 + b1, g1, be1))
    x = _lrelu(bn(x @ w2 + b2, g2, be2))
    x = _lrelu(bn(x @ w3 + b3, g3, be3))
    return jnp.tanh(x @ w4 + b4)


def generator_ref_bf16(z, lin_params, bn_params):
    """Reference mirroring kernel numerics (bf16 matmuls, fused BN); keeps
    the Linear biases to validate that dropping them in-kernel is exact."""
    (w0, b0), (w1, b1), (w2, b2), (w3, b3), (w4, b4) = lin_params
    (g1, be1), (g2, be2), (g3, be3) = bn_params

    def lin(x, w, b):
        return jnp.dot(x.astype(jnp.bfloat16), w.astype(jnp.bfloat16),
                       preferred_element_type=jnp.float32) + b

    def bn(x, g, be):
        mu = jnp.mean(x, axis=0, keepdims=True)
        ex2 = jnp.mean(x * x, axis=0, keepdims=True)
        var = ex2 - mu * mu
        scale = g * jax.lax.rsqrt(var + BN_EPS)
        shift = be - mu * scale
        return x * scale + shift

    x = _lrelu(lin(z, w0, b0))
    x = _lrelu(bn(lin(x, w1, b1), g1, be1))
    x = _lrelu(bn(lin(x, w2, b2), g2, be2))
    x = _lrelu(bn(lin(x, w3, b3), g3, be3))
    return jnp.tanh(lin(x, w4, b4))


# ----------------------------------------------------------------------------
# Main
# ----------------------------------------------------------------------------
if __name__ == "__main__":
    key = jax.random.PRNGKey(0)
    key, kz, kp = jax.random.split(key, 3)

    lin_params, bn_params = init_generator_params(kp)
    prepped = prep_generator_params(lin_params, bn_params)   # one-time prep

    # Single-batch path: batch=8 matches validation_z; batch=2 matches
    # example_input_array and exercises row-padding / masked BN statistics.
    for batch in (8, 2):
        kz, sub = jax.random.split(kz)
        z = jax.random.normal(sub, (batch, LATENT_DIM), jnp.float32)

        out = jax.block_until_ready(generator_forward(z, prepped))
        assert out.shape == (batch, OUT_SHAPE), out.shape

        ref_bf16 = generator_ref_bf16(z, lin_params, bn_params)
        ref_f32 = generator_ref_f32(z, lin_params, bn_params)
        assert jnp.allclose(out, ref_bf16, atol=2e-3, rtol=2e-3), \
            "mismatch vs bf16-matmul reference"
        assert jnp.allclose(out, ref_f32, atol=5e-2, rtol=5e-2), \
            "mismatch vs f32 PyTorch-faithful reference"

    # Gridded throughput path: 4 independent batches of 8 in one pallas_call.
    kz, sub = jax.random.split(kz)
    zb = jax.random.normal(sub, (4, 8, LATENT_DIM), jnp.float32)
    outb = jax.block_until_ready(generator_forward_batched(zb, prepped))
    assert outb.shape == (4, 8, OUT_SHAPE), outb.shape
    refb = jax.vmap(lambda zz: generator_ref_bf16(zz, lin_params, bn_params))(zb)
    assert jnp.allclose(outb, refb, atol=2e-3, rtol=2e-3), \
        "mismatch vs per-batch bf16 reference (gridded path)"

    print("KERNEL_OK")
</pallas_src>

<mosaic_0001>
module attributes {stable_mosaic.version = 11 : i64} {
  func.func @_generator_kernel(%arg0: i32, %arg1: memref<1x16x128xf32, #tpu.memory_space<vmem>>, %arg2: memref<128x128xbf16, #tpu.memory_space<vmem>>, %arg3: memref<128x256xbf16, #tpu.memory_space<vmem>>, %arg4: memref<256x512xbf16, #tpu.memory_space<vmem>>, %arg5: memref<512x1024xbf16, #tpu.memory_space<vmem>>, %arg6: memref<1024x128xbf16, #tpu.memory_space<vmem>>, %arg7: memref<1x3840xf32, #tpu.memory_space<vmem>>, %arg8: memref<1x16x128xf32, #tpu.memory_space<vmem>>) attributes {dimension_semantics = [#tpu.dimension_semantics<parallel>], iteration_bounds = array<i64: 1>, scalar_prefetch = 0 : i64, scratch_operands = 0 : i64, tpu.core_type = #tpu.core_type<tc>, window_params = [{transform_indices = @transform_0, window_bounds = array<i64: 1, 16, 128>}, {pipeline_mode = #tpu.pipeline_mode<synchronous>, transform_indices = @transform_1, window_bounds = array<i64: 128, 128>}, {pipeline_mode = #tpu.pipeline_mode<synchronous>, transform_indices = @transform_2, window_bounds = array<i64: 128, 256>}, {pipeline_mode = #tpu.pipeline_mode<synchronous>, transform_indices = @transform_3, window_bounds = array<i64: 256, 512>}, {pipeline_mode = #tpu.pipeline_mode<synchronous>, transform_indices = @transform_4, window_bounds = array<i64: 512, 1024>}, {pipeline_mode = #tpu.pipeline_mode<synchronous>, transform_indices = @transform_5, window_bounds = array<i64: 1024, 128>}, {pipeline_mode = #tpu.pipeline_mode<synchronous>, transform_indices = @transform_6, window_bounds = array<i64: 1, 3840>}, {transform_indices = @transform_7, window_bounds = array<i64: 1, 16, 128>}]} {
    %0 = tpu.iota {dimensions = array<i32: 0>} : vector<16x1xi32>
    %c8_i32 = arith.constant 8 : i32
    %1 = vector.broadcast %c8_i32 : i32 to vector<16x1xi32>
    %2 = arith.cmpi slt, %0, %1 : vector<16x1xi32>
    %cst = arith.constant 1.250000e-01 : f32
    %cst_0 = arith.constant 0.000000e+00 : f32
    %3 = vector.broadcast %cst : f32 to vector<16x1xf32>
    %4 = vector.broadcast %cst_0 : f32 to vector<16x1xf32>
    %5 = arith.select %2, %3, %4 : vector<16x1xi1>, vector<16x1xf32>
    %c0 = arith.constant 0 : index
    %c0_1 = arith.constant 0 : index
    %6 = vector.load %arg7[%c0, %c0_1] : memref<1x3840xf32, #tpu.memory_space<vmem>>, vector<1x128xf32>
    %c0_2 = arith.constant 0 : index
    %c128 = arith.constant 128 : index
    %7 = vector.load %arg7[%c0_2, %c128] : memref<1x3840xf32, #tpu.memory_space<vmem>>, vector<1x128xf32>
    %c0_3 = arith.constant 0 : index
    %c256 = arith.constant 256 : index
    %8 = vector.load %arg7[%c0_3, %c256] : memref<1x3840xf32, #tpu.memory_space<vmem>>, vector<1x256xf32>
    %c0_4 = arith.constant 0 : index
    %c512 = arith.constant 512 : index
    %9 = vector.load %arg7[%c0_4, %c512] : memref<1x3840xf32, #tpu.memory_space<vmem>>, vector<1x256xf32>
    %c0_5 = arith.constant 0 : index
    %c768 = arith.constant 768 : index
    %10 = vector.load %arg7[%c0_5, %c768] : memref<1x3840xf32, #tpu.memory_space<vmem>>, vector<1x512xf32>
    %c0_6 = arith.constant 0 : index
    %c1280 = arith.constant 1280 : index
    %11 = vector.load %arg7[%c0_6, %c1280] : memref<1x3840xf32, #tpu.memory_space<vmem>>, vector<1x512xf32>
    %c0_7 = arith.constant 0 : index
    %c1792 = arith.constant 1792 : index
    %12 = vector.load %arg7[%c0_7, %c1792] : memref<1x3840xf32, #tpu.memory_space<vmem>>, vector<1x1024xf32>
    %c0_8 = arith.constant 0 : index
    %c2816 = arith.constant 2816 : index
    %13 = vector.load %arg7[%c0_8, %c2816] : memref<1x3840xf32, #tpu.memory_space<vmem>>, vector<1x1024xf32>
    %c0_9 = arith.constant 0 : index
    %c0_10 = arith.constant 0 : index
    %c0_11 = arith.constant 0 : index
    %14 = vector.load %arg1[%c0_9, %c0_10, %c0_11] : memref<1x16x128xf32, #tpu.memory_space<vmem>>, vector<1x16x128xf32>
    %15 = vector.shape_cast %14 : vector<1x16x128xf32> to vector<16x128xf32>
    %16 = arith.truncf %15 : vector<16x128xf32> to vector<16x128xbf16>
    %c0_12 = arith.constant 0 : index
    %c0_13 = arith.constant 0 : index
    %17 = vector.load %arg2[%c0_12, %c0_13] : memref<128x128xbf16, #tpu.memory_space<vmem>>, vector<128x128xbf16>
    %cst_14 = arith.constant dense<0.000000e+00> : vector<16x128xf32>
    %18 = tpu.matmul %16, %17, %cst_14 {dimension_numbers = #tpu.dot_dimension_numbers<[1], [0], [0], [1], [0, 0, 1, 1], [], []>} : vector<16x128xbf16>, vector<128x128xbf16>, vector<16x128xf32> -> vector<16x128xf32>
    %19 = vector.broadcast %6 : vector<1x128xf32> to vector<16x128xf32>
    %20 = arith.addf %18, %19 : vector<16x128xf32>
    %cst_15 = arith.constant 2.000000e-01 : f32
    %21 = vector.broadcast %cst_15 : f32 to vector<16x128xf32>
    %22 = arith.mulf %21, %20 : vector<16x128xf32>
    %23 = arith.maximumf %20, %22 : vector<16x128xf32>
    %24 = arith.truncf %23 : vector<16x128xf32> to vector<16x128xbf16>
    %c0_16 = arith.constant 0 : index
    %c0_17 = arith.constant 0 : index
    %25 = vector.load %arg3[%c0_16, %c0_17] : memref<128x256xbf16, #tpu.memory_space<vmem>>, vector<128x256xbf16>
    %cst_18 = arith.constant dense<0.000000e+00> : vector<16x256xf32>
    %26 = tpu.matmul %24, %25, %cst_18 {dimension_numbers = #tpu.dot_dimension_numbers<[1], [0], [0], [1], [0, 0, 1, 1], [], []>} : vector<16x128xbf16>, vector<128x256xbf16>, vector<16x256xf32> -> vector<16x256xf32>
    %27 = vector.broadcast %5 : vector<16x1xf32> to vector<16x256xf32>
    %28 = arith.mulf %26, %27 : vector<16x256xf32>
    %cst_19 = arith.constant dense<0.000000e+00> : vector<256xf32>
    %29 = vector.multi_reduction <add>, %28, %cst_19 [0] : vector<16x256xf32> to vector<256xf32>
    %30 = vector.shape_cast %29 : vector<256xf32> to vector<1x256xf32>
    %31 = arith.mulf %26, %26 : vector<16x256xf32>
    %32 = vector.broadcast %5 : vector<16x1xf32> to vector<16x256xf32>
    %33 = arith.mulf %31, %32 : vector<16x256xf32>
    %cst_20 = arith.constant dense<0.000000e+00> : vector<256xf32>
    %34 = vector.multi_reduction <add>, %33, %cst_20 [0] : vector<16x256xf32> to vector<256xf32>
    %35 = vector.shape_cast %34 : vector<256xf32> to vector<1x256xf32>
    %36 = arith.mulf %30, %30 : vector<1x256xf32>
    %37 = arith.subf %35, %36 : vector<1x256xf32>
    %cst_21 = arith.constant 8.000000e-01 : f32
    %38 = vector.broadcast %cst_21 : f32 to vector<1x256xf32>
    %39 = arith.addf %37, %38 : vector<1x256xf32>
    %40 = math.rsqrt %39 : vector<1x256xf32>
    %41 = arith.mulf %8, %40 : vector<1x256xf32>
    %42 = arith.mulf %30, %41 : vector<1x256xf32>
    %43 = arith.subf %9, %42 : vector<1x256xf32>
    %44 = vector.broadcast %41 : vector<1x256xf32> to vector<16x256xf32>
    %45 = arith.mulf %26, %44 : vector<16x256xf32>
    %46 = vector.broadcast %43 : vector<1x256xf32> to vector<16x256xf32>
    %47 = arith.addf %45, %46 : vector<16x256xf32>
    %cst_22 = arith.constant 2.000000e-01 : f32
    %48 = vector.broadcast %cst_22 : f32 to vector<16x256xf32>
    %49 = arith.mulf %48, %47 : vector<16x256xf32>
    %50 = arith.maximumf %47, %49 : vector<16x256xf32>
    %51 = arith.truncf %50 : vector<16x256xf32> to vector<16x256xbf16>
    %c0_23 = arith.constant 0 : index
    %c0_24 = arith.constant 0 : index
    %52 = vector.load %arg4[%c0_23, %c0_24] : memref<256x512xbf16, #tpu.memory_space<vmem>>, vector<256x512xbf16>
    %cst_25 = arith.constant dense<0.000000e+00> : vector<16x512xf32>
    %53 = tpu.matmul %51, %52, %cst_25 {dimension_numbers = #tpu.dot_dimension_numbers<[1], [0], [0], [1], [0, 0, 1, 1], [], []>} : vector<16x256xbf16>, vector<256x512xbf16>, vector<16x512xf32> -> vector<16x512xf32>
    %54 = vector.broadcast %5 : vector<16x1xf32> to vector<16x512xf32>
    %55 = arith.mulf %53, %54 : vector<16x512xf32>
    %cst_26 = arith.constant dense<0.000000e+00> : vector<512xf32>
    %56 = vector.multi_reduction <add>, %55, %cst_26 [0] : vector<16x512xf32> to vector<512xf32>
    %57 = vector.shape_cast %56 : vector<512xf32> to vector<1x512xf32>
    %58 = arith.mulf %53, %53 : vector<16x512xf32>
    %59 = vector.broadcast %5 : vector<16x1xf32> to vector<16x512xf32>
    %60 = arith.mulf %58, %59 : vector<16x512xf32>
    %cst_27 = arith.constant dense<0.000000e+00> : vector<512xf32>
    %61 = vector.multi_reduction <add>, %60, %cst_27 [0] : vector<16x512xf32> to vector<512xf32>
    %62 = vector.shape_cast %61 : vector<512xf32> to vector<1x512xf32>
    %63 = arith.mulf %57, %57 : vector<1x512xf32>
    %64 = arith.subf %62, %63 : vector<1x512xf32>
    %cst_28 = arith.constant 8.000000e-01 : f32
    %65 = vector.broadcast %cst_28 : f32 to vector<1x512xf32>
    %66 = arith.addf %64, %65 : vector<1x512xf32>
    %67 = math.rsqrt %66 : vector<1x512xf32>
    %68 = arith.mulf %10, %67 : vector<1x512xf32>
    %69 = arith.mulf %57, %68 : vector<1x512xf32>
    %70 = arith.subf %11, %69 : vector<1x512xf32>
    %71 = vector.broadcast %68 : vector<1x512xf32> to vector<16x512xf32>
    %72 = arith.mulf %53, %71 : vector<16x512xf32>
    %73 = vector.broadcast %70 : vector<1x512xf32> to vector<16x512xf32>
    %74 = arith.addf %72, %73 : vector<16x512xf32>
    %cst_29 = arith.constant 2.000000e-01 : f32
    %75 = vector.broadcast %cst_29 : f32 to vector<16x512xf32>
    %76 = arith.mulf %75, %74 : vector<16x512xf32>
    %77 = arith.maximumf %74, %76 : vector<16x512xf32>
    %78 = arith.truncf %77 : vector<16x512xf32> to vector<16x512xbf16>
    %c0_30 = arith.constant 0 : index
    %c0_31 = arith.constant 0 : index
    %79 = vector.load %arg5[%c0_30, %c0_31] : memref<512x1024xbf16, #tpu.memory_space<vmem>>, vector<512x1024xbf16>
    %cst_32 = arith.constant dense<0.000000e+00> : vector<16x1024xf32>
    %80 = tpu.matmul %78, %79, %cst_32 {dimension_numbers = #tpu.dot_dimension_numbers<[1], [0], [0], [1], [0, 0, 1, 1], [], []>} : vector<16x512xbf16>, vector<512x1024xbf16>, vector<16x1024xf32> -> vector<16x1024xf32>
    %81 = vector.broadcast %5 : vector<16x1xf32> to vector<16x1024xf32>
    %82 = arith.mulf %80, %81 : vector<16x1024xf32>
    %cst_33 = arith.constant dense<0.000000e+00> : vector<1024xf32>
    %83 = vector.multi_reduction <add>, %82, %cst_33 [0] : vector<16x1024xf32> to vector<1024xf32>
    %84 = vector.shape_cast %83 : vector<1024xf32> to vector<1x1024xf32>
    %85 = arith.mulf %80, %80 : vector<16x1024xf32>
    %86 = vector.broadcast %5 : vector<16x1xf32> to vector<16x1024xf32>
    %87 = arith.mulf %85, %86 : vector<16x1024xf32>
    %cst_34 = arith.constant dense<0.000000e+00> : vector<1024xf32>
    %88 = vector.multi_reduction <add>, %87, %cst_34 [0] : vector<16x1024xf32> to vector<1024xf32>
    %89 = vector.shape_cast %88 : vector<1024xf32> to vector<1x1024xf32>
    %90 = arith.mulf %84, %84 : vector<1x1024xf32>
    %91 = arith.subf %89, %90 : vector<1x1024xf32>
    %cst_35 = arith.constant 8.000000e-01 : f32
    %92 = vector.broadcast %cst_35 : f32 to vector<1x1024xf32>
    %93 = arith.addf %91, %92 : vector<1x1024xf32>
    %94 = math.rsqrt %93 : vector<1x1024xf32>
    %95 = arith.mulf %12, %94 : vector<1x1024xf32>
    %96 = arith.mulf %84, %95 : vector<1x1024xf32>
    %97 = arith.subf %13, %96 : vector<1x1024xf32>
    %98 = vector.broadcast %95 : vector<1x1024xf32> to vector<16x1024xf32>
    %99 = arith.mulf %80, %98 : vector<16x1024xf32>
    %100 = vector.broadcast %97 : vector<1x1024xf32> to vector<16x1024xf32>
    %101 = arith.addf %99, %100 : vector<16x1024xf32>
    %cst_36 = arith.constant 2.000000e-01 : f32
    %102 = vector.broadcast %cst_36 : f32 to vector<16x1024xf32>
    %103 = arith.mulf %102, %101 : vector<16x1024xf32>
    %104 = arith.maximumf %101, %103 : vector<16x1024xf32>
    %105 = arith.truncf %104 : vector<16x1024xf32> to vector<16x1024xbf16>
    %c0_37 = arith.constant 0 : index
    %c0_38 = arith.constant 0 : index
    %106 = vector.load %arg6[%c0_37, %c0_38] : memref<1024x128xbf16, #tpu.memory_space<vmem>>, vector<1024x128xbf16>
    %cst_39 = arith.constant dense<0.000000e+00> : vector<16x128xf32>
    %107 = tpu.matmul %105, %106, %cst_39 {dimension_numbers = #tpu.dot_dimension_numbers<[1], [0], [0], [1], [0, 0, 1, 1], [], []>} : vector<16x1024xbf16>, vector<1024x128xbf16>, vector<16x128xf32> -> vector<16x128xf32>
    %108 = vector.broadcast %7 : vector<1x128xf32> to vector<16x128xf32>
    %109 = arith.addf %107, %108 : vector<16x128xf32>
    %110 = math.tanh %109 : vector<16x128xf32>
    %c0_40 = arith.constant 0 : index
    %c0_41 = arith.constant 0 : index
    %c0_42 = arith.constant 0 : index
    %111 = vector.load %arg8[%c0_40, %c0_41, %c0_42] : memref<1x16x128xf32, #tpu.memory_space<vmem>>, vector<1x16x128xf32>
    %112 = vector.shape_cast %111 : vector<1x16x128xf32> to vector<16x128xf32>
    %113 = vector.shape_cast %110 : vector<16x128xf32> to vector<1x16x128xf32>
    tpu.vector_store %arg8[%c0_40, %c0_41, %c0_42], %113 {strides = array<i32>} : memref<1x16x128xf32, #tpu.memory_space<vmem>>, vector<1x16x128xf32>,
    return
  }
  func.func @transform_0(%arg0: i32) -> (i32, i32, i32) {
    %c0_i32 = arith.constant 0 : i32
    %c0_i32_0 = arith.constant 0 : i32
    %c0_i32_1 = arith.constant 0 : i32
    return %arg0, %c0_i32, %c0_i32_0 : i32, i32, i32
  }
  func.func @transform_1(%arg0: i32) -> (i32, i32) {
    %c0_i32 = arith.constant 0 : i32
    %c0_i32_0 = arith.constant 0 : i32
    %c0_i32_1 = arith.constant 0 : i32
    return %c0_i32, %c0_i32_0 : i32, i32
  }
  func.func @transform_2(%arg0: i32) -> (i32, i32) {
    %c0_i32 = arith.constant 0 : i32
    %c0_i32_0 = arith.constant 0 : i32
    %c0_i32_1 = arith.constant 0 : i32
    return %c0_i32, %c0_i32_0 : i32, i32
  }
  func.func @transform_3(%arg0: i32) -> (i32, i32) {
    %c0_i32 = arith.constant 0 : i32
    %c0_i32_0 = arith.constant 0 : i32
    %c0_i32_1 = arith.constant 0 : i32
    return %c0_i32, %c0_i32_0 : i32, i32
  }
  func.func @transform_4(%arg0: i32) -> (i32, i32) {
    %c0_i32 = arith.constant 0 : i32
    %c0_i32_0 = arith.constant 0 : i32
    %c0_i32_1 = arith.constant 0 : i32
    return %c0_i32, %c0_i32_0 : i32, i32
  }
  func.func @transform_5(%arg0: i32) -> (i32, i32) {
    %c0_i32 = arith.constant 0 : i32
    %c0_i32_0 = arith.constant 0 : i32
    %c0_i32_1 = arith.constant 0 : i32
    return %c0_i32, %c0_i32_0 : i32, i32
  }
  func.func @transform_6(%arg0: i32) -> (i32, i32) {
    %c0_i32 = arith.constant 0 : i32
    %c0_i32_0 = arith.constant 0 : i32
    %c0_i32_1 = arith.constant 0 : i32
    return %c0_i32, %c0_i32_0 : i32, i32
  }
  func.func @transform_7(%arg0: i32) -> (i32, i32, i32) {
    %c0_i32 = arith.constant 0 : i32
    %c0_i32_0 = arith.constant 0 : i32
    %c0_i32_1 = arith.constant 0 : i32
    return %arg0, %c0_i32, %c0_i32_0 : i32, i32, i32
  }
}

</mosaic_0001>

<bundles_post_ra>
// kernel: _generator_call.1
= control target key start
LH: loop header
LB: loop body
LE: loop exit
PB: predicated region body
PF: predicated region fallthrough
CT: control target
= control target key end

     0   :  { %12 = vsyncpa [#allocation3], 0  ;;  %s5629_s0 = inlined_call_operand.vmem [shape: f32[1,16,128], index: 0, kind: input, shape index: {}]   ;;  %s5630_s1 = inlined_call_operand.hbm [shape: bf16[128,128], index: 1, kind: input, shape index: {}]   ;;  %s5631_s2 = inlined_call_operand.hbm [shape: bf16[128,256], index: 2, kind: input, shape index: {}]   ;;  %s5632_s3 = inlined_call_operand.hbm [shape: bf16[256,512], index: 3, kind: input, shape index: {}]   ;;  %s5633_s4 = inlined_call_operand.hbm [shape: bf16[512,1024], index: 4, kind: input, shape index: {}]   ;;  %s5634_s5 = inlined_call_operand.hbm [shape: bf16[1024,128], index: 5, kind: input, shape index: {}]   ;;  %s5635_s6 = inlined_call_operand.vmem [shape: f32[1,3840], index: 6, kind: input, shape index: {}]   ;;  %s5636_s7 = inlined_call_operand.vmem [shape: f32[1,16,128], index: 7, kind: output, shape index: {}]  }
   0x1   :  { %13 = vsyncpa [#allocation5], 0 }
   0x2   :  { %14 = vsyncpa [#allocation8], 0  ;;  %s5149_s24 = smov [#allocation4]   ;;  %s5033_s28 = scalar_lea.hbm %s5631_s2, 2048 }
   0x3   :  { %s34_s25 = sshll.u32 %s5149_s24, 4  ;;  %p5034_p0 = scmp.ne.s32.totalorder %s5631_s2, %s5033_s28  ;;  %s35_s25 = int_to_ptr.vmem [resolvable:$true] %s34_s25 }
   0x4   :  { %p5037_p1 = scmp.lt.u32.totalorder %s5033_s28, %s5631_s2 }
   0x6   :  { %p5039_p2 = pnand %p5037_p1, %p5034_p0 }
   0x8   :  { %5042 = shalt.err (!%p5039_p2)
}
   0x9   :  { %s5043_s10 = scalar_lea.vmem %s35_s25, 2048  ;;  %p5048_p4 = scmp.lt.s32.totalorder %s35_s25, %s35_s25 }
   0xa   :  { %p5044_p3 = scmp.ne.s32.totalorder %s35_s25, %s5043_s10  ;;  %p5049_p5 = scmp.lt.s32.totalorder %s5043_s10, %s5043_s10 }
   0xc   :  { %p5050_p6 = por %p5049_p5, %p5048_p4 }
   0xe   :  { %p5051_p7 = pnand %p5050_p6, %p5044_p3 }
  0x10   :  { %5054 = shalt.err (!%p5051_p7)
}
  0x11   :  { %s5150_s11 = smov 128   ;;  %s5151_s12 = smov 8  }
  0x12   :  { %40 = dma.hbm_to_vmem [thread:$0]  %s5631_s2, 2048, %s35_s25, [#allocation5], %s5150_s11, %s5150_s11, %s5151_s12  }
  0x13   :  { %s5152_s15 = smov [#allocation7]   ;;  %s5055_s19 = scalar_lea.hbm %s5633_s4, 32768 }
  0x14   :  { %s58_s16 = sshll.u32 %s5152_s15, 4  ;;  %p5056_p8 = scmp.ne.s32.totalorder %s5633_s4, %s5055_s19  ;;  %s59_s16 = int_to_ptr.vmem [resolvable:$true] %s58_s16 }
  0x15   :  { %p5059_p9 = scmp.lt.u32.totalorder %s5055_s19, %s5633_s4 }
  0x17   :  { %p5061_p10 = pnand %p5059_p9, %p5056_p8 }
  0x19   :  { %5064 = shalt.err (!%p5061_p10)
}
  0x1a   :  { %s5065_s24 = scalar_lea.vmem %s59_s16, 32768  ;;  %p5070_p12 = scmp.lt.s32.totalorder %s59_s16, %s59_s16 }
  0x1b   :  { %p5066_p11 = scmp.ne.s32.totalorder %s59_s16, %s5065_s24  ;;  %p5071_p13 = scmp.lt.s32.totalorder %s5065_s24, %s5065_s24 }
  0x1d   :  { %p5072_p0 = por %p5071_p13, %p5070_p12 }
  0x1f   :  { %p5073_p1 = pnand %p5072_p0, %p5066_p11 }
  0x21   :  { %5076 = shalt.err (!%p5073_p1)
}
  0x22   :  { %s5153_s2 = smov 512   ;;  %s5154_s25 = smov 32  }
  0x23   :  { %64 = dma.hbm_to_vmem [thread:$0]  %s5633_s4, 32768, %s59_s16, [#allocation8], %s5153_s2, %s5153_s2, %s5154_s25  }
  0x24   :  { %s5155_s28 = smov [#allocation2]   ;;  %s5077_s9 = scalar_lea.hbm %s5630_s1, 1024 }
  0x25   :  { %s22_s29 = sshll.u32 %s5155_s28, 4  ;;  %p5078_p2 = scmp.ne.s32.totalorder %s5630_s1, %s5077_s9  ;;  %s23_s29 = int_to_ptr.vmem [resolvable:$true] %s22_s29 }
  0x26   :  { %p5081_p3 = scmp.lt.u32.totalorder %s5077_s9, %s5630_s1 }
  0x28   :  { %p5083_p4 = pnand %p5081_p3, %p5078_p2 }
  0x2a   :  { %5086 = shalt.err (!%p5083_p4)
}
  0x2b   :  { %s5087_s14 = scalar_lea.vmem %s23_s29, 1024  ;;  %p5092_p6 = scmp.lt.s32.totalorder %s23_s29, %s23_s29 }
  0x2c   :  { %p5088_p5 = scmp.ne.s32.totalorder %s23_s29, %s5087_s14  ;;  %p5093_p7 = scmp.lt.s32.totalorder %s5087_s14, %s5087_s14 }
  0x2e   :  { %p5094_p8 = por %p5093_p7, %p5092_p6 }
  0x30   :  { %p5095_p9 = pnand %p5094_p8, %p5088_p5 }
  0x32   :  { %5098 = shalt.err (!%p5095_p9)
}
  0x33   :  { %s5156_s4 = smov 64   ;;  %s5157_s15 = smov 4  }
  0x34   :  { %28 = dma.hbm_to_vmem [thread:$0]  %s5630_s1, 1024, %s23_s29, [#allocation3], %s5156_s4, %s5156_s4, %s5157_s15  }
  0x35   :  { %s5158_s18 = smov [#allocation6]   ;;  %s5099_s22 = scalar_lea.hbm %s5632_s3, 8192 }
  0x36   :  { %s46_s19 = sshll.u32 %s5158_s18, 4  ;;  %p5100_p10 = scmp.ne.s32.totalorder %s5632_s3, %s5099_s22  ;;  %s47_s19 = int_to_ptr.vmem [resolvable:$true] %s46_s19 }
  0x37   :  { %p5103_p11 = scmp.lt.u32.totalorder %s5099_s22, %s5632_s3 }
  0x39   :  { %p5105_p12 = pnand %p5103_p11, %p5100_p10 }
  0x3b   :  { %5108 = shalt.err (!%p5105_p12)
}
  0x3c   :  { %s5109_s26 = scalar_lea.vmem %s47_s19, 8192  ;;  %p5114_p0 = scmp.lt.s32.totalorder %s47_s19, %s47_s19 }
  0x3d   :  { %p5110_p13 = scmp.ne.s32.totalorder %s47_s19, %s5109_s26  ;;  %p5115_p1 = scmp.lt.s32.totalorder %s5109_s26, %s5109_s26 }
  0x3f   :  { %p5116_p2 = por %p5115_p1, %p5114_p0 }
  0x41   :  { %p5117_p3 = pnand %p5116_p2, %p5110_p13 }
  0x43   :  { %5120 = shalt.err (!%p5117_p3)
}
  0x44   :  { %s5159_s1 = smov 256   ;;  %s5160_s27 = smov 16  }
  0x45   :  { %52 = dma.hbm_to_vmem [thread:$0]  %s5632_s3, 8192, %s47_s19, [#allocation5], %s5159_s1, %s5159_s1, %s5160_s27  }
  0x46   :  { %s5161_s30 = smov [#allocation9]   ;;  %s5121_s11 = scalar_lea.hbm %s5634_s5, 8192 }
  0x47   :  { %s70_s8 = sshll.u32 %s5161_s30, 4  ;;  %p5122_p4 = scmp.ne.s32.totalorder %s5634_s5, %s5121_s11  ;;  %s71_s8 = int_to_ptr.vmem [resolvable:$true] %s70_s8 }
  0x48   :  { %p5125_p5 = scmp.lt.u32.totalorder %s5121_s11, %s5634_s5 }
  0x4a   :  { %p5127_p6 = pnand %p5125_p5, %p5122_p4 }
  0x4c   :  { %5130 = shalt.err (!%p5127_p6)
}
  0x4d   :  { %s5131_s17 = scalar_lea.vmem %s71_s8, 8192  ;;  %p5136_p8 = scmp.lt.s32.totalorder %s71_s8, %s71_s8 }
  0x4e   :  { %p5132_p7 = scmp.ne.s32.totalorder %s71_s8, %s5131_s17  ;;  %p5137_p9 = scmp.lt.s32.totalorder %s5131_s17, %s5131_s17 }
  0x50   :  { %p5138_p10 = por %p5137_p9, %p5136_p8 }
  0x52   :  { %p5139_p11 = pnand %p5138_p10, %p5132_p7 }
  0x54   :  { %5142 = shalt.err (!%p5139_p11)
}
  0x55   :  { %76 = dma.hbm_to_vmem [thread:$0]  %s5634_s5, 8192, %s71_s8, [#allocation8], %s5156_s4, %s5156_s4, %s5157_s15  }
  0x56   :  { %5143 = dma.done.wait [#allocation3], 1024  }
  0x57   :  { %5144 = vsyncadd [#allocation3], 4294966272 }
  0x58   :  { %5145 = dma.done.wait [#allocation5], 10240  }
  0x59   :  { %5146 = vsyncadd [#allocation5], 4294957056 }
  0x5a   :  { %5147 = dma.done.wait [#allocation8], 40960  }
  0x5b   :  { %5148 = vsyncadd [#allocation8], 4294926336  ;;  %v5162_v0 = vmov 0.0   ;;  %vm5163_vm0 = vmmov 0   ;;  %v4809_v1 = vld [vmem:[#allocation2] sm:$0xff]   ;;  %v4810_v2 = vld [vmem:[#allocation2 + $0x8] sm:$0xff]  }
  0x5c   :  { %4756 = vmatprep.subr.bf16.mxu0 %v5162_v0  ;;  %4772 = vmatprep.mubr.msk.bf16.mxu0 %vm5163_vm0, %v5162_v0  ;;  %v4811_v3 = vld [vmem:[#allocation2 + $0x10] sm:$0xff]   ;;  %v4812_v4 = vld [vmem:[#allocation2 + $0x18] sm:$0xff]   ;;  %v4817_v5 = vld [vmem:[#allocation4 + $0x4] ss:$8 sps:$4 sm:$0xff]   ;;  %v5164_v28 = vmov 0  }
  0x5d   :  { %4757 = vmatpush3.bf16.msra.mxu0 %v4809_v1  ;;  %v4819_v6 = vld [vmem:[#allocation4] ss:$8 sps:$4 sm:$0xff]   ;;  %v4820_v7 = vld [vmem:[#allocation4 + $0x14] ss:$8 sps:$4 sm:$0xff]   ;;  %325 = vmatprep.subr.bf16.mxu1 %v4817_v5  ;;  %v4822_v8 = vld [vmem:[#allocation4 + $0x10] ss:$8 sps:$4 sm:$0xff]  }
  0x5e   :  { %4758 = vmatprep.subr.bf16.mxu0 %v5162_v0  ;;  %326 = vmatpush1.bf16.msra.mxu1 %v4819_v6  ;;  %v4823_v9 = vld [vmem:[#allocation4 + $0x24] ss:$8 sps:$4 sm:$0xff]   ;;  %v4825_v12 = vld [vmem:[#allocation4 + $0x20] ss:$8 sps:$4 sm:$0xff]   ;;  %v4826_v13 = vld [vmem:[#allocation4 + $0x34] ss:$8 sps:$4 sm:$0xff]  }
  0x5f   :  { %327 = vmatprep.subr.bf16.mxu1 %v4820_v7  ;;  %v4813_v10 = vld [vmem:[#allocation2 + $0x20] sm:$0xff]   ;;  %v4814_v11 = vld [vmem:[#allocation2 + $0x28] sm:$0xff]   ;;  %v4828_v14 = vld [vmem:[#allocation4 + $0x30] ss:$8 sps:$4 sm:$0xff]   ;;  %357 = vmatprep.mubr.bf16.mxu1 %v5164_v28 }
  0x60   :  { %v4829_v15 = vld [vmem:[#allocation4 + $0x44] ss:$8 sps:$4 sm:$0xff]   ;;  %v4815_v16 = vld [vmem:[#allocation2 + $0x30] sm:$0xff]   ;;  %v4831_v17 = vld [vmem:[#allocation4 + $0x40] ss:$8 sps:$4 sm:$0xff]  }
  0x61   :  { %4759 = vmatpush3.bf16.msra.mxu0 %v4810_v2  ;;  %v4832_v18 = vld [vmem:[#allocation4 + $0x54] ss:$8 sps:$4 sm:$0xff]   ;;  %v110_v20 = vld [vmem:[%s5629_s0] sm:$0xff]  ;;  %v111_v21 = vld [vmem:[%s5629_s0 + $0x8] sm:$0xff] }
  0x62   :  { %4760 = vmatprep.subr.bf16.mxu0 %v5162_v0  ;;  %328 = vmatpush1.bf16.msra.mxu1 %v4822_v8  ;;  %v4816_v19 = vld [vmem:[#allocation2 + $0x38] sm:$0xff]   ;;  %v112_v22 = vpack.c.bf16 %v111_v21, %v110_v20  ;;  %v4835_v24 = vld [vmem:[#allocation4 + $0x64] ss:$8 sps:$4 sm:$0xff]   ;;  %v4837_v25 = vld [vmem:[#allocation4 + $0x60] ss:$8 sps:$4 sm:$0xff]  }
  0x63   :  { %329 = vmatprep.subr.bf16.mxu1 %v4823_v9  ;;  %v4834_v23 = vld [vmem:[#allocation4 + $0x50] ss:$8 sps:$4 sm:$0xff]   ;;  %v4838_v26 = vld [vmem:[#allocation4 + $0x74] ss:$8 sps:$4 sm:$0xff]   ;;  %v4249_v29 = vld [vmem:[%s5635_s6] ss:$0 sm:$0xff] }
  0x64   :  { %v4840_v27 = vld [vmem:[#allocation4 + $0x70] ss:$8 sps:$4 sm:$0xff]   ;;  %v4843_v41 = vld [vmem:[#allocation6 + $0x4] ss:$16 sps:$4 sm:$0xff]   ;;  %v4846_v42 = vld [vmem:[#allocation6 + $0xc] ss:$16 sps:$4 sm:$0xff]  }
  0x65   :  { %4761 = vmatpush3.bf16.msra.mxu0 %v4811_v3  ;;  %v4841_v43 = vld [vmem:[#allocation6] ss:$16 sps:$4 sm:$0xff]   ;;  %v4844_v44 = vld [vmem:[#allocation6 + $0x8] ss:$16 sps:$4 sm:$0xff]   ;;  %v4849_v45 = vld [vmem:[#allocation6 + $0x24] ss:$16 sps:$4 sm:$0xff]  }
  0x66   :  { %4762 = vmatprep.subr.bf16.mxu0 %v5162_v0  ;;  %330 = vmatpush1.bf16.msra.mxu1 %v4825_v12  ;;  %v4852_v46 = vld [vmem:[#allocation6 + $0x2c] ss:$16 sps:$4 sm:$0xff]   ;;  %v4847_v47 = vld [vmem:[#allocation6 + $0x20] ss:$16 sps:$4 sm:$0xff]   ;;  %v4850_v48 = vld [vmem:[#allocation6 + $0x28] ss:$16 sps:$4 sm:$0xff]  }
  0x67   :  { %331 = vmatprep.subr.bf16.mxu1 %v4826_v13  ;;  %v4855_v49 = vld [vmem:[#allocation6 + $0x44] ss:$16 sps:$4 sm:$0xff]   ;;  %v4858_v50 = vld [vmem:[#allocation6 + $0x4c] ss:$16 sps:$4 sm:$0xff]   ;;  %v4853_v51 = vld [vmem:[#allocation6 + $0x40] ss:$16 sps:$4 sm:$0xff]  }
  0x68   :  { %v4856_v52 = vld [vmem:[#allocation6 + $0x48] ss:$16 sps:$4 sm:$0xff]   ;;  %v4861_v53 = vld [vmem:[#allocation6 + $0x64] ss:$16 sps:$4 sm:$0xff]   ;;  %v4864_v54 = vld [vmem:[#allocation6 + $0x6c] ss:$16 sps:$4 sm:$0xff]  }
  0x69   :  { %4763 = vmatpush3.bf16.msra.mxu0 %v4812_v4  ;;  %v4859_v55 = vld [vmem:[#allocation6 + $0x60] ss:$16 sps:$4 sm:$0xff]   ;;  %v4862_v56 = vld [vmem:[#allocation6 + $0x68] ss:$16 sps:$4 sm:$0xff]   ;;  %v4867_v57 = vld [vmem:[#allocation6 + $0x84] ss:$16 sps:$4 sm:$0xff]  }
  0x6a   :  { %4764 = vmatprep.subr.bf16.mxu0 %v5162_v0  ;;  %332 = vmatpush1.bf16.msra.mxu1 %v4828_v14  ;;  %v4870_v58 = vld [vmem:[#allocation6 + $0x8c] ss:$16 sps:$4 sm:$0xff]   ;;  %v4865_v59 = vld [vmem:[#allocation6 + $0x80] ss:$16 sps:$4 sm:$0xff]   ;;  %v4868_v60 = vld [vmem:[#allocation6 + $0x88] ss:$16 sps:$4 sm:$0xff]  }
  0x6b   :  { %333 = vmatprep.subr.bf16.mxu1 %v4829_v15  ;;  %v4873_v61 = vld [vmem:[#allocation6 + $0xa4] ss:$16 sps:$4 sm:$0xff]   ;;  %v4876_v62 = vld [vmem:[#allocation6 + $0xac] ss:$16 sps:$4 sm:$0xff]   ;;  %v4871_v63 = vld [vmem:[#allocation6 + $0xa0] ss:$16 sps:$4 sm:$0xff]  }
  0x6c   :  { %v4879_v1 = vld [vmem:[#allocation6 + $0xc4] ss:$16 sps:$4 sm:$0xff]   ;;  %v4882_v2 = vld [vmem:[#allocation6 + $0xcc] ss:$16 sps:$4 sm:$0xff]   ;;  %v4877_v3 = vld [vmem:[#allocation6 + $0xc0] ss:$16 sps:$4 sm:$0xff]  }
  0x6d   :  { %4765 = vmatpush3.bf16.msra.mxu0 %v4813_v10  ;;  %v4880_v4 = vld [vmem:[#allocation6 + $0xc8] ss:$16 sps:$4 sm:$0xff]   ;;  %v4885_v5 = vld [vmem:[#allocation6 + $0xe4] ss:$16 sps:$4 sm:$0xff]   ;;  %v4888_v6 = vld [vmem:[#allocation6 + $0xec] ss:$16 sps:$4 sm:$0xff]  }
  0x6e   :  { %4766 = vmatprep.subr.bf16.mxu0 %v5162_v0  ;;  %334 = vmatpush1.bf16.msra.mxu1 %v4831_v17  ;;  %v4883_v7 = vld [vmem:[#allocation6 + $0xe0] ss:$16 sps:$4 sm:$0xff]   ;;  %v4886_v8 = vld [vmem:[#allocation6 + $0xe8] ss:$16 sps:$4 sm:$0xff]   ;;  %v4891_v9 = vld [vmem:[#allocation6 + $0x104] ss:$16 sps:$4 sm:$0xff]  }
  0x6f   :  { %335 = vmatprep.subr.bf16.mxu1 %v4832_v18  ;;  %v4894_v10 = vld [vmem:[#allocation6 + $0x10c] ss:$16 sps:$4 sm:$0xff]   ;;  %v4892_v12 = vld [vmem:[#allocation6 + $0x108] ss:$16 sps:$4 sm:$0xff]   ;;  %v4897_v13 = vld [vmem:[#allocation6 + $0x124] ss:$16 sps:$4 sm:$0xff]  }
  0x70   :  { %v4900_v14 = vld [vmem:[#allocation6 + $0x12c] ss:$16 sps:$4 sm:$0xff]   ;;  %v4895_v15 = vld [vmem:[#allocation6 + $0x120] ss:$16 sps:$4 sm:$0xff]   ;;  %v4903_v17 = vld [vmem:[#allocation6 + $0x144] ss:$16 sps:$4 sm:$0xff]  }
  0x71   :  { %4767 = vmatpush3.bf16.msra.mxu0 %v4814_v11  ;;  %v4889_v11 = vld [vmem:[#allocation6 + $0x100] ss:$16 sps:$4 sm:$0xff]   ;;  %v4906_v18 = vld [vmem:[#allocation6 + $0x14c] ss:$16 sps:$4 sm:$0xff]   ;;  %v4904_v20 = vld [vmem:[#allocation6 + $0x148] ss:$16 sps:$4 sm:$0xff]  }
  0x72   :  { %4768 = vmatprep.subr.bf16.mxu0 %v5162_v0  ;;  %336 = vmatpush1.bf16.msra.mxu1 %v4834_v23  ;;  %v4909_v21 = vld [vmem:[#allocation6 + $0x164] ss:$16 sps:$4 sm:$0xff]   ;;  %v4907_v23 = vld [vmem:[#allocation6 + $0x160] ss:$16 sps:$4 sm:$0xff]   ;;  %v4916_v28 = vld [vmem:[#allocation6 + $0x188] ss:$16 sps:$4 sm:$0xff]  }
  0x73   :  { %337 = vmatprep.subr.bf16.mxu1 %v4835_v24  ;;  %v4910_v24 = vld [vmem:[#allocation6 + $0x168] ss:$16 sps:$4 sm:$0xff]  }
  0x75   :  { %4769 = vmatpush3.bf16.msra.mxu0 %v4815_v16  ;;  %v4898_v16 = vld [vmem:[#allocation6 + $0x128] ss:$16 sps:$4 sm:$0xff]  }
  0x76   :  { %4770 = vmatprep.subr.bf16.mxu0 %v5162_v0  ;;  %338 = vmatpush1.bf16.msra.mxu1 %v4837_v25  ;;  %v4874_v0 = vld [vmem:[#allocation6 + $0xa8] ss:$16 sps:$4 sm:$0xff]   ;;  %v4915_v25 = vld [vmem:[#allocation6 + $0x184] ss:$16 sps:$4 sm:$0xff]  }
  0x77   :  { %339 = vmatprep.subr.bf16.mxu1 %v4838_v26  ;;  %v4918_v26 = vld [vmem:[#allocation6 + $0x18c] ss:$16 sps:$4 sm:$0xff]  }
  0x79   :  { %4771 = vmatpush3.bf16.msra.mxu0 %v4816_v19  ;;  %v4901_v19 = vld [vmem:[#allocation6 + $0x140] ss:$16 sps:$4 sm:$0xff]  }
  0x7a   :  { %340 = vmatpush1.bf16.msra.mxu1 %v4840_v27  ;;  %880 = vmatprep.subr.bf16.mxu0 %v4843_v41  ;;  %v4913_v27 = vld [vmem:[#allocation6 + $0x180] ss:$16 sps:$4 sm:$0xff]  }
  0x7b   :  { %923 = vmatprep.subr.bf16.mxu1 %v4846_v42 }
  0x7c   :  { %4773 = vmatmul.mubr.bf16.vlgmr.msra.gmra.mrb[0].mxu0 %v112_v22  ;;  %v4912_v22 = vld [vmem:[#allocation6 + $0x16c] ss:$16 sps:$4 sm:$0xff]  }
  0x7d   :  { %881 = vmatpush1.bf16.msra.mxu0 %v4841_v43 }
  0x7e   :  { %882 = vmatprep.subr.bf16.mxu0 %v4849_v45 }
  0x81   :  { %883 = vmatpush1.bf16.msra.mxu0 %v4847_v47 }
  0x82   :  { %884 = vmatprep.subr.bf16.mxu0 %v4855_v49 }
  0x85   :  { %885 = vmatpush1.bf16.msra.mxu0 %v4853_v51 }
  0x86   :  { %886 = vmatprep.subr.bf16.mxu0 %v4861_v53 }
  0x89   :  { %887 = vmatpush1.bf16.msra.mxu0 %v4859_v55 }
  0x8a   :  { %888 = vmatprep.subr.bf16.mxu0 %v4867_v57 }
  0x8d   :  { %889 = vmatpush1.bf16.msra.mxu0 %v4865_v59 }
  0x8e   :  { %890 = vmatprep.subr.bf16.mxu0 %v4873_v61 }
  0x91   :  { %891 = vmatpush1.bf16.msra.mxu0 %v4871_v63 }
  0x92   :  { %892 = vmatprep.subr.bf16.mxu0 %v4879_v1 }
  0x95   :  { %893 = vmatpush1.bf16.msra.mxu0 %v4877_v3 }
  0x96   :  { %894 = vmatprep.subr.bf16.mxu0 %v4885_v5 }
  0x99   :  { %895 = vmatpush1.bf16.msra.mxu0 %v4883_v7 }
  0x9a   :  { %896 = vmatprep.subr.bf16.mxu0 %v4891_v9 }
  0x9d   :  { %897 = vmatpush1.bf16.msra.mxu0 %v4889_v11 }
  0x9e   :  { %898 = vmatprep.subr.bf16.mxu0 %v4897_v13 }
  0xa1   :  { %899 = vmatpush1.bf16.msra.mxu0 %v4895_v15 }
  0xa2   :  { %900 = vmatprep.subr.bf16.mxu0 %v4903_v17 }
  0xa5   :  { %901 = vmatpush1.bf16.msra.mxu0 %v4901_v19 }
  0xa6   :  { %902 = vmatprep.subr.bf16.mxu0 %v4909_v21 }
  0xa9   :  { %903 = vmatpush1.bf16.msra.mxu0 %v4907_v23 }
  0xaa   :  { %904 = vmatprep.subr.bf16.mxu0 %v4915_v25 }
  0xad   :  { %905 = vmatpush1.bf16.msra.mxu0 %v4913_v27  ;;  %v5165_v27 = vmov 1966171168  }
 0x14f   :  { %v217_v30 = vpop.f32.mrb[0].mxu0 }
 0x150   :  { %v218_v31 = vadd.f32 %v4249_v29, %v217_v30  ;;  %v4774_v32 = vpop.f32.mrb[1].mxu0  ;;  %v4924_v30 = vld [vmem:[#allocation6 + $0x1ac] ss:$16 sps:$4 sm:$0xff]  }
 0x151   :  { %v220_v33 = vpop.f32.mrb[2].mxu0  ;;  %v4922_v32 = vld [vmem:[#allocation6 + $0x1a8] ss:$16 sps:$4 sm:$0xff]  }
 0x152   :  { %v224_v34 = vmul.f32 0.2, %v218_v31  ;;  %v221_v35 = vadd.f32 %v4249_v29, %v220_v33  ;;  %v4775_v36 = vpop.f32.mrb[3].mxu0  ;;  %v4921_v29 = vld [vmem:[#allocation6 + $0x1a4] ss:$16 sps:$4 sm:$0xff]  }
 0x153   :  { %906 = vmatprep.subr.bf16.mxu0 %v4921_v29  ;;  %v4927_v33 = vld [vmem:[#allocation6 + $0x1c4] ss:$16 sps:$4 sm:$0xff]   ;;  %v4928_v36 = vld [vmem:[#allocation6 + $0x1c8] ss:$16 sps:$4 sm:$0xff]   ;;  %v422_v29 = vlaneseq }
 0x154   :  { %v225_v37 = vmul.f32 0.2, %v221_v35  ;;  %v226_v38 = vmax.f32 %v218_v31, %v224_v34  ;;  %v4919_v31 = vld [vmem:[#allocation6 + $0x1a0] ss:$16 sps:$4 sm:$0xff]   ;;  %v4930_v34 = vld [vmem:[#allocation6 + $0x1cc] ss:$16 sps:$4 sm:$0xff]  }
 0x155   :  { %907 = vmatpush1.bf16.msra.mxu0 %v4919_v31  ;;  %v5301_v31 = vshrl.u32 %v422_v29, 7 }
 0x156   :  { %v227_v39 = vmax.f32 %v221_v35, %v225_v37  ;;  %v4925_v35 = vld [vmem:[#allocation6 + $0x1c0] ss:$16 sps:$4 sm:$0xff]   ;;  %908 = vmatprep.subr.bf16.mxu0 %v4927_v33 }
 0x157   :  { %v4931_v37 = vld [vmem:[#allocation6 + $0x1e0] ss:$16 sps:$4 sm:$0xff]  }
 0x158   :  { %v228_v40 = vpack.c.bf16 %v227_v39, %v226_v38  ;;  %v4933_v38 = vld [vmem:[#allocation6 + $0x1e4] ss:$16 sps:$4 sm:$0xff]   ;;  %v4934_v39 = vld [vmem:[#allocation6 + $0x1e8] ss:$16 sps:$4 sm:$0xff]  }
 0x159   :  { %909 = vmatpush1.bf16.msra.mxu0 %v4925_v35 }
 0x15a   :  { %358 = vmatmul.mubr.bf16.vlgmr.msra.gmra.mrb[0].mxu1 %v228_v40  ;;  %v4936_v40 = vld [vmem:[#allocation6 + $0x1ec] ss:$16 sps:$4 sm:$0xff]   ;;  %910 = vmatprep.subr.bf16.mxu0 %v4933_v38 }
 0x15b   :  { %924 = vmatpush1.bf16.msra.mxu1 %v4844_v44 }
 0x15c   :  { %925 = vmatprep.subr.bf16.mxu1 %v4852_v46 }
 0x15d   :  { %911 = vmatpush1.bf16.msra.mxu0 %v4931_v37  ;;  %v104_v37 = vld [vmem:[%s5635_s6 + $0x2] sm:$0x3] }
 0x15f   :  { %926 = vmatpush1.bf16.msra.mxu1 %v4850_v48 }
 0x160   :  { %927 = vmatprep.subr.bf16.mxu1 %v4858_v50 }
 0x163   :  { %928 = vmatpush1.bf16.msra.mxu1 %v4856_v52 }
 0x164   :  { %929 = vmatprep.subr.bf16.mxu1 %v4864_v54 }
 0x167   :  { %930 = vmatpush1.bf16.msra.mxu1 %v4862_v56 }
 0x168   :  { %931 = vmatprep.subr.bf16.mxu1 %v4870_v58 }
 0x16b   :  { %932 = vmatpush1.bf16.msra.mxu1 %v4868_v60 }
 0x16c   :  { %933 = vmatprep.subr.bf16.mxu1 %v4876_v62 }
 0x16f   :  { %934 = vmatpush1.bf16.msra.mxu1 %v4874_v0 }
 0x170   :  { %935 = vmatprep.subr.bf16.mxu1 %v4882_v2 }
 0x173   :  { %936 = vmatpush1.bf16.msra.mxu1 %v4880_v4 }
 0x174   :  { %937 = vmatprep.subr.bf16.mxu1 %v4888_v6 }
 0x177   :  { %938 = vmatpush1.bf16.msra.mxu1 %v4886_v8 }
 0x178   :  { %939 = vmatprep.subr.bf16.mxu1 %v4894_v10 }
 0x17b   :  { %940 = vmatpush1.bf16.msra.mxu1 %v4892_v12 }
 0x17c   :  { %941 = vmatprep.subr.bf16.mxu1 %v4900_v14 }
 0x17f   :  { %942 = vmatpush1.bf16.msra.mxu1 %v4898_v16 }
 0x180   :  { %943 = vmatprep.subr.bf16.mxu1 %v4906_v18 }
 0x183   :  { %944 = vmatpush1.bf16.msra.mxu1 %v4904_v20 }
 0x184   :  { %945 = vmatprep.subr.bf16.mxu1 %v4912_v22 }
 0x187   :  { %946 = vmatpush1.bf16.msra.mxu1 %v4910_v24 }
 0x188   :  { %947 = vmatprep.subr.bf16.mxu1 %v4918_v26 }
 0x18b   :  { %948 = vmatpush1.bf16.msra.mxu1 %v4916_v28  ;;  %v420_v28 = vunpack.c.l.s4 %v5165_v27  ;;  %v1225_v27 = vld [vmem:[#allocation7 + $0xa8] sm:$0xff] }
 0x18c   :  { %949 = vmatprep.subr.bf16.mxu1 %v4924_v30 }
 0x18d   :  { %v421_v30 = vunpack.c.0.s8 %v420_v28 }
 0x18f   :  { %950 = vmatpush1.bf16.msra.mxu1 %v4922_v32  ;;  %v5304_v33 = vsub.s32 %v421_v30, %v5301_v31 }
 0x190   :  { %951 = vmatprep.subr.bf16.mxu1 %v4930_v34 }
 0x193   :  { %952 = vmatpush1.bf16.msra.mxu1 %v4928_v36 }
 0x194   :  { %953 = vmatprep.subr.bf16.mxu1 %v4936_v40  ;;  %v5315_v40 = vsub.s32 1, %v5301_v31 }
 0x197   :  { %954 = vmatpush1.bf16.msra.mxu1 %v4934_v39  ;;  %v5312_v39 = vsub.s32 0, %v5301_v31 }
 0x22d   :  { %v5281_v41 = vpop.f32.mrb[0].mxu1 }
 0x22e   :  { %v386_v42 = vmul.f32 %v5281_v41, %v5281_v41  ;;  %v5285_v43 = vpop.f32.mrb[1].mxu1  ;;  %v368_v46 = vmul.f32 0.125, %v5281_v41 }
 0x22f   :  { %v387_v44 = vmul.f32 %v5285_v43, %v5285_v43  ;;  %v5289_v45 = vpop.f32.mrb[2].mxu1  ;;  %v369_v50 = vmul.f32 0.125, %v5285_v43 }
 0x230   :  { %v370_v47 = vmul.f32 0.0, %v5289_v45  ;;  %v388_v48 = vmul.f32 %v5289_v45, %v5289_v45  ;;  %v5295_v49 = vpop.f32.mrb[3].mxu1  ;;  %v390_v53 = vmul.f32 0.125, %v386_v42 }
 0x231   :  { %v371_v51 = vmul.f32 0.0, %v5295_v49  ;;  %v389_v52 = vmul.f32 %v5295_v49, %v5295_v49  ;;  %v391_v56 = vmul.f32 0.125, %v387_v44 }
 0x232   :  { %v372_v54 = vadd.f32 %v370_v47, %v368_v46  ;;  %v392_v55 = vmul.f32 0.0, %v388_v48 }
 0x233   :  { %v379_v57 = vadd.f32 %v371_v51, %v369_v50  ;;  %v393_v58 = vmul.f32 0.0, %v389_v52 }
 0x234   :  { %v373_v59 = vrot.slane %v372_v54, 4  ;;  %v394_v60 = vadd.f32 %v392_v55, %v390_v53 }
 0x235   :  { %v380_v61 = vrot.slane %v379_v57, 4  ;;  %v401_v62 = vadd.f32 %v393_v58, %v391_v56  ;;  %v105_v56 = vld [vmem:[%s5635_s6 + $0x4] sm:$0x3] }
 0x236   :  { %v374_v63 = vadd.f32 %v373_v59, %v372_v54  ;;  %v395_v0 = vrot.slane %v394_v60, 4 }
 0x237   :  { %v381_v1 = vadd.f32 %v380_v61, %v379_v57  ;;  %v402_v2 = vrot.slane %v401_v62, 4 }
 0x238   :  { %v375_v3 = vrot.slane %v374_v63, 2  ;;  %v396_v4 = vadd.f32 %v395_v0, %v394_v60 }
 0x239   :  { %v382_v5 = vrot.slane %v381_v1, 2  ;;  %v403_v6 = vadd.f32 %v402_v2, %v401_v62 }
 0x23a   :  { %v376_v7 = vadd.f32 %v375_v3, %v374_v63  ;;  %v397_v8 = vrot.slane %v396_v4, 2 }
 0x23b   :  { %v383_v9 = vadd.f32 %v382_v5, %v381_v1  ;;  %v404_v10 = vrot.slane %v403_v6, 2 }
 0x23c   :  { %v377_v11 = vrot.slane %v376_v7, 1  ;;  %v398_v12 = vadd.f32 %v397_v8, %v396_v4  ;;  %v1208_v8 = vld [vmem:[#allocation7 + $0x20] sm:$0xff] }
 0x23d   :  { %v384_v13 = vrot.slane %v383_v9, 1  ;;  %v405_v14 = vadd.f32 %v404_v10, %v403_v6 }
 0x23e   :  { %v378_v15 = vadd.f32 %v377_v11, %v376_v7  ;;  %v399_v16 = vrot.slane %v398_v12, 1  ;;  %v1204_v7 = vld [vmem:[#allocation7] sm:$0xff]  ;;  %v1209_v11 = vld [vmem:[#allocation7 + $0x28] sm:$0xff] }
 0x23f   :  { %v385_v17 = vadd.f32 %v384_v13, %v383_v9  ;;  %v406_v18 = vrot.slane %v405_v14, 1  ;;  %v1205_v9 = vld [vmem:[#allocation7 + $0x8] sm:$0xff]  ;;  %v4339_v10 = vcombine.high %v1204_v7, %v1208_v8 }
 0x240   :  { %v400_v19 = vadd.f32 %v399_v16, %v398_v12  ;;  %v408_v20 = vmul.f32 %v378_v15, %v378_v15  ;;  %v4338_v12 = vcombine.low %v1204_v7, %v1208_v8  ;;  %v4340_v13 = vcombine.low %v1205_v9, %v1209_v11  ;;  %v1216_v16 = vld [vmem:[#allocation7 + $0x60] sm:$0xff]  ;;  %v1265_v7 = vld [vmem:[#allocation7 + $0x1e8] sm:$0xff] }
 0x241   :  { %v407_v21 = vadd.f32 %v406_v18, %v405_v14  ;;  %v409_v22 = vmul.f32 %v385_v17, %v385_v17  ;;  %v4341_v14 = vcombine.high %v1205_v9, %v1209_v11  ;;  %2740 = vmatprep.subr.bf16.mxu0 %v4339_v10  ;;  %v1268_v11 = vld [vmem:[#allocation7 + $0x200] sm:$0xff] }
 0x242   :  { %v410_v23 = vsub.f32 %v400_v19, %v408_v20  ;;  %v1217_v19 = vld [vmem:[#allocation7 + $0x68] sm:$0xff] }
 0x243   :  { %v411_v24 = vsub.f32 %v407_v21, %v409_v22  ;;  %2826 = vmatprep.subr.bf16.mxu1 %v4341_v14 }
 0x244   :  { %v412_v25 = vadd.f32 0.8, %v410_v23  ;;  %v1220_v23 = vld [vmem:[#allocation7 + $0x80] sm:$0xff] }
 0x245   :  { %v413_v26 = vadd.f32 0.8, %v411_v24  ;;  %v1224_v24 = vld [vmem:[#allocation7 + $0xa0] sm:$0xff] }
 0x246   :  { %5001 = vrsqrt.f32 %v412_v25  ;;  %v1221_v25 = vld [vmem:[#allocation7 + $0x88] sm:$0xff]  ;;  %v4354_v28 = vcombine.low %v1220_v23, %v1224_v24 }
 0x247   :  { %5003 = vrsqrt.f32 %v413_v26  ;;  %v4355_v26 = vcombine.high %v1220_v23, %v1224_v24  ;;  %v4356_v29 = vcombine.low %v1221_v25, %v1225_v27  ;;  %v4357_v30 = vcombine.high %v1221_v25, %v1225_v27  ;;  %v1281_v23 = vld [vmem:[#allocation7 + $0x268] sm:$0xff]  ;;  %v1284_v27 = vld [vmem:[#allocation7 + $0x280] sm:$0xff] }
 0x250   :  { %v5002_v32 = vpop.eup %5001 }
 0x251   :  { %v5004_v34 = vpop.eup %5003 }
 0x252   :  { %v418_v35 = vcombine.low %v5002_v32, %v5004_v34  ;;  %v1228_v32 = vld [vmem:[#allocation7 + $0xc0] sm:$0xff] }
 0x253   :  { %v1232_v34 = vld [vmem:[#allocation7 + $0xe0] sm:$0xff] }
 0x254   :  { %v425_v36 = vrot.slane %v418_v35, %v5304_v33  ;;  %v1229_v35 = vld [vmem:[#allocation7 + $0xc8] sm:$0xff] }
 0x256   :  { %v432_v38 = vrot.slane %v425_v36, %v5304_v33  ;;  %v4363_v36 = vcombine.high %v1228_v32, %v1232_v34 }
 0x258   :  { %v434_v42 = vmul.f32 %v432_v38, %v104_v37  ;;  %v1233_v37 = vld [vmem:[#allocation7 + $0xe8] sm:$0xff]  ;;  %v4362_v38 = vcombine.low %v1228_v32, %v1232_v34 }
 0x259   :  { %v1289_v32 = vld [vmem:[#allocation7 + $0x2a8] sm:$0xff] }
 0x25a   :  { %v439_v44 = vrot.slane %v434_v42, %v5312_v39  ;;  %v443_v46 = vrot.slane %v434_v42, %v5315_v40  ;;  %v4364_v42 = vcombine.low %v1229_v35, %v1233_v37 }
 0x25c   :  { %v446_v47 = vmul.f32 %v439_v44, %v378_v15  ;;  %v447_v48 = vmul.f32 %v443_v46, %v385_v17  ;;  %v470_v50 = vmul.f32 %v443_v46, %v5295_v49  ;;  %v468_v51 = vmul.f32 %v443_v46, %v5285_v43  ;;  %v1212_v15 = vld [vmem:[#allocation7 + $0x40] sm:$0xff]  ;;  %v1213_v17 = vld [vmem:[#allocation7 + $0x48] sm:$0xff] }
 0x25d   :  { %v467_v52 = vmul.f32 %v439_v44, %v5281_v41  ;;  %v469_v53 = vmul.f32 %v439_v44, %v5289_v45  ;;  %v4347_v18 = vcombine.high %v1212_v15, %v1216_v16  ;;  %v4346_v20 = vcombine.low %v1212_v15, %v1216_v16  ;;  %v1236_v46 = vld [vmem:[#allocation7 + $0x100] sm:$0xff]  ;;  %v1273_v15 = vld [vmem:[#allocation7 + $0x228] sm:$0xff] }
 0x25e   :  { %v450_v54 = vcombine.low %v446_v47, %v447_v48  ;;  %v4348_v21 = vcombine.low %v1213_v17, %v1217_v19  ;;  %v4349_v22 = vcombine.high %v1213_v17, %v1217_v19  ;;  %v4365_v44 = vcombine.high %v1229_v35, %v1233_v37  ;;  %v1240_v47 = vld [vmem:[#allocation7 + $0x120] sm:$0xff]  ;;  %v1237_v48 = vld [vmem:[#allocation7 + $0x108] sm:$0xff] }
 0x25f   :  { %v1276_v19 = vld [vmem:[#allocation7 + $0x240] sm:$0xff] }
 0x260   :  { %v457_v55 = vrot.slane %v450_v54, %v5304_v33  ;;  %v1292_v37 = vld [vmem:[#allocation7 + $0x2c0] sm:$0xff] }
 0x262   :  { %v464_v57 = vrot.slane %v457_v55, %v5304_v33  ;;  %v1244_v55 = vld [vmem:[#allocation7 + $0x140] sm:$0xff] }
 0x264   :  { %v466_v58 = vsub.f32 %v105_v56, %v464_v57  ;;  %v1248_v56 = vld [vmem:[#allocation7 + $0x160] sm:$0xff]  ;;  %v1245_v57 = vld [vmem:[#allocation7 + $0x148] sm:$0xff] }
 0x266   :  { %v475_v59 = vrot.slane %v466_v58, %v5312_v39  ;;  %v479_v49 = vrot.slane %v466_v58, %v5315_v40  ;;  %v1249_v58 = vld [vmem:[#allocation7 + $0x168] sm:$0xff] }
 0x268   :  { %v485_v60 = vadd.f32 %v479_v49, %v470_v50  ;;  %v483_v43 = vadd.f32 %v479_v49, %v468_v51  ;;  %v482_v61 = vadd.f32 %v475_v59, %v467_v52  ;;  %v484_v41 = vadd.f32 %v475_v59, %v469_v53  ;;  %v1241_v51 = vld [vmem:[#allocation7 + $0x128] sm:$0xff] }
 0x269   :  { %v4371_v50 = vcombine.high %v1236_v46, %v1240_v47  ;;  %v4370_v52 = vcombine.low %v1236_v46, %v1240_v47  ;;  %v4372_v53 = vcombine.low %v1237_v48, %v1241_v51  ;;  %v4373_v54 = vcombine.high %v1237_v48, %v1241_v51  ;;  %v1297_v46 = vld [vmem:[#allocation7 + $0x2e8] sm:$0xff]  ;;  %v1300_v51 = vld [vmem:[#allocation7 + $0x300] sm:$0xff] }
 0x26a   :  { %v489_v62 = vmul.f32 0.2, %v485_v60  ;;  %v487_v45 = vmul.f32 0.2, %v483_v43  ;;  %v486_v63 = vmul.f32 0.2, %v482_v61  ;;  %v4378_v59 = vcombine.low %v1244_v55, %v1248_v56 }
 0x26b   :  { %v488_v0 = vmul.f32 0.2, %v484_v41  ;;  %v4379_v49 = vcombine.high %v1244_v55, %v1248_v56  ;;  %v1305_v55 = vld [vmem:[#allocation7 + $0x328] sm:$0xff] }
 0x26c   :  { %v491_v1 = vmax.f32 %v483_v43, %v487_v45  ;;  %v493_v2 = vmax.f32 %v485_v60, %v489_v62  ;;  %v490_v3 = vmax.f32 %v482_v61, %v486_v63  ;;  %v4380_v60 = vcombine.low %v1245_v57, %v1249_v58  ;;  %v1252_v61 = vld [vmem:[#allocation7 + $0x180] sm:$0xff]  ;;  %v1253_v62 = vld [vmem:[#allocation7 + $0x188] sm:$0xff] }
 0x26d   :  { %v492_v4 = vmax.f32 %v484_v41, %v488_v0  ;;  %v4381_v43 = vcombine.high %v1245_v57, %v1249_v58  ;;  %v1256_v41 = vld [vmem:[#allocation7 + $0x1a0] sm:$0xff]  ;;  %v1257_v63 = vld [vmem:[#allocation7 + $0x1a8] sm:$0xff] }
 0x26e   :  { %v495_v5 = vpack.c.bf16 %v493_v2, %v491_v1  ;;  %v4387_v45 = vcombine.high %v1252_v61, %v1256_v41  ;;  %v4386_v0 = vcombine.low %v1252_v61, %v1256_v41  ;;  %v4388_v1 = vcombine.low %v1253_v62, %v1257_v63  ;;  %v1313_v61 = vld [vmem:[#allocation7 + $0x368] sm:$0xff] }
 0x26f   :  { %v494_v6 = vpack.c.bf16 %v492_v4, %v490_v3  ;;  %v4389_v2 = vcombine.high %v1253_v62, %v1257_v63  ;;  %v1260_v3 = vld [vmem:[#allocation7 + $0x1c0] sm:$0xff] }
 0x270   :  { %912 = vmatprep.mubr.bf16.mxu0 %v495_v5  ;;  %955 = vmatprep.mubr.bf16.mxu1 %v495_v5  ;;  %v1264_v4 = vld [vmem:[#allocation7 + $0x1e0] sm:$0xff]  ;;  %v1261_v5 = vld [vmem:[#allocation7 + $0x1c8] sm:$0xff] }
 0x271   :  { %913 = vmatmul.mubr.bf16.vlgmr.msra.gmra.mrb[4].mxu0 %v494_v6  ;;  %956 = vmatmul.mubr.bf16.vlgmr.msra.gmra.mrb[4].mxu1 %v494_v6  ;;  %v4395_v6 = vcombine.high %v1260_v3, %v1264_v4  ;;  %v4394_v8 = vcombine.low %v1260_v3, %v1264_v4  ;;  %v4396_v9 = vcombine.low %v1261_v5, %v1265_v7  ;;  %v1316_v63 = vld [vmem:[#allocation7 + $0x380] sm:$0xff]  ;;  %v1321_v3 = vld [vmem:[#allocation7 + $0x3a8] sm:$0xff] }
 0x272   :  { %2741 = vmatpush1.bf16.msra.mxu0 %v4338_v12  ;;  %2827 = vmatpush1.bf16.msra.mxu1 %v4340_v13  ;;  %v4397_v10 = vcombine.high %v1261_v5, %v1265_v7  ;;  %v1272_v12 = vld [vmem:[#allocation7 + $0x220] sm:$0xff]  ;;  %v1269_v13 = vld [vmem:[#allocation7 + $0x208] sm:$0xff] }
 0x273   :  { %2742 = vmatprep.subr.bf16.mxu0 %v4347_v18  ;;  %2828 = vmatprep.subr.bf16.mxu1 %v4349_v22  ;;  %v4403_v14 = vcombine.high %v1268_v11, %v1272_v12  ;;  %v4402_v16 = vcombine.low %v1268_v11, %v1272_v12  ;;  %v4404_v17 = vcombine.low %v1269_v13, %v1273_v15  ;;  %v1324_v7 = vld [vmem:[#allocation7 + $0x3c0] sm:$0xff]  ;;  %v1329_v11 = vld [vmem:[#allocation7 + $0x3e8] sm:$0xff] }
 0x274   :  { %v4405_v18 = vcombine.high %v1269_v13, %v1273_v15  ;;  %v5330_v15 = vld [vmem:[#allocation7 + $0x400] sm:$0xff] }
 0x276   :  { %2743 = vmatpush1.bf16.msra.mxu0 %v4346_v20  ;;  %2829 = vmatpush1.bf16.msra.mxu1 %v4348_v21  ;;  %v1280_v20 = vld [vmem:[#allocation7 + $0x260] sm:$0xff]  ;;  %v1277_v21 = vld [vmem:[#allocation7 + $0x248] sm:$0xff] }
 0x277   :  { %2744 = vmatprep.subr.bf16.mxu0 %v4355_v26  ;;  %2830 = vmatprep.subr.bf16.mxu1 %v4357_v30  ;;  %v4411_v22 = vcombine.high %v1276_v19, %v1280_v20  ;;  %v4410_v24 = vcombine.low %v1276_v19, %v1280_v20  ;;  %v4412_v25 = vcombine.low %v1277_v21, %v1281_v23  ;;  %v5338_v19 = vld [vmem:[#allocation7 + $0x428] sm:$0xff] }
 0x278   :  { %v4413_v26 = vcombine.high %v1277_v21, %v1281_v23 }
 0x27a   :  { %2745 = vmatpush1.bf16.msra.mxu0 %v4354_v28  ;;  %2831 = vmatpush1.bf16.msra.mxu1 %v4356_v29  ;;  %v1288_v28 = vld [vmem:[#allocation7 + $0x2a0] sm:$0xff]  ;;  %v1285_v29 = vld [vmem:[#allocation7 + $0x288] sm:$0xff] }
 0x27b   :  { %2746 = vmatprep.subr.bf16.mxu0 %v4363_v36  ;;  %2832 = vmatprep.subr.bf16.mxu1 %v4365_v44  ;;  %v4419_v30 = vcombine.high %v1284_v27, %v1288_v28  ;;  %v4418_v34 = vcombine.low %v1284_v27, %v1288_v28  ;;  %v4420_v35 = vcombine.low %v1285_v29, %v1289_v32 }
 0x27c   :  { %v4421_v36 = vcombine.high %v1285_v29, %v1289_v32 }
 0x27e   :  { %2747 = vmatpush1.bf16.msra.mxu0 %v4362_v38  ;;  %2833 = vmatpush1.bf16.msra.mxu1 %v4364_v42  ;;  %v1296_v38 = vld [vmem:[#allocation7 + $0x2e0] sm:$0xff]  ;;  %v1293_v42 = vld [vmem:[#allocation7 + $0x2c8] sm:$0xff] }
 0x27f   :  { %2748 = vmatprep.subr.bf16.mxu0 %v4371_v50  ;;  %2834 = vmatprep.subr.bf16.mxu1 %v4373_v54  ;;  %v4427_v44 = vcombine.high %v1292_v37, %v1296_v38  ;;  %v4426_v47 = vcombine.low %v1292_v37, %v1296_v38  ;;  %v4428_v48 = vcombine.low %v1293_v42, %v1297_v46 }
 0x280   :  { %v4429_v50 = vcombine.high %v1293_v42, %v1297_v46 }
 0x282   :  { %2749 = vmatpush1.bf16.msra.mxu0 %v4370_v52  ;;  %2835 = vmatpush1.bf16.msra.mxu1 %v4372_v53  ;;  %v1304_v52 = vld [vmem:[#allocation7 + $0x320] sm:$0xff]  ;;  %v1301_v53 = vld [vmem:[#allocation7 + $0x308] sm:$0xff] }
 0x283   :  { %2750 = vmatprep.subr.bf16.mxu0 %v4379_v49  ;;  %2836 = vmatprep.subr.bf16.mxu1 %v4381_v43  ;;  %v4435_v54 = vcombine.high %v1300_v51, %v1304_v52  ;;  %v4434_v56 = vcombine.low %v1300_v51, %v1304_v52  ;;  %v4436_v57 = vcombine.low %v1301_v53, %v1305_v55  ;;  %v1312_v49 = vld [vmem:[#allocation7 + $0x360] sm:$0xff] }
 0x284   :  { %v4437_v58 = vcombine.high %v1301_v53, %v1305_v55 }
 0x286   :  { %2751 = vmatpush1.bf16.msra.mxu0 %v4378_v59  ;;  %2837 = vmatpush1.bf16.msra.mxu1 %v4380_v60  ;;  %v1308_v59 = vld [vmem:[#allocation7 + $0x340] sm:$0xff]  ;;  %v1309_v60 = vld [vmem:[#allocation7 + $0x348] sm:$0xff] }
 0x287   :  { %2752 = vmatprep.subr.bf16.mxu0 %v4387_v45  ;;  %2838 = vmatprep.subr.bf16.mxu1 %v4389_v2  ;;  %v4443_v43 = vcombine.high %v1308_v59, %v1312_v49  ;;  %v4442_v41 = vcombine.low %v1308_v59, %v1312_v49  ;;  %v4444_v62 = vcombine.low %v1309_v60, %v1313_v61 }
 0x288   :  { %v4445_v45 = vcombine.high %v1309_v60, %v1313_v61 }
 0x28a   :  { %2753 = vmatpush1.bf16.msra.mxu0 %v4386_v0  ;;  %2839 = vmatpush1.bf16.msra.mxu1 %v4388_v1  ;;  %v1320_v0 = vld [vmem:[#allocation7 + $0x3a0] sm:$0xff]  ;;  %v1317_v1 = vld [vmem:[#allocation7 + $0x388] sm:$0xff] }
 0x28b   :  { %2754 = vmatprep.subr.bf16.mxu0 %v4395_v6  ;;  %2840 = vmatprep.subr.bf16.mxu1 %v4397_v10  ;;  %v4451_v2 = vcombine.high %v1316_v63, %v1320_v0  ;;  %v4450_v4 = vcombine.low %v1316_v63, %v1320_v0  ;;  %v4452_v5 = vcombine.low %v1317_v1, %v1321_v3 }
 0x28c   :  { %v4453_v6 = vcombine.high %v1317_v1, %v1321_v3 }
 0x28e   :  { %2755 = vmatpush1.bf16.msra.mxu0 %v4394_v8  ;;  %2841 = vmatpush1.bf16.msra.mxu1 %v4396_v9  ;;  %v1328_v8 = vld [vmem:[#allocation7 + $0x3e0] sm:$0xff]  ;;  %v1325_v9 = vld [vmem:[#allocation7 + $0x3c8] sm:$0xff] }
 0x28f   :  { %2756 = vmatprep.subr.bf16.mxu0 %v4403_v14  ;;  %2842 = vmatprep.subr.bf16.mxu1 %v4405_v18  ;;  %v4459_v10 = vcombine.high %v1324_v7, %v1328_v8  ;;  %v4458_v12 = vcombine.low %v1324_v7, %v1328_v8  ;;  %v4460_v13 = vcombine.low %v1325_v9, %v1329_v11 }
 0x290   :  { %v4461_v14 = vcombine.high %v1325_v9, %v1329_v11 }
 0x292   :  { %2757 = vmatpush1.bf16.msra.mxu0 %v4402_v16  ;;  %2843 = vmatpush1.bf16.msra.mxu1 %v4404_v17  ;;  %v5332_v16 = vld [vmem:[#allocation7 + $0x420] sm:$0xff]  ;;  %v5334_v17 = vld [vmem:[#allocation7 + $0x408] sm:$0xff] }
 0x293   :  { %2758 = vmatprep.subr.bf16.mxu0 %v4411_v22  ;;  %2844 = vmatprep.subr.bf16.mxu1 %v4413_v26  ;;  %v4467_v18 = vcombine.high %v5330_v15, %v5332_v16  ;;  %v4466_v20 = vcombine.low %v5330_v15, %v5332_v16  ;;  %v4468_v21 = vcombine.low %v5334_v17, %v5338_v19 }
 0x294   :  { %v4469_v22 = vcombine.high %v5334_v17, %v5338_v19 }
 0x296   :  { %2759 = vmatpush1.bf16.msra.mxu0 %v4410_v24  ;;  %2845 = vmatpush1.bf16.msra.mxu1 %v4412_v25 }
 0x297   :  { %2760 = vmatprep.subr.bf16.mxu0 %v4419_v30  ;;  %2846 = vmatprep.subr.bf16.mxu1 %v4421_v36 }
 0x29a   :  { %2761 = vmatpush1.bf16.msra.mxu0 %v4418_v34  ;;  %2847 = vmatpush1.bf16.msra.mxu1 %v4420_v35 }
 0x29b   :  { %2762 = vmatprep.subr.bf16.mxu0 %v4427_v44  ;;  %2848 = vmatprep.subr.bf16.mxu1 %v4429_v50 }
 0x29e   :  { %2763 = vmatpush1.bf16.msra.mxu0 %v4426_v47  ;;  %2849 = vmatpush1.bf16.msra.mxu1 %v4428_v48 }
 0x29f   :  { %2764 = vmatprep.subr.bf16.mxu0 %v4435_v54  ;;  %2850 = vmatprep.subr.bf16.mxu1 %v4437_v58 }
 0x2a2   :  { %2765 = vmatpush1.bf16.msra.mxu0 %v4434_v56  ;;  %2851 = vmatpush1.bf16.msra.mxu1 %v4436_v57 }
 0x2a3   :  { %2766 = vmatprep.subr.bf16.mxu0 %v4443_v43  ;;  %2852 = vmatprep.subr.bf16.mxu1 %v4445_v45 }
 0x2a6   :  { %2767 = vmatpush1.bf16.msra.mxu0 %v4442_v41  ;;  %2853 = vmatpush1.bf16.msra.mxu1 %v4444_v62 }
 0x2a7   :  { %2768 = vmatprep.subr.bf16.mxu0 %v4451_v2  ;;  %2854 = vmatprep.subr.bf16.mxu1 %v4453_v6 }
 0x2aa   :  { %2769 = vmatpush1.bf16.msra.mxu0 %v4450_v4  ;;  %2855 = vmatpush1.bf16.msra.mxu1 %v4452_v5 }
 0x2ab   :  { %2770 = vmatprep.subr.bf16.mxu0 %v4459_v10  ;;  %2856 = vmatprep.subr.bf16.mxu1 %v4461_v14 }
 0x2ae   :  { %2771 = vmatpush1.bf16.msra.mxu0 %v4458_v12  ;;  %2857 = vmatpush1.bf16.msra.mxu1 %v4460_v13 }
 0x2af   :  { %2783 = vmatprep.subr.bf16.mxu0 %v4467_v18  ;;  %2869 = vmatprep.subr.bf16.mxu1 %v4469_v22 }
 0x344   :  { %v5346_v23 = vpop.f32.mrb[4].mxu0  ;;  %v5348_v24 = vpop.f32.mrb[4].mxu1 }
 0x345   :  { %v966_v25 = vmul.f32 0.125, %v5346_v23  ;;  %v1002_v26 = vmul.f32 %v5346_v23, %v5346_v23  ;;  %v968_v27 = vmul.f32 0.125, %v5348_v24  ;;  %v1004_v28 = vmul.f32 %v5348_v24, %v5348_v24  ;;  %v5356_v29 = vpop.f32.mrb[5].mxu0  ;;  %v5358_v30 = vpop.f32.mrb[5].mxu1 }
 0x346   :  { %v967_v32 = vmul.f32 0.125, %v5356_v29  ;;  %v1003_v34 = vmul.f32 %v5356_v29, %v5356_v29  ;;  %v969_v35 = vmul.f32 0.125, %v5358_v30  ;;  %v1005_v36 = vmul.f32 %v5358_v30, %v5358_v30  ;;  %v5366_v37 = vpop.f32.mrb[6].mxu0  ;;  %v5368_v38 = vpop.f32.mrb[6].mxu1 }
 0x347   :  { %v1010_v42 = vmul.f32 0.125, %v1002_v26  ;;  %v1012_v44 = vmul.f32 0.125, %v1004_v28  ;;  %v970_v46 = vmul.f32 0.0, %v5366_v37  ;;  %v1006_v47 = vmul.f32 %v5366_v37, %v5366_v37  ;;  %v5373_v48 = vpop.f32.mrb[7].mxu0  ;;  %v5375_v50 = vpop.f32.mrb[7].mxu1 }
 0x348   :  { %v1011_v51 = vmul.f32 0.125, %v1003_v34  ;;  %v1013_v52 = vmul.f32 0.125, %v1005_v36  ;;  %v972_v53 = vmul.f32 0.0, %v5368_v38  ;;  %v1008_v54 = vmul.f32 %v5368_v38, %v5368_v38 }
 0x349   :  { %v974_v55 = vadd.f32 %v970_v46, %v966_v25  ;;  %v1014_v56 = vmul.f32 0.0, %v1006_v47  ;;  %v971_v57 = vmul.f32 0.0, %v5373_v48  ;;  %v1007_v58 = vmul.f32 %v5373_v48, %v5373_v48 }
 0x34a   :  { %v988_v59 = vadd.f32 %v972_v53, %v968_v27  ;;  %v1016_v49 = vmul.f32 0.0, %v1008_v54  ;;  %v973_v60 = vmul.f32 0.0, %v5375_v50  ;;  %v1009_v43 = vmul.f32 %v5375_v50, %v5375_v50 }
 0x34b   :  { %v975_v61 = vrot.slane %v974_v55, 4  ;;  %v1018_v41 = vadd.f32 %v1014_v56, %v1010_v42  ;;  %v981_v62 = vadd.f32 %v971_v57, %v967_v32  ;;  %v1015_v45 = vmul.f32 0.0, %v1007_v58 }
 0x34c   :  { %v989_v63 = vrot.slane %v988_v59, 4  ;;  %v1032_v0 = vadd.f32 %v1016_v49, %v1012_v44  ;;  %v995_v1 = vadd.f32 %v973_v60, %v969_v35  ;;  %v1017_v2 = vmul.f32 0.0, %v1009_v43 }
 0x34d   :  { %v976_v3 = vadd.f32 %v975_v61, %v974_v55  ;;  %v1019_v4 = vrot.slane %v1018_v41, 4  ;;  %v982_v5 = vrot.slane %v981_v62, 4  ;;  %v1025_v6 = vadd.f32 %v1015_v45, %v1011_v51 }
 0x34e   :  { %v990_v7 = vadd.f32 %v989_v63, %v988_v59  ;;  %v1033_v8 = vrot.slane %v1032_v0, 4  ;;  %v996_v9 = vrot.slane %v995_v1, 4  ;;  %v1039_v10 = vadd.f32 %v1017_v2, %v1013_v52 }
 0x34f   :  { %v977_v11 = vrot.slane %v976_v3, 2  ;;  %v1020_v12 = vadd.f32 %v1019_v4, %v1018_v41  ;;  %v983_v13 = vadd.f32 %v982_v5, %v981_v62  ;;  %v1026_v14 = vrot.slane %v1025_v6, 4 }
 0x350   :  { %v991_v18 = vrot.slane %v990_v7, 2  ;;  %v1034_v22 = vadd.f32 %v1033_v8, %v1032_v0  ;;  %v997_v25 = vadd.f32 %v996_v9, %v995_v1  ;;  %v1040_v26 = vrot.slane %v1039_v10, 4 }
 0x351   :  { %v978_v27 = vadd.f32 %v977_v11, %v976_v3  ;;  %v1021_v28 = vrot.slane %v1020_v12, 2  ;;  %v984_v32 = vrot.slane %v983_v13, 2  ;;  %v1027_v34 = vadd.f32 %v1026_v14, %v1025_v6 }
 0x352   :  { %v992_v35 = vadd.f32 %v991_v18, %v990_v7  ;;  %v1035_v36 = vrot.slane %v1034_v22, 2  ;;  %v998_v42 = vrot.slane %v997_v25, 2  ;;  %v1041_v44 = vadd.f32 %v1040_v26, %v1039_v10 }
 0x353   :  { %v979_v46 = vrot.slane %v978_v27, 1  ;;  %v1022_v47 = vadd.f32 %v1021_v28, %v1020_v12  ;;  %v985_v51 = vadd.f32 %v984_v32, %v983_v13  ;;  %v1028_v52 = vrot.slane %v1027_v34, 2 }
 0x354   :  { %v993_v53 = vrot.slane %v992_v35, 1  ;;  %v1036_v54 = vadd.f32 %v1035_v36, %v1034_v22  ;;  %v999_v55 = vadd.f32 %v998_v42, %v997_v25  ;;  %v1042_v56 = vrot.slane %v1041_v44, 2 }
 0x355   :  { %v980_v57 = vadd.f32 %v979_v46, %v978_v27  ;;  %v1023_v58 = vrot.slane %v1022_v47, 1  ;;  %v986_v59 = vrot.slane %v985_v51, 1  ;;  %v1029_v49 = vadd.f32 %v1028_v52, %v1027_v34 }
 0x356   :  { %v994_v60 = vadd.f32 %v993_v53, %v992_v35  ;;  %v1037_v43 = vrot.slane %v1036_v54, 1  ;;  %v1000_v61 = vrot.slane %v999_v55, 1  ;;  %v1043_v41 = vadd.f32 %v1042_v56, %v1041_v44  ;;  %v106_v44 = vld [vmem:[%s5635_s6 + $0x6] sm:$0xf] }
 0x357   :  { %v1024_v62 = vadd.f32 %v1023_v58, %v1022_v47  ;;  %v1046_v45 = vmul.f32 %v980_v57, %v980_v57  ;;  %v987_v63 = vadd.f32 %v986_v59, %v985_v51  ;;  %v1030_v0 = vrot.slane %v1029_v49, 1 }
 0x358   :  { %v1038_v1 = vadd.f32 %v1037_v43, %v1036_v54  ;;  %v1048_v2 = vmul.f32 %v994_v60, %v994_v60  ;;  %v1001_v3 = vadd.f32 %v1000_v61, %v999_v55  ;;  %v1044_v4 = vrot.slane %v1043_v41, 1 }
 0x359   :  { %v1050_v5 = vsub.f32 %v1024_v62, %v1046_v45  ;;  %v1031_v6 = vadd.f32 %v1030_v0, %v1029_v49  ;;  %v1047_v7 = vmul.f32 %v987_v63, %v987_v63  ;;  %v5393_v47 = vsub.s32 2, %v5301_v31 }
 0x35a   :  { %v1052_v8 = vsub.f32 %v1038_v1, %v1048_v2  ;;  %v1045_v9 = vadd.f32 %v1044_v4, %v1043_v41  ;;  %v1049_v10 = vmul.f32 %v1001_v3, %v1001_v3  ;;  %v5396_v51 = vsub.s32 3, %v5301_v31 }
 0x35b   :  { %v1054_v11 = vadd.f32 0.8, %v1050_v5  ;;  %v1051_v12 = vsub.f32 %v1031_v6, %v1047_v7 }
 0x35c   :  { %v1056_v13 = vadd.f32 0.8, %v1052_v8  ;;  %v1053_v14 = vsub.f32 %v1045_v9, %v1049_v10 }
 0x35d   :  { %5005 = vrsqrt.f32 %v1054_v11  ;;  %v1055_v18 = vadd.f32 0.8, %v1051_v12 }
 0x35e   :  { %5007 = vrsqrt.f32 %v1056_v13  ;;  %v1057_v22 = vadd.f32 0.8, %v1053_v14 }
 0x35f   :  { %5009 = vrsqrt.f32 %v1055_v18 }
 0x360   :  { %5011 = vrsqrt.f32 %v1057_v22 }
 0x367   :  { %v5006_v25 = vpop.eup %5005 }
 0x368   :  { %v5008_v26 = vpop.eup %5007 }
 0x369   :  { %v5010_v27 = vpop.eup %5009 }
 0x36a   :  { %v5012_v28 = vpop.eup %5011  ;;  %v1066_v32 = vcombine.low %v5006_v25, %v5010_v27 }
 0x36b   :  { %v1067_v34 = vcombine.low %v5008_v26, %v5012_v28 }
 0x36c   :  { %v1074_v35 = vrot.slane %v1066_v32, %v5304_v33 }
 0x36d   :  { %v1081_v36 = vrot.slane %v1067_v34, %v5304_v33  ;;  %v1340_v34 = vld [vmem:[#allocation7 + $0x440] sm:$0xff] }
 0x36f   :  { %v1082_v42 = vcombine.low %v1074_v35, %v1081_v36 }
 0x371   :  { %v1089_v46 = vrot.slane %v1082_v42, %v5304_v33 }
 0x373   :  { %v1091_v52 = vmul.f32 %v1089_v46, %v106_v44  ;;  %v1344_v46 = vld [vmem:[#allocation7 + $0x460] sm:$0xff] }
 0x375   :  { %v1096_v53 = vrot.slane %v1091_v52, %v5312_v39  ;;  %v1100_v54 = vrot.slane %v1091_v52, %v5315_v40  ;;  %v1104_v55 = vrot.slane %v1091_v52, %v5393_v47  ;;  %v1108_v56 = vrot.slane %v1091_v52, %v5396_v51  ;;  %v1341_v52 = vld [vmem:[#allocation7 + $0x448] sm:$0xff] }
 0x377   :  { %v1113_v58 = vmul.f32 %v1096_v53, %v980_v57  ;;  %v1114_v59 = vmul.f32 %v1100_v54, %v987_v63  ;;  %v1115_v49 = vmul.f32 %v1104_v55, %v994_v60  ;;  %v1116_v43 = vmul.f32 %v1108_v56, %v1001_v3 }
 0x378   :  { %v1150_v61 = vmul.f32 %v1108_v56, %v5358_v30  ;;  %v1154_v41 = vmul.f32 %v1108_v56, %v5375_v50  ;;  %v1148_v62 = vmul.f32 %v1100_v54, %v5356_v29  ;;  %v1152_v45 = vmul.f32 %v1100_v54, %v5373_v48  ;;  %v107_v29 = vld [vmem:[%s5635_s6 + $0xa] sm:$0xf] }
 0x379   :  { %v1121_v0 = vcombine.low %v1113_v58, %v1114_v59  ;;  %v1122_v1 = vcombine.low %v1115_v49, %v1116_v43  ;;  %v1147_v2 = vmul.f32 %v1096_v53, %v5346_v23  ;;  %v1151_v4 = vmul.f32 %v1096_v53, %v5366_v37  ;;  %v1345_v53 = vld [vmem:[#allocation7 + $0x468] sm:$0xff]  ;;  %v1348_v49 = vld [vmem:[#allocation7 + $0x480] sm:$0xff] }
 0x37a   :  { %v1149_v5 = vmul.f32 %v1104_v55, %v5348_v24  ;;  %v1153_v57 = vmul.f32 %v1104_v55, %v5368_v38 }
 0x37b   :  { %v1129_v60 = vrot.slane %v1121_v0, %v5304_v33  ;;  %v1136_v30 = vrot.slane %v1122_v1, %v5304_v33  ;;  %v1353_v0 = vld [vmem:[#allocation7 + $0x4a8] sm:$0xff] }
 0x37d   :  { %v1137_v63 = vcombine.low %v1129_v60, %v1136_v30  ;;  %v1356_v60 = vld [vmem:[#allocation7 + $0x4c0] sm:$0xff] }
 0x37e   :  { %v1360_v30 = vld [vmem:[#allocation7 + $0x4e0] sm:$0xff] }
 0x37f   :  { %v1144_v48 = vrot.slane %v1137_v63, %v5304_v33  ;;  %v1357_v63 = vld [vmem:[#allocation7 + $0x4c8] sm:$0xff]  ;;  %v4491_v17 = vcombine.high %v1356_v60, %v1360_v30 }
 0x381   :  { %v1146_v50 = vsub.f32 %v107_v29, %v1144_v48  ;;  %v1361_v29 = vld [vmem:[#allocation7 + $0x4e8] sm:$0xff] }
 0x382   :  { %v4493_v19 = vcombine.high %v1357_v63, %v1361_v29  ;;  %v1365_v48 = vld [vmem:[#allocation7 + $0x508] sm:$0xff] }
 0x383   :  { %v1171_v23 = vrot.slane %v1146_v50, %v5396_v51  ;;  %v1163_v37 = vrot.slane %v1146_v50, %v5315_v40  ;;  %v1159_v24 = vrot.slane %v1146_v50, %v5312_v39  ;;  %v1167_v38 = vrot.slane %v1146_v50, %v5393_v47  ;;  %v1369_v50 = vld [vmem:[#allocation7 + $0x528] sm:$0xff] }
 0x385   :  { %v1179_v3 = vadd.f32 %v1171_v23, %v1150_v61  ;;  %v1183_v6 = vadd.f32 %v1171_v23, %v1154_v41  ;;  %v1177_v7 = vadd.f32 %v1163_v37, %v1148_v62  ;;  %v1181_v8 = vadd.f32 %v1163_v37, %v1152_v45  ;;  %v1352_v62 = vld [vmem:[#allocation7 + $0x4a0] sm:$0xff]  ;;  %v1349_v45 = vld [vmem:[#allocation7 + $0x488] sm:$0xff] }
 0x386   :  { %v1176_v9 = vadd.f32 %v1159_v24, %v1147_v2  ;;  %v1180_v10 = vadd.f32 %v1159_v24, %v1151_v4  ;;  %v1178_v11 = vadd.f32 %v1167_v38, %v1149_v5  ;;  %v1182_v12 = vadd.f32 %v1167_v38, %v1153_v57 }
 0x387   :  { %v1191_v13 = vmul.f32 0.2, %v1183_v6  ;;  %v1185_v14 = vmul.f32 0.2, %v1177_v7  ;;  %v1189_v18 = vmul.f32 0.2, %v1181_v8  ;;  %v4475_v61 = vcombine.high %v1340_v34, %v1344_v46 }
 0x388   :  { %v1184_v22 = vmul.f32 0.2, %v1176_v9  ;;  %v1188_v25 = vmul.f32 0.2, %v1180_v10  ;;  %v1187_v26 = vmul.f32 0.2, %v1179_v3  ;;  %v4477_v41 = vcombine.high %v1341_v52, %v1345_v53 }
 0x389   :  { %v1199_v27 = vmax.f32 %v1183_v6, %v1191_v13  ;;  %v1193_v28 = vmax.f32 %v1177_v7, %v1185_v14  ;;  %v1197_v32 = vmax.f32 %v1181_v8, %v1189_v18  ;;  %v1186_v35 = vmul.f32 0.2, %v1178_v11  ;;  %v1376_v6 = vld [vmem:[#allocation7 + $0x560] sm:$0xff]  ;;  %v1373_v7 = vld [vmem:[#allocation7 + $0x548] sm:$0xff] }
 0x38a   :  { %v1192_v36 = vmax.f32 %v1176_v9, %v1184_v22  ;;  %v1196_v42 = vmax.f32 %v1180_v10, %v1188_v25  ;;  %v1195_v44 = vmax.f32 %v1179_v3, %v1187_v26  ;;  %v1190_v54 = vmul.f32 0.2, %v1182_v12  ;;  %v1372_v3 = vld [vmem:[#allocation7 + $0x540] sm:$0xff]  ;;  %v1377_v8 = vld [vmem:[#allocation7 + $0x568] sm:$0xff] }
 0x38b   :  { %v5420_v55 = vpack.c.bf16 %v1197_v32, %v1193_v28  ;;  %v1194_v56 = vmax.f32 %v1178_v11, %v1186_v35  ;;  %v4474_v2 = vcombine.low %v1340_v34, %v1344_v46  ;;  %v4476_v4 = vcombine.low %v1341_v52, %v1345_v53  ;;  %v1380_v13 = vld [vmem:[#allocation7 + $0x580] sm:$0xff]  ;;  %v1381_v18 = vld [vmem:[#allocation7 + $0x588] sm:$0xff] }
 0x38c   :  { %v5422_v58 = vpack.c.bf16 %v1196_v42, %v1192_v36  ;;  %v5424_v59 = vpack.c.bf16 %v1199_v27, %v1195_v44  ;;  %v1198_v43 = vmax.f32 %v1182_v12, %v1190_v54  ;;  %v4483_v5 = vcombine.high %v1348_v49, %v1352_v62  ;;  %v1384_v14 = vld [vmem:[#allocation7 + $0x5a0] sm:$0xff]  ;;  %v1385_v22 = vld [vmem:[#allocation7 + $0x5a8] sm:$0xff] }
 0x38d   :  { %2772 = vmatprep.mubr.bf16.mxu0 %v5420_v55  ;;  %2858 = vmatprep.mubr.bf16.mxu1 %v5420_v55  ;;  %v4485_v57 = vcombine.high %v1349_v45, %v1353_v0  ;;  %v4482_v15 = vcombine.low %v1348_v49, %v1352_v62  ;;  %v4484_v16 = vcombine.low %v1349_v45, %v1353_v0  ;;  %v1388_v32 = vld [vmem:[#allocation7 + $0x5c0] sm:$0xff]  ;;  %v1389_v35 = vld [vmem:[#allocation7 + $0x5c8] sm:$0xff] }
 0x38e   :  { %2773 = vmatmul.mubr.bf16.vlgmr.msra.gmra.mrb[8].mxu0 %v5422_v58  ;;  %2859 = vmatmul.mubr.bf16.vlgmr.msra.gmra.mrb[8].mxu1 %v5422_v58  ;;  %v5430_v1 = vpack.c.bf16 %v1198_v43, %v1194_v56  ;;  %v4490_v23 = vcombine.low %v1356_v60, %v1360_v30  ;;  %v4492_v37 = vcombine.low %v1357_v63, %v1361_v29  ;;  %v1392_v34 = vld [vmem:[#allocation7 + $0x5e0] sm:$0xff]  ;;  %v1393_v36 = vld [vmem:[#allocation7 + $0x5e8] sm:$0xff] }
 0x38f   :  { %2784 = vmatpush1.bf16.msra.mxu0 %v4466_v20  ;;  %2870 = vmatpush1.bf16.msra.mxu1 %v4468_v21  ;;  %v1364_v20 = vld [vmem:[#allocation7 + $0x500] sm:$0xff]  ;;  %v4501_v38 = vcombine.high %v1365_v48, %v1369_v50  ;;  %v4500_v10 = vcombine.low %v1365_v48, %v1369_v50  ;;  %v4507_v11 = vcombine.high %v1372_v3, %v1376_v6  ;;  %v1397_v56 = vld [vmem:[#allocation7 + $0x608] sm:$0xff] }
 0x390   :  { %2815 = vmatprep.mubr.bf16.mxu0 %v5424_v59  ;;  %2901 = vmatprep.mubr.bf16.mxu1 %v5424_v59  ;;  %v1368_v21 = vld [vmem:[#allocation7 + $0x520] sm:$0xff]  ;;  %v4509_v12 = vcombine.high %v1373_v7, %v1377_v8  ;;  %v4506_v25 = vcombine.low %v1372_v3, %v1376_v6  ;;  %v4508_v26 = vcombine.low %v1373_v7, %v1377_v8  ;;  %v1401_v49 = vld [vmem:[#allocation7 + $0x628] sm:$0xff] }
 0x391   :  { %2785 = vmatprep.subr.bf16.mxu0 %v4475_v61  ;;  %2871 = vmatprep.subr.bf16.mxu1 %v4477_v41  ;;  %v4499_v24 = vcombine.high %v1364_v20, %v1368_v21  ;;  %v4498_v9 = vcombine.low %v1364_v20, %v1368_v21  ;;  %v4515_v27 = vcombine.high %v1380_v13, %v1384_v14  ;;  %v1396_v53 = vld [vmem:[#allocation7 + $0x600] sm:$0xff] }
 0x392   :  { %v4517_v28 = vcombine.high %v1381_v18, %v1385_v22  ;;  %v4514_v42 = vcombine.low %v1380_v13, %v1384_v14  ;;  %v4516_v44 = vcombine.low %v1381_v18, %v1385_v22  ;;  %v4523_v46 = vcombine.high %v1388_v32, %v1392_v34  ;;  %v1400_v54 = vld [vmem:[#allocation7 + $0x620] sm:$0xff] }
 0x393   :  { %2786 = vmatpush1.bf16.msra.mxu0 %v4474_v2  ;;  %2872 = vmatpush1.bf16.msra.mxu1 %v4476_v4  ;;  %v4525_v52 = vcombine.high %v1389_v35, %v1393_v36  ;;  %v4522_v43 = vcombine.low %v1388_v32, %v1392_v34  ;;  %v4524_v61 = vcombine.low %v1389_v35, %v1393_v36  ;;  %v1404_v45 = vld [vmem:[#allocation7 + $0x640] sm:$0xff]  ;;  %v1405_v2 = vld [vmem:[#allocation7 + $0x648] sm:$0xff] }
 0x394   :  { %2787 = vmatprep.subr.bf16.mxu0 %v4483_v5  ;;  %2873 = vmatprep.subr.bf16.mxu1 %v4485_v57  ;;  %v4531_v41 = vcombine.high %v1396_v53, %v1400_v54  ;;  %v4533_v62 = vcombine.high %v1397_v56, %v1401_v49  ;;  %v1408_v0 = vld [vmem:[#allocation7 + $0x660] sm:$0xff]  ;;  %v1409_v4 = vld [vmem:[#allocation7 + $0x668] sm:$0xff]  ;;  %v4530_v5 = vcombine.low %v1396_v53, %v1400_v54 }
 0x395   :  { %v4532_v57 = vcombine.low %v1397_v56, %v1401_v49  ;;  %v4539_v60 = vcombine.high %v1404_v45, %v1408_v0  ;;  %v4541_v30 = vcombine.high %v1405_v2, %v1409_v4  ;;  %v1412_v63 = vld [vmem:[#allocation7 + $0x680] sm:$0xff] }
 0x396   :  { %v1416_v29 = vld [vmem:[#allocation7 + $0x6a0] sm:$0xff] }
 0x397   :  { %2788 = vmatpush1.bf16.msra.mxu0 %v4482_v15  ;;  %2874 = vmatpush1.bf16.msra.mxu1 %v4484_v16  ;;  %v1413_v15 = vld [vmem:[#allocation7 + $0x688] sm:$0xff]  ;;  %v4547_v20 = vcombine.high %v1412_v63, %v1416_v29  ;;  %v1420_v48 = vld [vmem:[#allocation7 + $0x6c0] sm:$0xff] }
 0x398   :  { %2789 = vmatprep.subr.bf16.mxu0 %v4491_v17  ;;  %2875 = vmatprep.subr.bf16.mxu1 %v4493_v19  ;;  %v1417_v16 = vld [vmem:[#allocation7 + $0x6a8] sm:$0xff]  ;;  %v4538_v17 = vcombine.low %v1404_v45, %v1408_v0  ;;  %v4540_v19 = vcombine.low %v1405_v2, %v1409_v4  ;;  %v1424_v50 = vld [vmem:[#allocation7 + $0x6e0] sm:$0xff]  ;;  %v1206_v2 = vld [vmem:[#allocation7 + $0x10] sm:$0xff] }
 0x399   :  { %v4549_v21 = vcombine.high %v1413_v15, %v1417_v16  ;;  %v4555_v3 = vcombine.high %v1420_v48, %v1424_v50  ;;  %v1428_v7 = vld [vmem:[#allocation7 + $0x700] sm:$0xff]  ;;  %v1210_v4 = vld [vmem:[#allocation7 + $0x30] sm:$0xff] }
 0x39a   :  { %v1432_v8 = vld [vmem:[#allocation7 + $0x720] sm:$0xff] }
 0x39b   :  { %2790 = vmatpush1.bf16.msra.mxu0 %v4490_v23  ;;  %2876 = vmatpush1.bf16.msra.mxu1 %v4492_v37  ;;  %v1421_v23 = vld [vmem:[#allocation7 + $0x6c8] sm:$0xff]  ;;  %v4563_v13 = vcombine.high %v1428_v7, %v1432_v8  ;;  %v1436_v18 = vld [vmem:[#allocation7 + $0x740] sm:$0xff] }
 0x39c   :  { %2791 = vmatprep.subr.bf16.mxu0 %v4499_v24  ;;  %2877 = vmatprep.subr.bf16.mxu1 %v4501_v38  ;;  %v1425_v37 = vld [vmem:[#allocation7 + $0x6e8] sm:$0xff]  ;;  %v4546_v24 = vcombine.low %v1412_v63, %v1416_v29  ;;  %v4548_v38 = vcombine.low %v1413_v15, %v1417_v16  ;;  %v1440_v22 = vld [vmem:[#allocation7 + $0x760] sm:$0xff]  ;;  %v4343_v63 = vcombine.high %v1206_v2, %v1210_v4  ;;  %v1214_v15 = vld [vmem:[#allocation7 + $0x50] sm:$0xff] }
 0x39d   :  { %v4557_v6 = vcombine.high %v1421_v23, %v1425_v37  ;;  %v4571_v32 = vcombine.high %v1436_v18, %v1440_v22  ;;  %v1444_v35 = vld [vmem:[#allocation7 + $0x780] sm:$0xff]  ;;  %v1218_v16 = vld [vmem:[#allocation7 + $0x70] sm:$0xff] }
 0x39e   :  { %v1448_v36 = vld [vmem:[#allocation7 + $0x7a0] sm:$0xff] }
 0x39f   :  { %2792 = vmatpush1.bf16.msra.mxu0 %v4498_v9  ;;  %2878 = vmatpush1.bf16.msra.mxu1 %v4500_v10  ;;  %v1429_v9 = vld [vmem:[#allocation7 + $0x708] sm:$0xff]  ;;  %v4579_v53 = vcombine.high %v1444_v35, %v1448_v36  ;;  %v1452_v56 = vld [vmem:[#allocation7 + $0x7c0] sm:$0xff] }
 0x3a0   :  { %2793 = vmatprep.subr.bf16.mxu0 %v4507_v11  ;;  %2879 = vmatprep.subr.bf16.mxu1 %v4509_v12  ;;  %v1433_v10 = vld [vmem:[#allocation7 + $0x728] sm:$0xff]  ;;  %v4554_v11 = vcombine.low %v1420_v48, %v1424_v50  ;;  %v4556_v12 = vcombine.low %v1421_v23, %v1425_v37  ;;  %v1456_v49 = vld [vmem:[#allocation7 + $0x7e0] sm:$0xff]  ;;  %v4351_v48 = vcombine.high %v1214_v15, %v1218_v16  ;;  %v1222_v23 = vld [vmem:[#allocation7 + $0x90] sm:$0xff] }
 0x3a1   :  { %v4565_v14 = vcombine.high %v1429_v9, %v1433_v10  ;;  %v4587_v45 = vcombine.high %v1452_v56, %v1456_v49  ;;  %v1226_v37 = vld [vmem:[#allocation7 + $0xb0] sm:$0xff] }
 0x3a3   :  { %2794 = vmatpush1.bf16.msra.mxu0 %v4506_v25  ;;  %2880 = vmatpush1.bf16.msra.mxu1 %v4508_v26  ;;  %v1437_v25 = vld [vmem:[#allocation7 + $0x748] sm:$0xff] }
 0x3a4   :  { %2795 = vmatprep.subr.bf16.mxu0 %v4515_v27  ;;  %2881 = vmatprep.subr.bf16.mxu1 %v4517_v28  ;;  %v1441_v26 = vld [vmem:[#allocation7 + $0x768] sm:$0xff]  ;;  %v4562_v27 = vcombine.low %v1428_v7, %v1432_v8  ;;  %v4564_v28 = vcombine.low %v1429_v9, %v1433_v10  ;;  %v4359_v7 = vcombine.high %v1222_v23, %v1226_v37  ;;  %v1230_v9 = vld [vmem:[#allocation7 + $0xd0] sm:$0xff] }
 0x3a5   :  { %v4573_v34 = vcombine.high %v1437_v25, %v1441_v26  ;;  %v1234_v10 = vld [vmem:[#allocation7 + $0xf0] sm:$0xff] }
 0x3a7   :  { %2796 = vmatpush1.bf16.msra.mxu0 %v4514_v42  ;;  %2882 = vmatpush1.bf16.msra.mxu1 %v4516_v44  ;;  %v1445_v42 = vld [vmem:[#allocation7 + $0x788] sm:$0xff] }
 0x3a8   :  { %2797 = vmatprep.subr.bf16.mxu0 %v4523_v46  ;;  %2883 = vmatprep.subr.bf16.mxu1 %v4525_v52  ;;  %v1449_v44 = vld [vmem:[#allocation7 + $0x7a8] sm:$0xff]  ;;  %v4570_v46 = vcombine.low %v1436_v18, %v1440_v22  ;;  %v4572_v52 = vcombine.low %v1437_v25, %v1441_v26  ;;  %v4367_v18 = vcombine.high %v1230_v9, %v1234_v10  ;;  %v1238_v25 = vld [vmem:[#allocation7 + $0x110] sm:$0xff] }
 0x3a9   :  { %v4581_v54 = vcombine.high %v1445_v42, %v1449_v44  ;;  %v1242_v26 = vld [vmem:[#allocation7 + $0x130] sm:$0xff] }
 0x3ab   :  { %2798 = vmatpush1.bf16.msra.mxu0 %v4522_v43  ;;  %2884 = vmatpush1.bf16.msra.mxu1 %v4524_v61  ;;  %v1453_v43 = vld [vmem:[#allocation7 + $0x7c8] sm:$0xff] }
 0x3ac   :  { %2799 = vmatprep.subr.bf16.mxu0 %v4531_v41  ;;  %2885 = vmatprep.subr.bf16.mxu1 %v4533_v62  ;;  %v1457_v61 = vld [vmem:[#allocation7 + $0x7e8] sm:$0xff]  ;;  %v4578_v41 = vcombine.low %v1444_v35, %v1448_v36  ;;  %v4580_v62 = vcombine.low %v1445_v42, %v1449_v44  ;;  %v1246_v36 = vld [vmem:[#allocation7 + $0x150] sm:$0xff]  ;;  %v1247_v44 = vld [vmem:[#allocation7 + $0x158] sm:$0xff] }
 0x3ad   :  { %v4589_v0 = vcombine.high %v1453_v43, %v1457_v61  ;;  %v1250_v42 = vld [vmem:[#allocation7 + $0x170] sm:$0xff] }
 0x3af   :  { %2800 = vmatpush1.bf16.msra.mxu0 %v4530_v5  ;;  %2886 = vmatpush1.bf16.msra.mxu1 %v4532_v57  ;;  %v1207_v5 = vld [vmem:[#allocation7 + $0x18] sm:$0xff] }
 0x3b0   :  { %2801 = vmatprep.subr.bf16.mxu0 %v4539_v60  ;;  %2887 = vmatprep.subr.bf16.mxu1 %v4541_v30  ;;  %v1211_v57 = vld [vmem:[#allocation7 + $0x38] sm:$0xff]  ;;  %v4586_v60 = vcombine.low %v1452_v56, %v1456_v49  ;;  %v4588_v30 = vcombine.low %v1453_v43, %v1457_v61  ;;  %v1254_v49 = vld [vmem:[#allocation7 + $0x190] sm:$0xff] }
 0x3b1   :  { %v4345_v29 = vcombine.high %v1207_v5, %v1211_v57  ;;  %v1258_v43 = vld [vmem:[#allocation7 + $0x1b0] sm:$0xff]  ;;  %v1255_v61 = vld [vmem:[#allocation7 + $0x198] sm:$0xff] }
 0x3b3   :  { %2802 = vmatpush1.bf16.msra.mxu0 %v4538_v17  ;;  %2888 = vmatpush1.bf16.msra.mxu1 %v4540_v19  ;;  %v1215_v17 = vld [vmem:[#allocation7 + $0x58] sm:$0xff] }
 0x3b4   :  { %2803 = vmatprep.subr.bf16.mxu0 %v4547_v20  ;;  %2889 = vmatprep.subr.bf16.mxu1 %v4549_v21  ;;  %v1219_v19 = vld [vmem:[#allocation7 + $0x78] sm:$0xff]  ;;  %v4342_v20 = vcombine.low %v1206_v2, %v1210_v4  ;;  %v4344_v21 = vcombine.low %v1207_v5, %v1211_v57  ;;  %v1262_v4 = vld [vmem:[#allocation7 + $0x1d0] sm:$0xff] }
 0x3b5   :  { %v4353_v50 = vcombine.high %v1215_v17, %v1219_v19  ;;  %v1266_v5 = vld [vmem:[#allocation7 + $0x1f0] sm:$0xff]  ;;  %v1263_v57 = vld [vmem:[#allocation7 + $0x1d8] sm:$0xff] }
 0x3b7   :  { %2804 = vmatpush1.bf16.msra.mxu0 %v4546_v24  ;;  %2890 = vmatpush1.bf16.msra.mxu1 %v4548_v38  ;;  %v1223_v24 = vld [vmem:[#allocation7 + $0x98] sm:$0xff] }
 0x3b8   :  { %2805 = vmatprep.subr.bf16.mxu0 %v4555_v3  ;;  %2891 = vmatprep.subr.bf16.mxu1 %v4557_v6  ;;  %v1227_v38 = vld [vmem:[#allocation7 + $0xb8] sm:$0xff]  ;;  %v4350_v3 = vcombine.low %v1214_v15, %v1218_v16  ;;  %v4352_v6 = vcombine.low %v1215_v17, %v1219_v19  ;;  %v1270_v16 = vld [vmem:[#allocation7 + $0x210] sm:$0xff] }
 0x3b9   :  { %v4361_v8 = vcombine.high %v1223_v24, %v1227_v38  ;;  %v1274_v17 = vld [vmem:[#allocation7 + $0x230] sm:$0xff]  ;;  %v1271_v19 = vld [vmem:[#allocation7 + $0x218] sm:$0xff] }
 0x3bb   :  { %2806 = vmatpush1.bf16.msra.mxu0 %v4554_v11  ;;  %2892 = vmatpush1.bf16.msra.mxu1 %v4556_v12  ;;  %v1231_v11 = vld [vmem:[#allocation7 + $0xd8] sm:$0xff] }
 0x3bc   :  { %2807 = vmatprep.subr.bf16.mxu0 %v4563_v13  ;;  %2893 = vmatprep.subr.bf16.mxu1 %v4565_v14  ;;  %v1235_v12 = vld [vmem:[#allocation7 + $0xf8] sm:$0xff]  ;;  %v4358_v13 = vcombine.low %v1222_v23, %v1226_v37  ;;  %v4360_v14 = vcombine.low %v1223_v24, %v1227_v38  ;;  %v1278_v37 = vld [vmem:[#allocation7 + $0x250] sm:$0xff] }
 0x3bd   :  { %v4369_v22 = vcombine.high %v1231_v11, %v1235_v12  ;;  %v1282_v24 = vld [vmem:[#allocation7 + $0x270] sm:$0xff]  ;;  %v1279_v38 = vld [vmem:[#allocation7 + $0x258] sm:$0xff] }
 0x3bf   :  { %2808 = vmatpush1.bf16.msra.mxu0 %v4562_v27  ;;  %2894 = vmatpush1.bf16.msra.mxu1 %v4564_v28  ;;  %v1243_v27 = vld [vmem:[#allocation7 + $0x138] sm:$0xff]  ;;  %v4366_v28 = vcombine.low %v1230_v9, %v1234_v10  ;;  %v1286_v10 = vld [vmem:[#allocation7 + $0x290] sm:$0xff] }
 0x3c0   :  { %2809 = vmatprep.subr.bf16.mxu0 %v4571_v32  ;;  %2895 = vmatprep.subr.bf16.mxu1 %v4573_v34  ;;  %v4368_v32 = vcombine.low %v1231_v11, %v1235_v12  ;;  %v4375_v34 = vcombine.high %v1238_v25, %v1242_v26  ;;  %v1290_v11 = vld [vmem:[#allocation7 + $0x2b0] sm:$0xff]  ;;  %v1287_v12 = vld [vmem:[#allocation7 + $0x298] sm:$0xff] }
 0x3c3   :  { %2810 = vmatpush1.bf16.msra.mxu0 %v4570_v46  ;;  %2896 = vmatpush1.bf16.msra.mxu1 %v4572_v52  ;;  %v1251_v46 = vld [vmem:[#allocation7 + $0x178] sm:$0xff]  ;;  %v4374_v52 = vcombine.low %v1238_v25, %v1242_v26  ;;  %v1294_v26 = vld [vmem:[#allocation7 + $0x2d0] sm:$0xff] }
 0x3c4   :  { %2811 = vmatprep.subr.bf16.mxu0 %v4579_v53  ;;  %2897 = vmatprep.subr.bf16.mxu1 %v4581_v54  ;;  %v4383_v54 = vcombine.high %v1246_v36, %v1250_v42  ;;  %v4385_v56 = vcombine.high %v1247_v44, %v1251_v46 }
 0x3c7   :  { %2812 = vmatpush1.bf16.msra.mxu0 %v4578_v41  ;;  %2898 = vmatpush1.bf16.msra.mxu1 %v4580_v62  ;;  %v1259_v41 = vld [vmem:[#allocation7 + $0x1b8] sm:$0xff]  ;;  %v4382_v62 = vcombine.low %v1246_v36, %v1250_v42  ;;  %v1302_v42 = vld [vmem:[#allocation7 + $0x310] sm:$0xff] }
 0x3c8   :  { %2813 = vmatprep.subr.bf16.mxu0 %v4587_v45  ;;  %2899 = vmatprep.subr.bf16.mxu1 %v4589_v0  ;;  %v4384_v45 = vcombine.low %v1247_v44, %v1251_v46  ;;  %v4391_v0 = vcombine.high %v1254_v49, %v1258_v43  ;;  %v4393_v2 = vcombine.high %v1255_v61, %v1259_v41  ;;  %v1306_v44 = vld [vmem:[#allocation7 + $0x330] sm:$0xff]  ;;  %v1303_v46 = vld [vmem:[#allocation7 + $0x318] sm:$0xff] }
 0x3cb   :  { %2814 = vmatpush1.bf16.msra.mxu0 %v4586_v60  ;;  %2900 = vmatpush1.bf16.msra.mxu1 %v4588_v30  ;;  %v1267_v60 = vld [vmem:[#allocation7 + $0x1f8] sm:$0xff]  ;;  %v4390_v30 = vcombine.low %v1254_v49, %v1258_v43  ;;  %v1310_v43 = vld [vmem:[#allocation7 + $0x350] sm:$0xff] }
 0x3cc   :  { %2912 = vmatprep.subr.bf16.mxu0 %v4343_v63  ;;  %2998 = vmatprep.subr.bf16.mxu1 %v4345_v29  ;;  %v4392_v63 = vcombine.low %v1255_v61, %v1259_v41  ;;  %v4399_v29 = vcombine.high %v1262_v4, %v1266_v5  ;;  %v4401_v15 = vcombine.high %v1263_v57, %v1267_v60  ;;  %v1314_v61 = vld [vmem:[#allocation7 + $0x370] sm:$0xff]  ;;  %v1311_v41 = vld [vmem:[#allocation7 + $0x358] sm:$0xff] }
 0x3ce   :  { %2816 = vmatmul.mubr.bf16.vlgmr.msra.gmra.mrb[8].mxu0 %v5430_v1  ;;  %2902 = vmatmul.mubr.bf16.vlgmr.msra.gmra.mrb[8].mxu1 %v5430_v1 }
 0x3cf   :  { %2913 = vmatpush1.bf16.msra.mxu0 %v4342_v20  ;;  %2944 = vmatprep.mubr.bf16.mxu0 %v5420_v55  ;;  %v1275_v20 = vld [vmem:[#allocation7 + $0x238] sm:$0xff] }
 0x3d0   :  { %2999 = vmatpush1.bf16.msra.mxu1 %v4344_v21  ;;  %3030 = vmatprep.mubr.bf16.mxu1 %v5420_v55  ;;  %v1239_v55 = vld [vmem:[#allocation7 + $0x118] sm:$0xff]  ;;  %v4398_v21 = vcombine.low %v1262_v4, %v1266_v5  ;;  %v4409_v23 = vcombine.high %v1271_v19, %v1275_v20  ;;  %v1318_v5 = vld [vmem:[#allocation7 + $0x390] sm:$0xff] }
 0x3d1   :  { %2914 = vmatprep.subr.bf16.mxu0 %v4351_v48  ;;  %3000 = vmatprep.subr.bf16.mxu1 %v4353_v50  ;;  %v4377_v35 = vcombine.high %v1239_v55, %v1243_v27  ;;  %v4376_v53 = vcombine.low %v1239_v55, %v1243_v27  ;;  %v4400_v48 = vcombine.low %v1263_v57, %v1267_v60  ;;  %v1298_v55 = vld [vmem:[#allocation7 + $0x2f0] sm:$0xff]  ;;  %v1295_v27 = vld [vmem:[#allocation7 + $0x2d8] sm:$0xff] }
 0x3d2   :  { %v4407_v50 = vcombine.high %v1270_v16, %v1274_v17  ;;  %v1322_v57 = vld [vmem:[#allocation7 + $0x3b0] sm:$0xff]  ;;  %v1319_v60 = vld [vmem:[#allocation7 + $0x398] sm:$0xff] }
 0x3d3   :  { %2915 = vmatpush1.bf16.msra.mxu0 %v4350_v3  ;;  %v1283_v3 = vld [vmem:[#allocation7 + $0x278] sm:$0xff] }
 0x3d4   :  { %3001 = vmatpush1.bf16.msra.mxu1 %v4352_v6  ;;  %2916 = vmatprep.subr.bf16.mxu0 %v4359_v7  ;;  %v4406_v6 = vcombine.low %v1270_v16, %v1274_v17  ;;  %v4408_v7 = vcombine.low %v1271_v19, %v1275_v20  ;;  %v4417_v9 = vcombine.high %v1279_v38, %v1283_v3  ;;  %v1326_v17 = vld [vmem:[#allocation7 + $0x3d0] sm:$0xff]  ;;  %v1327_v20 = vld [vmem:[#allocation7 + $0x3d8] sm:$0xff] }
 0x3d5   :  { %3002 = vmatprep.subr.bf16.mxu1 %v4361_v8  ;;  %v4415_v8 = vcombine.high %v1278_v37, %v1282_v24  ;;  %v1330_v19 = vld [vmem:[#allocation7 + $0x3f0] sm:$0xff] }
 0x3d7   :  { %2917 = vmatpush1.bf16.msra.mxu0 %v4358_v13  ;;  %v1291_v13 = vld [vmem:[#allocation7 + $0x2b8] sm:$0xff] }
 0x3d8   :  { %3003 = vmatpush1.bf16.msra.mxu1 %v4360_v14  ;;  %2918 = vmatprep.subr.bf16.mxu0 %v4367_v18  ;;  %v4414_v14 = vcombine.low %v1278_v37, %v1282_v24  ;;  %v4416_v18 = vcombine.low %v1279_v38, %v1283_v3  ;;  %v4425_v25 = vcombine.high %v1287_v12, %v1291_v13  ;;  %v1334_v24 = vld [vmem:[#allocation7 + $0x410] sm:$0xff]  ;;  %v1335_v3 = vld [vmem:[#allocation7 + $0x418] sm:$0xff] }
 0x3d9   :  { %3004 = vmatprep.subr.bf16.mxu1 %v4369_v22  ;;  %v4423_v22 = vcombine.high %v1286_v10, %v1290_v11  ;;  %v1338_v38 = vld [vmem:[#allocation7 + $0x430] sm:$0xff] }
 0x3db   :  { %2919 = vmatpush1.bf16.msra.mxu0 %v4366_v28  ;;  %v1299_v28 = vld [vmem:[#allocation7 + $0x2f8] sm:$0xff] }
 0x3dc   :  { %3005 = vmatpush1.bf16.msra.mxu1 %v4368_v32  ;;  %2920 = vmatprep.subr.bf16.mxu0 %v4375_v34  ;;  %v4422_v32 = vcombine.low %v1286_v10, %v1290_v11  ;;  %v4424_v34 = vcombine.low %v1287_v12, %v1291_v13  ;;  %v4433_v36 = vcombine.high %v1295_v27, %v1299_v28  ;;  %v1342_v11 = vld [vmem:[#allocation7 + $0x450] sm:$0xff] }
 0x3dd   :  { %3006 = vmatprep.subr.bf16.mxu1 %v4377_v35  ;;  %v4431_v35 = vcombine.high %v1294_v26, %v1298_v55  ;;  %v1346_v12 = vld [vmem:[#allocation7 + $0x470] sm:$0xff]  ;;  %v4470_v13 = vcombine.low %v1334_v24, %v1338_v38 }
 0x3df   :  { %2921 = vmatpush1.bf16.msra.mxu0 %v4374_v52  ;;  %v1307_v52 = vld [vmem:[#allocation7 + $0x338] sm:$0xff] }
 0x3e0   :  { %3007 = vmatpush1.bf16.msra.mxu1 %v4376_v53  ;;  %2922 = vmatprep.subr.bf16.mxu0 %v4383_v54  ;;  %v4430_v53 = vcombine.low %v1294_v26, %v1298_v55  ;;  %v4432_v54 = vcombine.low %v1295_v27, %v1299_v28  ;;  %v4441_v49 = vcombine.high %v1303_v46, %v1307_v52  ;;  %v1350_v26 = vld [vmem:[#allocation7 + $0x490] sm:$0xff]  ;;  %v1351_v28 = vld [vmem:[#allocation7 + $0x498] sm:$0xff] }
 0x3e1   :  { %3008 = vmatprep.subr.bf16.mxu1 %v4385_v56  ;;  %v4439_v56 = vcombine.high %v1302_v42, %v1306_v44  ;;  %v1354_v55 = vld [vmem:[#allocation7 + $0x4b0] sm:$0xff] }
 0x3e3   :  { %2923 = vmatpush1.bf16.msra.mxu0 %v4382_v62  ;;  %v1315_v62 = vld [vmem:[#allocation7 + $0x378] sm:$0xff] }
 0x3e4   :  { %3009 = vmatpush1.bf16.msra.mxu1 %v4384_v45  ;;  %2924 = vmatprep.subr.bf16.mxu0 %v4391_v0  ;;  %v4438_v45 = vcombine.low %v1302_v42, %v1306_v44  ;;  %v4440_v0 = vcombine.low %v1303_v46, %v1307_v52  ;;  %v4449_v4 = vcombine.high %v1311_v41, %v1315_v62  ;;  %v1358_v44 = vld [vmem:[#allocation7 + $0x4d0] sm:$0xff]  ;;  %v1359_v52 = vld [vmem:[#allocation7 + $0x4d8] sm:$0xff] }
 0x3e5   :  { %3010 = vmatprep.subr.bf16.mxu1 %v4393_v2  ;;  %v4447_v2 = vcombine.high %v1310_v43, %v1314_v61  ;;  %v1362_v46 = vld [vmem:[#allocation7 + $0x4f0] sm:$0xff] }
 0x3e7   :  { %2925 = vmatpush1.bf16.msra.mxu0 %v4390_v30  ;;  %v1323_v30 = vld [vmem:[#allocation7 + $0x3b8] sm:$0xff] }
 0x3e8   :  { %3011 = vmatpush1.bf16.msra.mxu1 %v4392_v63  ;;  %2926 = vmatprep.subr.bf16.mxu0 %v4399_v29  ;;  %v4446_v63 = vcombine.low %v1310_v43, %v1314_v61  ;;  %v4448_v29 = vcombine.low %v1311_v41, %v1315_v62  ;;  %v4457_v16 = vcombine.high %v1319_v60, %v1323_v30  ;;  %v1366_v43 = vld [vmem:[#allocation7 + $0x510] sm:$0xff]  ;;  %v1367_v41 = vld [vmem:[#allocation7 + $0x518] sm:$0xff] }
 0x3e9   :  { %3012 = vmatprep.subr.bf16.mxu1 %v4401_v15  ;;  %v4455_v15 = vcombine.high %v1318_v5, %v1322_v57  ;;  %v1370_v61 = vld [vmem:[#allocation7 + $0x530] sm:$0xff]  ;;  %v1371_v62 = vld [vmem:[#allocation7 + $0x538] sm:$0xff] }
 0x3eb   :  { %2927 = vmatpush1.bf16.msra.mxu0 %v4398_v21  ;;  %v1331_v21 = vld [vmem:[#allocation7 + $0x3f8] sm:$0xff] }
 0x3ec   :  { %3013 = vmatpush1.bf16.msra.mxu1 %v4400_v48  ;;  %2928 = vmatprep.subr.bf16.mxu0 %v4407_v50  ;;  %v4454_v48 = vcombine.low %v1318_v5, %v1322_v57  ;;  %v4456_v50 = vcombine.low %v1319_v60, %v1323_v30  ;;  %v4465_v37 = vcombine.high %v1327_v20, %v1331_v21  ;;  %v1378_v5 = vld [vmem:[#allocation7 + $0x570] sm:$0xff]  ;;  %v1375_v57 = vld [vmem:[#allocation7 + $0x558] sm:$0xff] }
 0x3ed   :  { %3014 = vmatprep.subr.bf16.mxu1 %v4409_v23  ;;  %v4463_v23 = vcombine.high %v1326_v17, %v1330_v19  ;;  %v1379_v60 = vld [vmem:[#allocation7 + $0x578] sm:$0xff]  ;;  %v4502_v30 = vcombine.low %v1366_v43, %v1370_v61 }
 0x3ef   :  { %2929 = vmatpush1.bf16.msra.mxu0 %v4406_v6  ;;  %v1339_v6 = vld [vmem:[#allocation7 + $0x438] sm:$0xff] }
 0x3f0   :  { %3015 = vmatpush1.bf16.msra.mxu1 %v4408_v7  ;;  %2930 = vmatprep.subr.bf16.mxu0 %v4415_v8  ;;  %v4462_v7 = vcombine.low %v1326_v17, %v1330_v19  ;;  %v4464_v8 = vcombine.low %v1327_v20, %v1331_v21  ;;  %v4473_v10 = vcombine.high %v1335_v3, %v1339_v6  ;;  %v1386_v17 = vld [vmem:[#allocation7 + $0x5b0] sm:$0xff]  ;;  %v1383_v19 = vld [vmem:[#allocation7 + $0x598] sm:$0xff] }
 0x3f1   :  { %3016 = vmatprep.subr.bf16.mxu1 %v4417_v9  ;;  %v4471_v9 = vcombine.high %v1334_v24, %v1338_v38  ;;  %v1387_v20 = vld [vmem:[#allocation7 + $0x5b8] sm:$0xff]  ;;  %v1394_v24 = vld [vmem:[#allocation7 + $0x5f0] sm:$0xff] }
 0x3f2   :  { %v1391_v38 = vld [vmem:[#allocation7 + $0x5d8] sm:$0xff] }
 0x3f3   :  { %2931 = vmatpush1.bf16.msra.mxu0 %v4414_v14  ;;  %v1343_v14 = vld [vmem:[#allocation7 + $0x458] sm:$0xff] }
 0x3f4   :  { %3017 = vmatpush1.bf16.msra.mxu1 %v4416_v18  ;;  %2932 = vmatprep.subr.bf16.mxu0 %v4423_v22  ;;  %v1347_v18 = vld [vmem:[#allocation7 + $0x478] sm:$0xff]  ;;  %v4472_v22 = vcombine.low %v1335_v3, %v1339_v6 }
 0x3f5   :  { %3018 = vmatprep.subr.bf16.mxu1 %v4425_v25  ;;  %v4479_v25 = vcombine.high %v1342_v11, %v1346_v12  ;;  %v4481_v27 = vcombine.high %v1343_v14, %v1347_v18  ;;  %v1395_v3 = vld [vmem:[#allocation7 + $0x5f8] sm:$0xff] }
 0x3f7   :  { %2933 = vmatpush1.bf16.msra.mxu0 %v4422_v32  ;;  %v1355_v32 = vld [vmem:[#allocation7 + $0x4b8] sm:$0xff] }
 0x3f8   :  { %3019 = vmatpush1.bf16.msra.mxu1 %v4424_v34  ;;  %2934 = vmatprep.subr.bf16.mxu0 %v4431_v35  ;;  %v4478_v34 = vcombine.low %v1342_v11, %v1346_v12  ;;  %v4480_v35 = vcombine.low %v1343_v14, %v1347_v18  ;;  %v4489_v42 = vcombine.high %v1351_v28, %v1355_v32  ;;  %v1402_v11 = vld [vmem:[#allocation7 + $0x630] sm:$0xff]  ;;  %v1399_v12 = vld [vmem:[#allocation7 + $0x618] sm:$0xff] }
 0x3f9   :  { %3020 = vmatprep.subr.bf16.mxu1 %v4433_v36  ;;  %v4487_v36 = vcombine.high %v1350_v26, %v1354_v55  ;;  %v4528_v18 = vcombine.low %v1391_v38, %v1395_v3 }
 0x3fb   :  { %2935 = vmatpush1.bf16.msra.mxu0 %v4430_v53  ;;  %v1363_v53 = vld [vmem:[#allocation7 + $0x4f8] sm:$0xff] }
 0x3fc   :  { %3021 = vmatpush1.bf16.msra.mxu1 %v4432_v54  ;;  %2936 = vmatprep.subr.bf16.mxu0 %v4439_v56  ;;  %v4486_v54 = vcombine.low %v1350_v26, %v1354_v55  ;;  %v4495_v56 = vcombine.high %v1358_v44, %v1362_v46  ;;  %v1406_v26 = vld [vmem:[#allocation7 + $0x650] sm:$0xff] }
 0x3fd   :  { %3022 = vmatprep.subr.bf16.mxu1 %v4441_v49  ;;  %v4497_v49 = vcombine.high %v1359_v52, %v1363_v53  ;;  %v1410_v55 = vld [vmem:[#allocation7 + $0x670] sm:$0xff] }
 0x3ff   :  { %2937 = vmatpush1.bf16.msra.mxu0 %v4438_v45  ;;  %v4496_v45 = vcombine.low %v1359_v52, %v1363_v53  ;;  %v1419_v52 = vld [vmem:[#allocation7 + $0x6b8] sm:$0xff]  ;;  %v4542_v53 = vcombine.low %v1406_v26, %v1410_v55 }
 0x400   :  { %3023 = vmatpush1.bf16.msra.mxu1 %v4440_v0  ;;  %2938 = vmatprep.subr.bf16.mxu0 %v4447_v2  ;;  %v4503_v0 = vcombine.high %v1366_v43, %v1370_v61  ;;  %v4505_v2 = vcombine.high %v1367_v41, %v1371_v62  ;;  %v1426_v43 = vld [vmem:[#allocation7 + $0x6f0] sm:$0xff]  ;;  %v1423_v61 = vld [vmem:[#allocation7 + $0x6d8] sm:$0xff] }
 0x401   :  { %3024 = vmatprep.subr.bf16.mxu1 %v4449_v4  ;;  %v1374_v4 = vld [vmem:[#allocation7 + $0x550] sm:$0xff] }
 0x402   :  { %v4510_v21 = vcombine.low %v1374_v4, %v1378_v5 }
 0x403   :  { %2939 = vmatpush1.bf16.msra.mxu0 %v4446_v63  ;;  %v4504_v63 = vcombine.low %v1367_v41, %v1371_v62  ;;  %v1427_v41 = vld [vmem:[#allocation7 + $0x6f8] sm:$0xff] }
 0x404   :  { %3025 = vmatpush1.bf16.msra.mxu1 %v4448_v29  ;;  %2940 = vmatprep.subr.bf16.mxu0 %v4455_v15  ;;  %v4511_v29 = vcombine.high %v1374_v4, %v1378_v5  ;;  %v4513_v15 = vcombine.high %v1375_v57, %v1379_v60  ;;  %v1434_v4 = vld [vmem:[#allocation7 + $0x730] sm:$0xff]  ;;  %v1431_v5 = vld [vmem:[#allocation7 + $0x718] sm:$0xff] }
 0x405   :  { %3026 = vmatprep.subr.bf16.mxu1 %v4457_v16  ;;  %v1382_v16 = vld [vmem:[#allocation7 + $0x590] sm:$0xff] }
 0x406   :  { %v4518_v6 = vcombine.low %v1382_v16, %v1386_v17 }
 0x407   :  { %2941 = vmatpush1.bf16.msra.mxu0 %v4454_v48  ;;  %v4512_v48 = vcombine.low %v1375_v57, %v1379_v60  ;;  %v1435_v57 = vld [vmem:[#allocation7 + $0x738] sm:$0xff] }
 0x408   :  { %3027 = vmatpush1.bf16.msra.mxu1 %v4456_v50  ;;  %2942 = vmatprep.subr.bf16.mxu0 %v4463_v23  ;;  %v4519_v50 = vcombine.high %v1382_v16, %v1386_v17  ;;  %v4521_v23 = vcombine.high %v1383_v19, %v1387_v20  ;;  %v1442_v16 = vld [vmem:[#allocation7 + $0x770] sm:$0xff]  ;;  %v1439_v17 = vld [vmem:[#allocation7 + $0x758] sm:$0xff] }
 0x409   :  { %3028 = vmatprep.subr.bf16.mxu1 %v4465_v37  ;;  %v1390_v37 = vld [vmem:[#allocation7 + $0x5d0] sm:$0xff] }
 0x40a   :  { %v4526_v14 = vcombine.low %v1390_v37, %v1394_v24 }
 0x40b   :  { %2943 = vmatpush1.bf16.msra.mxu0 %v4462_v7  ;;  %v4520_v7 = vcombine.low %v1383_v19, %v1387_v20  ;;  %v1443_v19 = vld [vmem:[#allocation7 + $0x778] sm:$0xff] }
 0x40c   :  { %3029 = vmatpush1.bf16.msra.mxu1 %v4464_v8  ;;  %2955 = vmatprep.subr.bf16.mxu0 %v4471_v9  ;;  %v4527_v8 = vcombine.high %v1390_v37, %v1394_v24  ;;  %v4529_v9 = vcombine.high %v1391_v38, %v1395_v3  ;;  %v1450_v37 = vld [vmem:[#allocation7 + $0x7b0] sm:$0xff]  ;;  %v1447_v24 = vld [vmem:[#allocation7 + $0x798] sm:$0xff] }
 0x40d   :  { %3041 = vmatprep.subr.bf16.mxu1 %v4473_v10  ;;  %v1398_v10 = vld [vmem:[#allocation7 + $0x610] sm:$0xff]  ;;  %v1451_v38 = vld [vmem:[#allocation7 + $0x7b8] sm:$0xff] }
 0x40e   :  { %2945 = vmatmul.mubr.bf16.vlgmr.msra.gmra.mrb[12].mxu0 %v5422_v58 }
 0x40f   :  { %3031 = vmatmul.mubr.bf16.vlgmr.msra.gmra.mrb[12].mxu1 %v5422_v58  ;;  %2956 = vmatpush1.bf16.msra.mxu0 %v4470_v13  ;;  %v4488_v58 = vcombine.low %v1351_v28, %v1355_v32  ;;  %v1403_v13 = vld [vmem:[#allocation7 + $0x638] sm:$0xff]  ;;  %v4534_v32 = vcombine.low %v1398_v10, %v1402_v11 }
 0x410   :  { %2987 = vmatprep.mubr.bf16.mxu0 %v5424_v59  ;;  %3042 = vmatpush1.bf16.msra.mxu1 %v4472_v22  ;;  %v4535_v22 = vcombine.high %v1398_v10, %v1402_v11  ;;  %v1411_v28 = vld [vmem:[#allocation7 + $0x678] sm:$0xff]  ;;  %v1458_v10 = vld [vmem:[#allocation7 + $0x7f0] sm:$0xff] }
 0x411   :  { %3073 = vmatprep.mubr.bf16.mxu1 %v5424_v59  ;;  %2957 = vmatprep.subr.bf16.mxu0 %v4479_v25  ;;  %v4494_v59 = vcombine.low %v1358_v44, %v1362_v46  ;;  %v4537_v25 = vcombine.high %v1399_v12, %v1403_v13  ;;  %v1418_v44 = vld [vmem:[#allocation7 + $0x6b0] sm:$0xff]  ;;  %v1415_v46 = vld [vmem:[#allocation7 + $0x698] sm:$0xff] }
 0x412   :  { %3043 = vmatprep.subr.bf16.mxu1 %v4481_v27  ;;  %v1407_v27 = vld [vmem:[#allocation7 + $0x658] sm:$0xff] }
 0x413   :  { %2958 = vmatpush1.bf16.msra.mxu0 %v4478_v34  ;;  %v4536_v34 = vcombine.low %v1399_v12, %v1403_v13  ;;  %v1455_v11 = vld [vmem:[#allocation7 + $0x7d8] sm:$0xff] }
 0x414   :  { %3044 = vmatpush1.bf16.msra.mxu1 %v4480_v35  ;;  %2959 = vmatprep.subr.bf16.mxu0 %v4487_v36  ;;  %v4543_v35 = vcombine.high %v1406_v26, %v1410_v55  ;;  %v4545_v36 = vcombine.high %v1407_v27, %v1411_v28  ;;  %v1459_v12 = vld [vmem:[#allocation7 + $0x7f8] sm:$0xff] }
 0x415   :  { %3045 = vmatprep.subr.bf16.mxu1 %v4489_v42  ;;  %v1414_v42 = vld [vmem:[#allocation7 + $0x690] sm:$0xff]  ;;  %v4592_v26 = vcombine.low %v1455_v11, %v1459_v12 }
 0x416   :  { %v4550_v62 = vcombine.low %v1414_v42, %v1418_v44 }
 0x417   :  { %2960 = vmatpush1.bf16.msra.mxu0 %v4486_v54  ;;  %v4544_v54 = vcombine.low %v1407_v27, %v1411_v28 }
 0x418   :  { %3046 = vmatpush1.bf16.msra.mxu1 %v4488_v58  ;;  %2961 = vmatprep.subr.bf16.mxu0 %v4495_v56  ;;  %v4551_v58 = vcombine.high %v1414_v42, %v1418_v44  ;;  %v4553_v56 = vcombine.high %v1415_v46, %v1419_v52 }
 0x419   :  { %3047 = vmatprep.subr.bf16.mxu1 %v4497_v49  ;;  %v1422_v49 = vld [vmem:[#allocation7 + $0x6d0] sm:$0xff] }
 0x41a   :  { %v4558_v60 = vcombine.low %v1422_v49, %v1426_v43 }
 0x41b   :  { %2962 = vmatpush1.bf16.msra.mxu0 %v4494_v59  ;;  %v4552_v59 = vcombine.low %v1415_v46, %v1419_v52 }
 0x41c   :  { %3048 = vmatpush1.bf16.msra.mxu1 %v4496_v45  ;;  %2963 = vmatprep.subr.bf16.mxu0 %v4503_v0  ;;  %v4559_v45 = vcombine.high %v1422_v49, %v1426_v43  ;;  %v4561_v0 = vcombine.high %v1423_v61, %v1427_v41 }
 0x41d   :  { %3049 = vmatprep.subr.bf16.mxu1 %v4505_v2  ;;  %v1430_v2 = vld [vmem:[#allocation7 + $0x710] sm:$0xff] }
 0x41e   :  { %v4566_v20 = vcombine.low %v1430_v2, %v1434_v4 }
 0x41f   :  { %2964 = vmatpush1.bf16.msra.mxu0 %v4502_v30  ;;  %v4560_v30 = vcombine.low %v1423_v61, %v1427_v41 }
 0x420   :  { %3050 = vmatpush1.bf16.msra.mxu1 %v4504_v63  ;;  %2965 = vmatprep.subr.bf16.mxu0 %v4511_v29  ;;  %v4567_v63 = vcombine.high %v1430_v2, %v1434_v4  ;;  %v4569_v29 = vcombine.high %v1431_v5, %v1435_v57 }
 0x421   :  { %3051 = vmatprep.subr.bf16.mxu1 %v4513_v15  ;;  %v1438_v15 = vld [vmem:[#allocation7 + $0x750] sm:$0xff] }
 0x422   :  { %v4574_v3 = vcombine.low %v1438_v15, %v1442_v16 }
 0x423   :  { %2966 = vmatpush1.bf16.msra.mxu0 %v4510_v21  ;;  %v4568_v21 = vcombine.low %v1431_v5, %v1435_v57 }
 0x424   :  { %3052 = vmatpush1.bf16.msra.mxu1 %v4512_v48  ;;  %2967 = vmatprep.subr.bf16.mxu0 %v4519_v50  ;;  %v4575_v48 = vcombine.high %v1438_v15, %v1442_v16  ;;  %v4577_v50 = vcombine.high %v1439_v17, %v1443_v19 }
 0x425   :  { %3053 = vmatprep.subr.bf16.mxu1 %v4521_v23  ;;  %v1446_v23 = vld [vmem:[#allocation7 + $0x790] sm:$0xff] }
 0x426   :  { %v4582_v13 = vcombine.low %v1446_v23, %v1450_v37 }
 0x427   :  { %2968 = vmatpush1.bf16.msra.mxu0 %v4518_v6  ;;  %v4576_v6 = vcombine.low %v1439_v17, %v1443_v19 }
 0x428   :  { %3054 = vmatpush1.bf16.msra.mxu1 %v4520_v7  ;;  %2969 = vmatprep.subr.bf16.mxu0 %v4527_v8  ;;  %v4583_v7 = vcombine.high %v1446_v23, %v1450_v37  ;;  %v4585_v8 = vcombine.high %v1447_v24, %v1451_v38 }
 0x429   :  { %3055 = vmatprep.subr.bf16.mxu1 %v4529_v9  ;;  %v1454_v9 = vld [vmem:[#allocation7 + $0x7d0] sm:$0xff] }
 0x42b   :  { %2970 = vmatpush1.bf16.msra.mxu0 %v4526_v14  ;;  %v4584_v14 = vcombine.low %v1447_v24, %v1451_v38 }
 0x42c   :  { %3056 = vmatpush1.bf16.msra.mxu1 %v4528_v18  ;;  %2971 = vmatprep.subr.bf16.mxu0 %v4535_v22  ;;  %v4591_v18 = vcombine.high %v1454_v9, %v1458_v10  ;;  %v4593_v22 = vcombine.high %v1455_v11, %v1459_v12 }
 0x42d   :  { %3057 = vmatprep.subr.bf16.mxu1 %v4537_v25  ;;  %v4590_v25 = vcombine.low %v1454_v9, %v1458_v10 }
 0x42f   :  { %2972 = vmatpush1.bf16.msra.mxu0 %v4534_v32 }
 0x430   :  { %3058 = vmatpush1.bf16.msra.mxu1 %v4536_v34  ;;  %2973 = vmatprep.subr.bf16.mxu0 %v4543_v35 }
 0x431   :  { %3059 = vmatprep.subr.bf16.mxu1 %v4545_v36 }
 0x433   :  { %2974 = vmatpush1.bf16.msra.mxu0 %v4542_v53 }
 0x434   :  { %3060 = vmatpush1.bf16.msra.mxu1 %v4544_v54  ;;  %2975 = vmatprep.subr.bf16.mxu0 %v4551_v58 }
 0x435   :  { %3061 = vmatprep.subr.bf16.mxu1 %v4553_v56 }
 0x437   :  { %2976 = vmatpush1.bf16.msra.mxu0 %v4550_v62 }
 0x438   :  { %3062 = vmatpush1.bf16.msra.mxu1 %v4552_v59  ;;  %2977 = vmatprep.subr.bf16.mxu0 %v4559_v45 }
 0x439   :  { %3063 = vmatprep.subr.bf16.mxu1 %v4561_v0 }
 0x43b   :  { %2978 = vmatpush1.bf16.msra.mxu0 %v4558_v60 }
 0x43c   :  { %3064 = vmatpush1.bf16.msra.mxu1 %v4560_v30  ;;  %2979 = vmatprep.subr.bf16.mxu0 %v4567_v63 }
 0x43d   :  { %3065 = vmatprep.subr.bf16.mxu1 %v4569_v29 }
 0x43f   :  { %2980 = vmatpush1.bf16.msra.mxu0 %v4566_v20 }
 0x440   :  { %3066 = vmatpush1.bf16.msra.mxu1 %v4568_v21  ;;  %2981 = vmatprep.subr.bf16.mxu0 %v4575_v48 }
 0x441   :  { %3067 = vmatprep.subr.bf16.mxu1 %v4577_v50 }
 0x443   :  { %2982 = vmatpush1.bf16.msra.mxu0 %v4574_v3 }
 0x444   :  { %3068 = vmatpush1.bf16.msra.mxu1 %v4576_v6  ;;  %2983 = vmatprep.subr.bf16.mxu0 %v4583_v7 }
 0x445   :  { %3069 = vmatprep.subr.bf16.mxu1 %v4585_v8 }
 0x447   :  { %2984 = vmatpush1.bf16.msra.mxu0 %v4582_v13 }
 0x448   :  { %3070 = vmatpush1.bf16.msra.mxu1 %v4584_v14  ;;  %2985 = vmatprep.subr.bf16.mxu0 %v4591_v18 }
 0x449   :  { %3071 = vmatprep.subr.bf16.mxu1 %v4593_v22 }
 0x44b   :  { %2986 = vmatpush1.bf16.msra.mxu0 %v4590_v25 }
 0x44c   :  { %3072 = vmatpush1.bf16.msra.mxu1 %v4592_v26 }
 0x44e   :  { %2988 = vmatmul.mubr.bf16.vlgmr.msra.gmra.mrb[12].mxu0 %v5430_v1 }
 0x44f   :  { %3074 = vmatmul.mubr.bf16.vlgmr.msra.gmra.mrb[12].mxu1 %v5430_v1 }
 0x4a1   :  { %v5450_v55 = vpop.f32.mrb[8].mxu0  ;;  %v5452_v27 = vpop.f32.mrb[8].mxu1 }
 0x4a2   :  { %v3084_v28 = vmul.f32 0.125, %v5450_v55  ;;  %v3156_v32 = vmul.f32 %v5450_v55, %v5450_v55  ;;  %v3086_v34 = vmul.f32 0.125, %v5452_v27  ;;  %v3158_v35 = vmul.f32 %v5452_v27, %v5452_v27  ;;  %v5460_v36 = vpop.f32.mrb[9].mxu0  ;;  %v5462_v42 = vpop.f32.mrb[9].mxu1 }
 0x4a3   :  { %v3085_v1 = vmul.f32 0.125, %v5460_v36  ;;  %v3157_v44 = vmul.f32 %v5460_v36, %v5460_v36  ;;  %v3087_v46 = vmul.f32 0.125, %v5462_v42  ;;  %v3159_v52 = vmul.f32 %v5462_v42, %v5462_v42  ;;  %v5470_v53 = vpop.f32.mrb[10].mxu0  ;;  %v5472_v54 = vpop.f32.mrb[10].mxu1 }
 0x4a4   :  { %v3172_v58 = vmul.f32 0.125, %v3156_v32  ;;  %v3174_v56 = vmul.f32 0.125, %v3158_v35  ;;  %v3092_v49 = vmul.f32 0.0, %v5470_v53  ;;  %v3164_v43 = vmul.f32 %v5470_v53, %v5470_v53  ;;  %v5477_v61 = vpop.f32.mrb[11].mxu0  ;;  %v5479_v41 = vpop.f32.mrb[11].mxu1 }
 0x4a5   :  { %v3173_v62 = vmul.f32 0.125, %v3157_v44  ;;  %v3175_v59 = vmul.f32 0.125, %v3159_v52  ;;  %v3094_v45 = vmul.f32 0.0, %v5472_v54  ;;  %v3166_v0 = vmul.f32 %v5472_v54, %v5472_v54 }
 0x4a6   :  { %v3100_v2 = vadd.f32 %v3092_v49, %v3084_v28  ;;  %v3180_v4 = vmul.f32 0.0, %v3164_v43  ;;  %v3093_v5 = vmul.f32 0.0, %v5477_v61  ;;  %v3165_v57 = vmul.f32 %v5477_v61, %v5477_v61 }
 0x4a7   :  { %v3114_v60 = vadd.f32 %v3094_v45, %v3086_v34  ;;  %v3182_v30 = vmul.f32 0.0, %v3166_v0  ;;  %v3095_v63 = vmul.f32 0.0, %v5479_v41  ;;  %v3167_v29 = vmul.f32 %v5479_v41, %v5479_v41 }
 0x4a8   :  { %v3101_v15 = vrot.slane %v3100_v2, 4  ;;  %v3188_v16 = vadd.f32 %v3180_v4, %v3172_v58  ;;  %v3107_v17 = vadd.f32 %v3093_v5, %v3085_v1  ;;  %v3181_v19 = vmul.f32 0.0, %v3165_v57 }
 0x4a9   :  { %v3115_v20 = vrot.slane %v3114_v60, 4  ;;  %v3202_v21 = vadd.f32 %v3182_v30, %v3174_v56  ;;  %v3121_v48 = vadd.f32 %v3095_v63, %v3087_v46  ;;  %v3183_v50 = vmul.f32 0.0, %v3167_v29 }
 0x4aa   :  { %v3102_v23 = vadd.f32 %v3101_v15, %v3100_v2  ;;  %v3189_v37 = vrot.slane %v3188_v16, 4  ;;  %v3108_v24 = vrot.slane %v3107_v17, 4  ;;  %v3195_v38 = vadd.f32 %v3181_v19, %v3173_v62 }
 0x4ab   :  { %v3116_v3 = vadd.f32 %v3115_v20, %v3114_v60  ;;  %v3203_v6 = vrot.slane %v3202_v21, 4  ;;  %v3122_v7 = vrot.slane %v3121_v48, 4  ;;  %v3209_v8 = vadd.f32 %v3183_v50, %v3175_v59 }
 0x4ac   :  { %v3103_v9 = vrot.slane %v3102_v23, 2  ;;  %v3190_v10 = vadd.f32 %v3189_v37, %v3188_v16  ;;  %v3109_v11 = vadd.f32 %v3108_v24, %v3107_v17  ;;  %v3196_v12 = vrot.slane %v3195_v38, 4 }
 0x4ad   :  { %v3117_v13 = vrot.slane %v3116_v3, 2  ;;  %v3204_v14 = vadd.f32 %v3203_v6, %v3202_v21  ;;  %v3123_v18 = vadd.f32 %v3122_v7, %v3121_v48  ;;  %v3210_v22 = vrot.slane %v3209_v8, 4 }
 0x4ae   :  { %v3104_v25 = vadd.f32 %v3103_v9, %v3102_v23  ;;  %v3191_v26 = vrot.slane %v3190_v10, 2  ;;  %v3110_v28 = vrot.slane %v3109_v11, 2  ;;  %v3197_v32 = vadd.f32 %v3196_v12, %v3195_v38 }
 0x4af   :  { %v3118_v34 = vadd.f32 %v3117_v13, %v3116_v3  ;;  %v3205_v35 = vrot.slane %v3204_v14, 2  ;;  %v3124_v1 = vrot.slane %v3123_v18, 2  ;;  %v3211_v44 = vadd.f32 %v3210_v22, %v3209_v8 }
 0x4b0   :  { %v3105_v46 = vrot.slane %v3104_v25, 1  ;;  %v3192_v52 = vadd.f32 %v3191_v26, %v3190_v10  ;;  %v3111_v58 = vadd.f32 %v3110_v28, %v3109_v11  ;;  %v3198_v56 = vrot.slane %v3197_v32, 2 }
 0x4b1   :  { %v3119_v49 = vrot.slane %v3118_v34, 1  ;;  %v3206_v43 = vadd.f32 %v3205_v35, %v3204_v14  ;;  %v3125_v62 = vadd.f32 %v3124_v1, %v3123_v18  ;;  %v3212_v59 = vrot.slane %v3211_v44, 2  ;;  %v4939_v35 = vld [vmem:[#allocation9] sm:$0xff]  }
 0x4b2   :  { %v5490_v45 = vadd.f32 %v3105_v46, %v3104_v25  ;;  %v3193_v0 = vrot.slane %v3192_v52, 1  ;;  %v3112_v2 = vrot.slane %v3111_v58, 1  ;;  %v3199_v4 = vadd.f32 %v3198_v56, %v3197_v32  ;;  %v4937_v32 = vld [vmem:[#allocation9 + $0x40] sm:$0xff]   ;;  %v4942_v46 = vld [vmem:[#allocation9 + $0xc8] sm:$0xff]   ;;  %v4945_v56 = vld [vmem:[#allocation9 + $0x50] sm:$0xff]  }
 0x4b3   :  { %v5492_v5 = vadd.f32 %v3119_v49, %v3118_v34  ;;  %v3207_v57 = vrot.slane %v3206_v43, 1  ;;  %v3126_v60 = vrot.slane %v3125_v62, 1  ;;  %v3213_v30 = vadd.f32 %v3212_v59, %v3211_v44  ;;  %v4938_v34 = vld [vmem:[#allocation9 + $0xc0] sm:$0xff]   ;;  %4668 = vmatprep.subr.bf16.mxu0 %v4937_v32  ;;  %v4941_v44 = vld [vmem:[#allocation9 + $0x48] sm:$0xff]   ;;  %v4946_v49 = vld [vmem:[#allocation9 + $0xd0] sm:$0xff]  }
 0x4b4   :  { %v3194_v63 = vadd.f32 %v3193_v0, %v3192_v52  ;;  %v3244_v29 = vmul.f32 %v5490_v45, %v5490_v45  ;;  %v5496_v15 = vadd.f32 %v3112_v2, %v3111_v58  ;;  %v3200_v16 = vrot.slane %v3199_v4, 1  ;;  %v4940_v1 = vld [vmem:[#allocation9 + $0x80] sm:$0xff]   ;;  %4690 = vmatprep.subr.bf16.mxu1 %v4938_v34  ;;  %4669 = vmatpush3.bf16.msra.mxu0 %v4939_v35  ;;  %v4943_v52 = vld [vmem:[#allocation9 + $0x8] sm:$0xff]   ;;  %v4949_v59 = vld [vmem:[#allocation9 + $0x58] sm:$0xff]  }
 0x4b5   :  { %v3208_v17 = vadd.f32 %v3207_v57, %v3206_v43  ;;  %v3246_v19 = vmul.f32 %v5492_v5, %v5492_v5  ;;  %v5500_v20 = vadd.f32 %v3126_v60, %v3125_v62  ;;  %v3214_v21 = vrot.slane %v3213_v30, 1  ;;  %4691 = vmatpush3.bf16.msra.mxu1 %v4940_v1  ;;  %v4944_v58 = vld [vmem:[#allocation9 + $0x88] sm:$0xff]   ;;  %4670 = vmatprep.subr.bf16.mxu0 %v4941_v44  ;;  %v4947_v43 = vld [vmem:[#allocation9 + $0x10] sm:$0xff]   ;;  %v4950_v0 = vld [vmem:[#allocation9 + $0xd8] sm:$0xff]  }
 0x4b6   :  { %v3252_v48 = vsub.f32 %v3194_v63, %v3244_v29  ;;  %v3201_v50 = vadd.f32 %v3200_v16, %v3199_v4  ;;  %v3245_v23 = vmul.f32 %v5496_v15, %v5496_v15  ;;  %4692 = vmatprep.subr.bf16.mxu1 %v4942_v46  ;;  %v4948_v62 = vld [vmem:[#allocation9 + $0x90] sm:$0xff]   ;;  %v4951_v2 = vld [vmem:[#allocation9 + $0x18] sm:$0xff]   ;;  %v4953_v57 = vld [vmem:[#allocation9 + $0x60] sm:$0xff]  }
 0x4b7   :  { %v3254_v37 = vsub.f32 %v3208_v17, %v3246_v19  ;;  %v3215_v24 = vadd.f32 %v3214_v21, %v3213_v30  ;;  %v3247_v38 = vmul.f32 %v5500_v20, %v5500_v20  ;;  %v4952_v4 = vld [vmem:[#allocation9 + $0x98] sm:$0xff]   ;;  %v4954_v60 = vld [vmem:[#allocation9 + $0xe0] sm:$0xff]   ;;  %v4957_v29 = vld [vmem:[#allocation9 + $0x68] sm:$0xff]  }
 0x4b8   :  { %v3260_v3 = vadd.f32 0.8, %v3252_v48  ;;  %v3253_v6 = vsub.f32 %v3201_v50, %v3245_v23  ;;  %4671 = vmatpush3.bf16.msra.mxu0 %v4943_v52  ;;  %v4955_v30 = vld [vmem:[#allocation9 + $0x20] sm:$0xff]   ;;  %v4958_v16 = vld [vmem:[#allocation9 + $0xe8] sm:$0xff]   ;;  %v4961_v21 = vld [vmem:[#allocation9 + $0x70] sm:$0xff]  }
 0x4b9   :  { %v3262_v7 = vadd.f32 0.8, %v3254_v37  ;;  %v3255_v8 = vsub.f32 %v3215_v24, %v3247_v38  ;;  %4693 = vmatpush3.bf16.msra.mxu1 %v4944_v58  ;;  %4672 = vmatprep.subr.bf16.mxu0 %v4945_v56  ;;  %v4956_v63 = vld [vmem:[#allocation9 + $0xa0] sm:$0xff]   ;;  %v4959_v17 = vld [vmem:[#allocation9 + $0x28] sm:$0xff]   ;;  %v4962_v48 = vld [vmem:[#allocation9 + $0xf0] sm:$0xff]  }
 0x4ba   :  { %5013 = vrsqrt.f32 %v3260_v3  ;;  %v3261_v9 = vadd.f32 0.8, %v3253_v6  ;;  %4694 = vmatprep.subr.bf16.mxu1 %v4946_v49  ;;  %v4960_v19 = vld [vmem:[#allocation9 + $0xa8] sm:$0xff]   ;;  %v4963_v50 = vld [vmem:[#allocation9 + $0x30] sm:$0xff]   ;;  %v4965_v37 = vld [vmem:[#allocation9 + $0x78] sm:$0xff]  }
 0x4bb   :  { %5015 = vrsqrt.f32 %v3262_v7  ;;  %v3263_v10 = vadd.f32 0.8, %v3255_v8  ;;  %v4964_v23 = vld [vmem:[#allocation9 + $0xb0] sm:$0xff]   ;;  %v4966_v24 = vld [vmem:[#allocation9 + $0xf8] sm:$0xff]   ;;  %v4969_v6 = vld [vmem:[#allocation9 + $0x140] sm:$0xff]  }
 0x4bc   :  { %5017 = vrsqrt.f32 %v3261_v9  ;;  %4673 = vmatpush3.bf16.msra.mxu0 %v4947_v43  ;;  %v4967_v38 = vld [vmem:[#allocation9 + $0x38] sm:$0xff]   ;;  %v4970_v7 = vld [vmem:[#allocation9 + $0x1c0] sm:$0xff]  }
 0x4bd   :  { %5019 = vrsqrt.f32 %v3263_v10  ;;  %4695 = vmatpush3.bf16.msra.mxu1 %v4948_v62  ;;  %4674 = vmatprep.subr.bf16.mxu0 %v4949_v59  ;;  %v4968_v3 = vld [vmem:[#allocation9 + $0xb8] sm:$0xff]  }
 0x4be   :  { %4696 = vmatprep.subr.bf16.mxu1 %v4950_v0 }
 0x4c0   :  { %4675 = vmatpush3.bf16.msra.mxu0 %v4951_v2 }
 0x4c1   :  { %4697 = vmatpush3.bf16.msra.mxu1 %v4952_v4  ;;  %4676 = vmatprep.subr.bf16.mxu0 %v4953_v57 }
 0x4c2   :  { %4698 = vmatprep.subr.bf16.mxu1 %v4954_v60 }
 0x4c4   :  { %v5014_v11 = vpop.eup %5013  ;;  %4677 = vmatpush3.bf16.msra.mxu0 %v4955_v30 }
 0x4c5   :  { %v5016_v12 = vpop.eup %5015  ;;  %4699 = vmatpush3.bf16.msra.mxu1 %v4956_v63  ;;  %4678 = vmatprep.subr.bf16.mxu0 %v4957_v29 }
 0x4c6   :  { %v5018_v13 = vpop.eup %5017  ;;  %4700 = vmatprep.subr.bf16.mxu1 %v4958_v16 }
 0x4c7   :  { %v5020_v14 = vpop.eup %5019  ;;  %v3284_v18 = vcombine.low %v5014_v11, %v5018_v13 }
 0x4c8   :  { %v3285_v22 = vcombine.low %v5016_v12, %v5020_v14  ;;  %4679 = vmatpush3.bf16.msra.mxu0 %v4959_v17 }
 0x4c9   :  { %v5507_v25 = vrot.slane %v3284_v18, %v5304_v33  ;;  %4701 = vmatpush3.bf16.msra.mxu1 %v4960_v19  ;;  %4680 = vmatprep.subr.bf16.mxu0 %v4961_v21 }
 0x4ca   :  { %v5510_v26 = vrot.slane %v3285_v22, %v5304_v33  ;;  %4702 = vmatprep.subr.bf16.mxu1 %v4962_v48 }
 0x4cc   :  { %v3316_v28 = vcombine.low %v5507_v25, %v5510_v26  ;;  %4681 = vmatpush3.bf16.msra.mxu0 %v4963_v50 }
 0x4cd   :  { %4703 = vmatpush3.bf16.msra.mxu1 %v4964_v23  ;;  %4682 = vmatprep.subr.bf16.mxu0 %v4965_v37 }
 0x4ce   :  { %4704 = vmatprep.subr.bf16.mxu1 %v4966_v24 }
 0x4d0   :  { %4683 = vmatpush3.bf16.msra.mxu0 %v4967_v38 }
 0x4d1   :  { %4705 = vmatpush3.bf16.msra.mxu1 %v4968_v3  ;;  %4712 = vmatprep.subr.bf16.mxu0 %v4969_v6 }
 0x4d2   :  { %4734 = vmatprep.subr.bf16.mxu1 %v4970_v7 }
 0x521   :  { %v5514_v8 = vpop.f32.mrb[12].mxu0 }
 0x522   :  { %v3088_v9 = vmul.f32 0.125, %v5514_v8  ;;  %v3160_v10 = vmul.f32 %v5514_v8, %v5514_v8  ;;  %v5519_v11 = vpop.f32.mrb[12].mxu1  ;;  %v5521_v12 = vpop.f32.mrb[13].mxu0 }
 0x523   :  { %v3090_v13 = vmul.f32 0.125, %v5519_v11  ;;  %v3162_v14 = vmul.f32 %v5519_v11, %v5519_v11  ;;  %v3089_v18 = vmul.f32 0.125, %v5521_v12  ;;  %v3161_v22 = vmul.f32 %v5521_v12, %v5521_v12  ;;  %v5529_v32 = vpop.f32.mrb[13].mxu1  ;;  %v5531_v34 = vpop.f32.mrb[14].mxu0 }
 0x524   :  { %v3176_v35 = vmul.f32 0.125, %v3160_v10  ;;  %v3091_v1 = vmul.f32 0.125, %v5529_v32  ;;  %v3163_v44 = vmul.f32 %v5529_v32, %v5529_v32  ;;  %v3096_v46 = vmul.f32 0.0, %v5531_v34  ;;  %v5537_v52 = vpop.f32.mrb[14].mxu1  ;;  %v5539_v58 = vpop.f32.mrb[15].mxu0 }
 0x525   :  { %v3178_v56 = vmul.f32 0.125, %v3162_v14  ;;  %v3177_v49 = vmul.f32 0.125, %v3161_v22  ;;  %v3168_v43 = vmul.f32 %v5531_v34, %v5531_v34  ;;  %v3098_v62 = vmul.f32 0.0, %v5537_v52  ;;  %v5544_v59 = vpop.f32.mrb[15].mxu1 }
 0x526   :  { %v3179_v0 = vmul.f32 0.125, %v3163_v44  ;;  %v3128_v2 = vadd.f32 %v3096_v46, %v3088_v9  ;;  %v3170_v4 = vmul.f32 %v5537_v52, %v5537_v52  ;;  %v3097_v57 = vmul.f32 0.0, %v5539_v58 }
 0x527   :  { %v3184_v60 = vmul.f32 0.0, %v3168_v43  ;;  %v3142_v30 = vadd.f32 %v3098_v62, %v3090_v13  ;;  %v3169_v63 = vmul.f32 %v5539_v58, %v5539_v58  ;;  %v3099_v29 = vmul.f32 0.0, %v5544_v59 }
 0x528   :  { %v3129_v16 = vrot.slane %v3128_v2, 4  ;;  %v3186_v17 = vmul.f32 0.0, %v3170_v4  ;;  %v3135_v19 = vadd.f32 %v3097_v57, %v3089_v18  ;;  %v3171_v21 = vmul.f32 %v5544_v59, %v5544_v59 }
 0x529   :  { %v3216_v48 = vadd.f32 %v3184_v60, %v3176_v35  ;;  %v3143_v50 = vrot.slane %v3142_v30, 4  ;;  %v3185_v23 = vmul.f32 0.0, %v3169_v63  ;;  %v3149_v37 = vadd.f32 %v3099_v29, %v3091_v1 }
 0x52a   :  { %v3130_v24 = vadd.f32 %v3129_v16, %v3128_v2  ;;  %v3230_v38 = vadd.f32 %v3186_v17, %v3178_v56  ;;  %v3136_v3 = vrot.slane %v3135_v19, 4  ;;  %v3187_v6 = vmul.f32 0.0, %v3171_v21 }
 0x52b   :  { %v3217_v7 = vrot.slane %v3216_v48, 4  ;;  %v3144_v9 = vadd.f32 %v3143_v50, %v3142_v30  ;;  %v3223_v10 = vadd.f32 %v3185_v23, %v3177_v49  ;;  %v3150_v13 = vrot.slane %v3149_v37, 4 }
 0x52c   :  { %v3131_v14 = vrot.slane %v3130_v24, 2  ;;  %v3231_v22 = vrot.slane %v3230_v38, 4  ;;  %v3137_v44 = vadd.f32 %v3136_v3, %v3135_v19  ;;  %v3237_v46 = vadd.f32 %v3187_v6, %v3179_v0 }
 0x52d   :  { %v3218_v18 = vadd.f32 %v3217_v7, %v3216_v48  ;;  %v3145_v43 = vrot.slane %v3144_v9, 2  ;;  %v3224_v62 = vrot.slane %v3223_v10, 4  ;;  %v3151_v4 = vadd.f32 %v3150_v13, %v3149_v37 }
 0x52e   :  { %v3132_v35 = vadd.f32 %v3131_v14, %v3130_v24  ;;  %v3232_v57 = vadd.f32 %v3231_v22, %v3230_v38  ;;  %v3138_v60 = vrot.slane %v3137_v44, 2  ;;  %v3238_v1 = vrot.slane %v3237_v46, 4 }
 0x52f   :  { %v3219_v2 = vrot.slane %v3218_v18, 2  ;;  %v3146_v56 = vadd.f32 %v3145_v43, %v3144_v9  ;;  %v3225_v63 = vadd.f32 %v3224_v62, %v3223_v10  ;;  %v3152_v29 = vrot.slane %v3151_v4, 2 }
 0x530   :  { %v3133_v16 = vrot.slane %v3132_v35, 1  ;;  %v3233_v30 = vrot.slane %v3232_v57, 2  ;;  %v3139_v49 = vadd.f32 %v3138_v60, %v3137_v44  ;;  %v3239_v17 = vadd.f32 %v3238_v1, %v3237_v46 }
 0x531   :  { %v3220_v21 = vadd.f32 %v3219_v2, %v3218_v18  ;;  %v3147_v50 = vrot.slane %v3146_v56, 1  ;;  %v3226_v19 = vrot.slane %v3225_v63, 2  ;;  %v3153_v0 = vadd.f32 %v3152_v29, %v3151_v4 }
 0x532   :  { %v5554_v48 = vadd.f32 %v3133_v16, %v3132_v35  ;;  %v3234_v23 = vadd.f32 %v3233_v30, %v3232_v57  ;;  %v3140_v37 = vrot.slane %v3139_v49, 1  ;;  %v3240_v24 = vrot.slane %v3239_v17, 2 }
 0x533   :  { %v3221_v38 = vrot.slane %v3220_v21, 1  ;;  %v3148_v3 = vadd.f32 %v3147_v50, %v3146_v56  ;;  %v3227_v6 = vadd.f32 %v3226_v19, %v3225_v63  ;;  %v3154_v7 = vrot.slane %v3153_v0, 1 }
 0x534   :  { %v3248_v9 = vmul.f32 %v5554_v48, %v5554_v48  ;;  %v3235_v10 = vrot.slane %v3234_v23, 1  ;;  %v3141_v13 = vadd.f32 %v3140_v37, %v3139_v49  ;;  %v3241_v14 = vadd.f32 %v3240_v24, %v3239_v17 }
 0x535   :  { %v3222_v22 = vadd.f32 %v3221_v38, %v3220_v21  ;;  %v3250_v44 = vmul.f32 %v3148_v3, %v3148_v3  ;;  %v3228_v46 = vrot.slane %v3227_v6, 1  ;;  %v3155_v18 = vadd.f32 %v3154_v7, %v3153_v0 }
 0x536   :  { %v3236_v43 = vadd.f32 %v3235_v10, %v3234_v23  ;;  %v3249_v62 = vmul.f32 %v3141_v13, %v3141_v13  ;;  %v3242_v4 = vrot.slane %v3241_v14, 1 }
 0x537   :  { %v3256_v35 = vsub.f32 %v3222_v22, %v3248_v9  ;;  %v3229_v57 = vadd.f32 %v3228_v46, %v3227_v6  ;;  %v3251_v60 = vmul.f32 %v3155_v18, %v3155_v18  ;;  %v3324_v6 = vrot.slane %v3316_v28, %v5304_v33  ;;  %v108_v9 = vld [vmem:[%s5635_s6 + $0xe] sm:$0xff] }
 0x538   :  { %v3258_v1 = vsub.f32 %v3236_v43, %v3250_v44  ;;  %v3243_v2 = vadd.f32 %v3242_v4, %v3241_v14  ;;  %v3354_v14 = vsub.s32 4, %v5301_v31  ;;  %v3358_v22 = vsub.s32 5, %v5301_v31 }
 0x539   :  { %v3264_v56 = vadd.f32 0.8, %v3256_v35  ;;  %v3257_v63 = vsub.f32 %v3229_v57, %v3249_v62  ;;  %v3362_v44 = vsub.s32 6, %v5301_v31  ;;  %v3366_v46 = vsub.s32 7, %v5301_v31 }
 0x53a   :  { %v3266_v29 = vadd.f32 0.8, %v3258_v1  ;;  %v3259_v16 = vsub.f32 %v3243_v2, %v3251_v60 }
 0x53b   :  { %5021 = vrsqrt.f32 %v3264_v56  ;;  %v3265_v30 = vadd.f32 0.8, %v3257_v63 }
 0x53c   :  { %5023 = vrsqrt.f32 %v3266_v29  ;;  %v3267_v49 = vadd.f32 0.8, %v3259_v16 }
 0x53d   :  { %5025 = vrsqrt.f32 %v3265_v30 }
 0x53e   :  { %5027 = vrsqrt.f32 %v3267_v49 }
 0x545   :  { %v5022_v17 = vpop.eup %5021 }
 0x546   :  { %v5024_v21 = vpop.eup %5023 }
 0x547   :  { %v5026_v50 = vpop.eup %5025 }
 0x548   :  { %v5028_v19 = vpop.eup %5027  ;;  %v3286_v0 = vcombine.low %v5022_v17, %v5026_v50 }
 0x549   :  { %v3287_v23 = vcombine.low %v5024_v21, %v5028_v19 }
 0x54a   :  { %v3308_v37 = vrot.slane %v3286_v0, %v5304_v33 }
 0x54b   :  { %v3315_v24 = vrot.slane %v3287_v23, %v5304_v33 }
 0x54d   :  { %v3317_v38 = vcombine.low %v3308_v37, %v3315_v24 }
 0x54f   :  { %v3331_v7 = vrot.slane %v3317_v38, %v5304_v33 }
 0x551   :  { %v3332_v10 = vcombine.low %v3324_v6, %v3331_v7 }
 0x553   :  { %v3334_v43 = vmul.f32 %v3332_v10, %v108_v9 }
 0x555   :  { %v3339_v62 = vrot.slane %v3334_v43, %v5312_v39  ;;  %v3343_v25 = vrot.slane %v3334_v43, %v5315_v40  ;;  %v3347_v26 = vrot.slane %v3334_v43, %v5393_v47  ;;  %v3351_v28 = vrot.slane %v3334_v43, %v5396_v51 }
 0x556   :  { %v3355_v4 = vrot.slane %v3334_v43, %v3354_v14  ;;  %v3359_v35 = vrot.slane %v3334_v43, %v3358_v22  ;;  %v3363_v57 = vrot.slane %v3334_v43, %v3362_v44  ;;  %v3367_v60 = vrot.slane %v3334_v43, %v3366_v46 }
 0x557   :  { %v3376_v1 = vmul.f32 %v3339_v62, %v5490_v45  ;;  %v3377_v2 = vmul.f32 %v3343_v25, %v5496_v15  ;;  %v3378_v56 = vmul.f32 %v3347_v26, %v5492_v5  ;;  %v3379_v31 = vmul.f32 %v3351_v28, %v5500_v20 }
 0x558   :  { %v3380_v63 = vmul.f32 %v3355_v4, %v5554_v48  ;;  %v3381_v29 = vmul.f32 %v3359_v35, %v3141_v13  ;;  %v3382_v16 = vmul.f32 %v3363_v57, %v3148_v3  ;;  %v3383_v30 = vmul.f32 %v3367_v60, %v3155_v18 }
 0x559   :  { %v3392_v49 = vcombine.low %v3376_v1, %v3377_v2  ;;  %v3393_v17 = vcombine.low %v3378_v56, %v3379_v31  ;;  %v3458_v21 = vmul.f32 %v3367_v60, %v5544_v59  ;;  %v3444_v50 = vmul.f32 %v3343_v25, %v5460_v36 }
 0x55a   :  { %v3394_v19 = vcombine.low %v3380_v63, %v3381_v29  ;;  %v3395_v0 = vcombine.low %v3382_v16, %v3383_v30  ;;  %v3452_v45 = vmul.f32 %v3343_v25, %v5477_v61  ;;  %v3446_v15 = vmul.f32 %v3351_v28, %v5462_v42 }
 0x55b   :  { %v3402_v5 = vrot.slane %v3392_v49, %v5304_v33  ;;  %v3409_v20 = vrot.slane %v3393_v17, %v5304_v33  ;;  %v3454_v48 = vmul.f32 %v3351_v28, %v5479_v41  ;;  %v3443_v3 = vmul.f32 %v3339_v62, %v5450_v55 }
 0x55c   :  { %v3416_v13 = vrot.slane %v3394_v19, %v5304_v33  ;;  %v3423_v59 = vrot.slane %v3395_v0, %v5304_v33  ;;  %v3451_v36 = vmul.f32 %v3339_v62, %v5470_v53  ;;  %v3445_v18 = vmul.f32 %v3347_v26, %v5452_v27  ;;  %v4971_v0 = vld [vmem:[#allocation9 + $0x100] sm:$0xff]  }
 0x55d   :  { %v3424_v23 = vcombine.low %v3402_v5, %v3409_v20  ;;  %v3453_v61 = vmul.f32 %v3347_v26, %v5472_v54  ;;  %v3448_v42 = vmul.f32 %v3359_v35, %v5521_v12  ;;  %v3456_v37 = vmul.f32 %v3359_v35, %v5539_v58  ;;  %v109_v12 = vld [vmem:[%s5635_s6 + $0x16] sm:$0xff]  ;;  %v4972_v20 = vld [vmem:[#allocation9 + $0x180] sm:$0xff]  }
 0x55e   :  { %v3425_v24 = vcombine.low %v3416_v13, %v3423_v59  ;;  %v3450_v41 = vmul.f32 %v3367_v60, %v5529_v32  ;;  %v3447_v55 = vmul.f32 %v3355_v4, %v5514_v8  ;;  %v3455_v38 = vmul.f32 %v3355_v4, %v5531_v34  ;;  %v4973_v13 = vld [vmem:[#allocation9 + $0x148] sm:$0xff]  }
 0x55f   :  { %v3432_v6 = vrot.slane %v3424_v23, %v5304_v33  ;;  %v5601_v53 = vmul.f32 %v3363_v57, %v5519_v11  ;;  %v5604_v27 = vmul.f32 %v3363_v57, %v5537_v52 }
 0x560   :  { %v3439_v54 = vrot.slane %v3425_v24, %v5304_v33 }
 0x562   :  { %v3440_v58 = vcombine.low %v3432_v6, %v3439_v54 }
 0x564   :  { %v3442_v32 = vsub.f32 %v109_v12, %v3440_v58  ;;  %v4975_v12 = vld [vmem:[#allocation9 + $0x108] sm:$0xff]  }
 0x566   :  { %v3491_v7 = vrot.slane %v3442_v32, %v3366_v46  ;;  %v3467_v8 = vrot.slane %v3442_v32, %v5315_v40  ;;  %v3475_v34 = vrot.slane %v3442_v32, %v5396_v51  ;;  %v3463_v9 = vrot.slane %v3442_v32, %v5312_v39 }
 0x567   :  { %v3471_v11 = vrot.slane %v3442_v32, %v5393_v47  ;;  %v3483_v10 = vrot.slane %v3442_v32, %v3358_v22  ;;  %v3479_v52 = vrot.slane %v3442_v32, %v3354_v14  ;;  %v3487_v43 = vrot.slane %v3442_v32, %v3362_v44  ;;  %v4976_v32 = vld [vmem:[#allocation9 + $0x188] sm:$0xff]  }
 0x568   :  { %v5614_v62 = vadd.f32 %v3491_v7, %v3458_v21  ;;  %v3501_v33 = vadd.f32 %v3467_v8, %v3444_v50  ;;  %v3509_v25 = vadd.f32 %v3467_v8, %v3452_v45  ;;  %v3503_v26 = vadd.f32 %v3475_v34, %v3446_v15 }
 0x569   :  { %v3511_v28 = vadd.f32 %v3475_v34, %v3454_v48  ;;  %v3500_v4 = vadd.f32 %v3463_v9, %v3443_v3  ;;  %v3508_v35 = vadd.f32 %v3463_v9, %v3451_v36  ;;  %v3502_v46 = vadd.f32 %v3471_v11, %v3445_v18 }
 0x56a   :  { %v3531_v40 = vmul.f32 0.2, %v5614_v62  ;;  %v3517_v57 = vmul.f32 0.2, %v3501_v33  ;;  %v3525_v51 = vmul.f32 0.2, %v3509_v25  ;;  %v3510_v60 = vadd.f32 %v3471_v11, %v3453_v61 }
 0x56b   :  { %v3519_v39 = vmul.f32 0.2, %v3503_v26  ;;  %v3527_v1 = vmul.f32 0.2, %v3511_v28  ;;  %v3516_v47 = vmul.f32 0.2, %v3500_v4  ;;  %v3505_v22 = vadd.f32 %v3483_v10, %v3448_v42 }
 0x56c   :  { %v3533_v14 = vmax.f32 %v3501_v33, %v3517_v57  ;;  %v3541_v44 = vmax.f32 %v3509_v25, %v3525_v51  ;;  %v3524_v2 = vmul.f32 0.2, %v3508_v35  ;;  %v3518_v56 = vmul.f32 0.2, %v3502_v46  ;;  %v4974_v61 = vld [vmem:[#allocation9 + $0x1c8] sm:$0xff]   ;;  %v4978_v11 = vld [vmem:[#allocation9 + $0x1d0] sm:$0xff]  }
 0x56d   :  { %v3535_v31 = vmax.f32 %v3503_v26, %v3519_v39  ;;  %v3543_v63 = vmax.f32 %v3511_v28, %v3527_v1  ;;  %v3532_v29 = vmax.f32 %v3500_v4, %v3516_v47  ;;  %v3526_v16 = vmul.f32 0.2, %v3510_v60  ;;  %v4981_v33 = vld [vmem:[#allocation9 + $0x158] sm:$0xff]   ;;  %v4988_v57 = vld [vmem:[#allocation9 + $0x1a0] sm:$0xff]   ;;  %v4989_v51 = vld [vmem:[#allocation9 + $0x168] sm:$0xff]  }
 0x56e   :  { %v3549_v30 = vpack.c.bf16 %v3541_v44, %v3533_v14  ;;  %v3540_v49 = vmax.f32 %v3508_v35, %v3524_v2  ;;  %v3534_v17 = vmax.f32 %v3502_v46, %v3518_v56  ;;  %v3513_v21 = vadd.f32 %v3483_v10, %v3456_v37  ;;  %v4982_v26 = vld [vmem:[#allocation9 + $0x1d8] sm:$0xff]   ;;  %v4985_v35 = vld [vmem:[#allocation9 + $0x160] sm:$0xff]   ;;  %v4991_v39 = vld [vmem:[#allocation9 + $0x128] sm:$0xff]  }
 0x56f   :  { %v3551_v50 = vpack.c.bf16 %v3543_v63, %v3535_v31  ;;  %v3542_v19 = vmax.f32 %v3510_v60, %v3526_v16  ;;  %v3521_v45 = vmul.f32 0.2, %v3505_v22  ;;  %v3507_v15 = vadd.f32 %v3491_v7, %v3450_v41  ;;  %v4977_v7 = vld [vmem:[#allocation9 + $0x150] sm:$0xff]   ;;  %v4983_v28 = vld [vmem:[#allocation9 + $0x118] sm:$0xff]   ;;  %v4986_v46 = vld [vmem:[#allocation9 + $0x1e0] sm:$0xff]  }
 0x570   :  { %4106 = vmatprep.mubr.bf16.mxu0 %v3549_v30  ;;  %v3548_v5 = vpack.c.bf16 %v3540_v49, %v3532_v29  ;;  %v3529_v48 = vmul.f32 0.2, %v3513_v21  ;;  %v3547_v3 = vmax.f32 %v5614_v62, %v3531_v40  ;;  %v3504_v59 = vadd.f32 %v3479_v52, %v3447_v55  ;;  %v4980_v62 = vld [vmem:[#allocation9 + $0x190] sm:$0xff]   ;;  %v4984_v4 = vld [vmem:[#allocation9 + $0x198] sm:$0xff]   ;;  %v4987_v40 = vld [vmem:[#allocation9 + $0x120] sm:$0xff]  }
 0x571   :  { %4147 = vmatprep.mubr.bf16.mxu1 %v3551_v50  ;;  %v3550_v36 = vpack.c.bf16 %v3542_v19, %v3534_v17  ;;  %v3537_v18 = vmax.f32 %v3505_v22, %v3521_v45  ;;  %v3523_v23 = vmul.f32 0.2, %v3507_v15  ;;  %v3512_v42 = vadd.f32 %v3479_v52, %v3455_v38  ;;  %v4979_v52 = vld [vmem:[#allocation9 + $0x110] sm:$0xff]   ;;  %v4990_v60 = vld [vmem:[#allocation9 + $0x1e8] sm:$0xff]   ;;  %v4997_v2 = vld [vmem:[#allocation9 + $0x178] sm:$0xff]  }
 0x572   :  { %4107 = vmatmul.mubr.bf16.vlgmr.msra.gmra.mrb[16].mxu0 %v3548_v5  ;;  %v3545_v37 = vmax.f32 %v3513_v21, %v3529_v48  ;;  %v3520_v24 = vmul.f32 0.2, %v3504_v59  ;;  %v3506_v6 = vadd.f32 %v3487_v43, %v5601_v53  ;;  %v3514_v41 = vadd.f32 %v3487_v43, %v5604_v27  ;;  %v4992_v1 = vld [vmem:[#allocation9 + $0x1a8] sm:$0xff]   ;;  %v4993_v47 = vld [vmem:[#allocation9 + $0x170] sm:$0xff]   ;;  %v4998_v56 = vld [vmem:[#allocation9 + $0x1f8] sm:$0xff]  }
 0x573   :  { %4148 = vmatmul.mubr.bf16.vlgmr.msra.gmra.mrb[16].mxu1 %v3550_v36  ;;  %4713 = vmatpush3.bf16.msra.mxu0 %v4971_v0  ;;  %v3539_v54 = vmax.f32 %v3507_v15, %v3523_v23  ;;  %v3528_v58 = vmul.f32 0.2, %v3512_v42  ;;  %v4994_v22 = vld [vmem:[#allocation9 + $0x1f0] sm:$0xff]   ;;  %v4999_v31 = vld [vmem:[#allocation9 + $0x138] sm:$0xff]   ;;  %v4594_v30 = vld [vmem:[%s5635_s6 + $0x1] ss:$0 sm:$0xff] }
 0x574   :  { %4735 = vmatpush3.bf16.msra.mxu1 %v4972_v20  ;;  %v3553_v55 = vpack.c.bf16 %v3545_v37, %v3537_v18  ;;  %4714 = vmatprep.subr.bf16.mxu0 %v4973_v13  ;;  %v3536_v8 = vmax.f32 %v3504_v59, %v3520_v24  ;;  %v3522_v34 = vmul.f32 0.2, %v3506_v6  ;;  %v3530_v38 = vmul.f32 0.2, %v3514_v41  ;;  %v4995_v14 = vld [vmem:[#allocation9 + $0x130] sm:$0xff]   ;;  %v5000_v63 = vld [vmem:[#allocation9 + $0x1b8] sm:$0xff]  }
 0x575   :  { %v3555_v9 = vpack.c.bf16 %v3547_v3, %v3539_v54  ;;  %4736 = vmatprep.subr.bf16.mxu1 %v4974_v61  ;;  %v3544_v10 = vmax.f32 %v3512_v42, %v3528_v58  ;;  %v4996_v44 = vld [vmem:[#allocation9 + $0x1b0] sm:$0xff]  }
 0x576   :  { %4188 = vmatprep.mubr.bf16.mxu0 %v3553_v55  ;;  %v3538_v53 = vmax.f32 %v3506_v6, %v3522_v34  ;;  %v3546_v27 = vmax.f32 %v3514_v41, %v3530_v38 }
 0x577   :  { %4229 = vmatprep.mubr.bf16.mxu1 %v3555_v9  ;;  %4715 = vmatpush3.bf16.msra.mxu0 %v4975_v12  ;;  %v3552_v43 = vpack.c.bf16 %v3544_v10, %v3536_v8 }
 0x578   :  { %4737 = vmatpush3.bf16.msra.mxu1 %v4976_v32  ;;  %4716 = vmatprep.subr.bf16.mxu0 %v4977_v7  ;;  %v3554_v25 = vpack.c.bf16 %v3546_v27, %v3538_v53 }
 0x579   :  { %4738 = vmatprep.subr.bf16.mxu1 %v4978_v11 }
 0x57b   :  { %4717 = vmatpush3.bf16.msra.mxu0 %v4979_v52 }
 0x57c   :  { %4739 = vmatpush3.bf16.msra.mxu1 %v4980_v62  ;;  %4718 = vmatprep.subr.bf16.mxu0 %v4981_v33 }
 0x57d   :  { %4740 = vmatprep.subr.bf16.mxu1 %v4982_v26 }
 0x57f   :  { %4719 = vmatpush3.bf16.msra.mxu0 %v4983_v28 }
 0x580   :  { %4741 = vmatpush3.bf16.msra.mxu1 %v4984_v4  ;;  %4720 = vmatprep.subr.bf16.mxu0 %v4985_v35 }
 0x581   :  { %4742 = vmatprep.subr.bf16.mxu1 %v4986_v46 }
 0x583   :  { %4721 = vmatpush3.bf16.msra.mxu0 %v4987_v40 }
 0x584   :  { %4743 = vmatpush3.bf16.msra.mxu1 %v4988_v57  ;;  %4722 = vmatprep.subr.bf16.mxu0 %v4989_v51 }
 0x585   :  { %4744 = vmatprep.subr.bf16.mxu1 %v4990_v60 }
 0x587   :  { %4723 = vmatpush3.bf16.msra.mxu0 %v4991_v39 }
 0x588   :  { %4745 = vmatpush3.bf16.msra.mxu1 %v4992_v1  ;;  %4724 = vmatprep.subr.bf16.mxu0 %v4993_v47 }
 0x589   :  { %4746 = vmatprep.subr.bf16.mxu1 %v4994_v22 }
 0x58b   :  { %4725 = vmatpush3.bf16.msra.mxu0 %v4995_v14 }
 0x58c   :  { %4747 = vmatpush3.bf16.msra.mxu1 %v4996_v44  ;;  %4726 = vmatprep.subr.bf16.mxu0 %v4997_v2 }
 0x58d   :  { %4748 = vmatprep.subr.bf16.mxu1 %v4998_v56 }
 0x58f   :  { %4727 = vmatpush3.bf16.msra.mxu0 %v4999_v31 }
 0x590   :  { %4749 = vmatpush3.bf16.msra.mxu1 %v5000_v63 }
 0x592   :  { %4189 = vmatmul.mubr.bf16.vlgmr.msra.gmra.mrb[20].mxu0 %v3552_v43 }
 0x593   :  { %4230 = vmatmul.mubr.bf16.vlgmr.msra.gmra.mrb[20].mxu1 %v3554_v25 }
 0x645   :  { %v4684_v29 = vpop.f32.mrb[16].mxu0 }
 0x646   :  { %v4706_v16 = vpop.f32.mrb[16].mxu1  ;;  %v4685_v49 = vpop.f32.mrb[17].mxu0 }
 0x647   :  { %v4686_v17 = vadd.f32 %v4685_v49, %v4684_v29  ;;  %v4707_v21 = vpop.f32.mrb[17].mxu1  ;;  %v4687_v50 = vpop.f32.mrb[18].mxu0 }
 0x648   :  { %v4708_v19 = vadd.f32 %v4707_v21, %v4706_v16  ;;  %v4709_v0 = vpop.f32.mrb[18].mxu1  ;;  %v4688_v45 = vpop.f32.mrb[19].mxu0 }
 0x649   :  { %v4109_v15 = vadd.f32 %v4686_v17, %v4594_v30  ;;  %v4689_v5 = vadd.f32 %v4688_v45, %v4687_v50  ;;  %v4710_v20 = vpop.f32.mrb[19].mxu1 }
 0x64a   :  { %v4711_v48 = vadd.f32 %v4710_v20, %v4709_v0 }
 0x64b   :  { %v4150_v3 = vadd.f32 %v4708_v19, %v4109_v15  ;;  %v4112_v13 = vadd.f32 %v4689_v5, %v4594_v30 }
 0x64d   :  { %v4153_v59 = vadd.f32 %v4711_v48, %v4112_v13 }
 0x665   :  { %v4728_v36 = vpop.f32.mrb[20].mxu0 }
 0x666   :  { %v4750_v18 = vpop.f32.mrb[20].mxu1  ;;  %v4729_v23 = vpop.f32.mrb[21].mxu0 }
 0x667   :  { %v4730_v61 = vadd.f32 %v4729_v23, %v4728_v36  ;;  %v4751_v42 = vpop.f32.mrb[21].mxu1  ;;  %v4731_v37 = vpop.f32.mrb[22].mxu0 }
 0x668   :  { %v4752_v24 = vadd.f32 %v4751_v42, %v4750_v18  ;;  %v4753_v6 = vpop.f32.mrb[22].mxu1  ;;  %v4732_v41 = vpop.f32.mrb[23].mxu0 }
 0x669   :  { %v4191_v54 = vadd.f32 %v4730_v61, %v4150_v3  ;;  %v4733_v12 = vadd.f32 %v4732_v41, %v4731_v37  ;;  %v4754_v58 = vpop.f32.mrb[23].mxu1 }
 0x66a   :  { %v4755_v55 = vadd.f32 %v4754_v58, %v4753_v6 }
 0x66b   :  { %v4232_v32 = vadd.f32 %v4752_v24, %v4191_v54  ;;  %v4194_v7 = vadd.f32 %v4733_v12, %v4153_v59 }
 0x66d   :  { %5029 = vtanh.f32 %v4232_v32  ;;  %v4235_v8 = vadd.f32 %v4755_v55, %v4194_v7 }
 0x66f   :  { %5031 = vtanh.f32 %v4235_v8 }
 0x677   :  { %v5030_v34 = vpop.eup %5029 }
 0x678   :  { %4240 = vst [vmem:[%s5636_s7] sm:$0xff] %v5030_v34 }
 0x679   :  { %v5032_v38 = vpop.eup %5031 }
 0x67a   :  { %4241 = vst [vmem:[%s5636_s7 + $0x8] sm:$0xff] %v5032_v38 }
 0x67b   :  { %4246 = vsyncpa [#allocation3], 1 }
 0x67c   :  { %4247 = vsyncpa [#allocation5], 1 }
 0x67d   :  { %4248 = vsyncpa [#allocation8], 1 }

</bundles_post_ra>
